<compile_context>
chip_gen: v5e
topology: v5e:2x2
jax: 0.10.0
libtpu: 0.0.40
codegen_flags: <defaults>
</compile_context>

<pallas_src>
import functools

import jax
import jax.numpy as jnp
from jax.experimental import pallas as pl
from jax.experimental.pallas import tpu as pltpu


_VMEM_LIMIT = 32 * 1024 * 1024  # explicit; fits v5e/v6e and v7x's 64 MiB physical VMEM


# ------------------------------ small helpers -------------------------------

def _round_up(x, m):
    return (x + m - 1) // m * m


def _pick_tm(mp):
    # Largest lane tile in {1024, 512, 256} that still yields >= 2 grid steps
    # (keeps both v7x TensorCores busy); fall back to 128 for tiny problems.
    for tm in (1024, 512, 256):
        if _round_up(mp, tm) // tm >= 2:
            return tm
    return 128


def _geom(N, D, H, W):
    """Static per-resolution geometry of the padded-flat voxel layout."""
    Dp, Hp, Wp = D + 2, H + 2, W + 2
    mp = N * Dp * Hp * Wp                      # flat padded voxel count
    R = Hp * Wp + Wp + 1                       # max |tap offset| in the flat index
    tm = _pick_tm(mp)                          # lane tile (voxels per grid step)
    mo = _round_up(mp, tm)                     # lane-dense padded flat length
    wlen = _round_up(tm + 2 * R, 128)          # tile + halo window length
    lx = mo - tm + wlen                        # extended flat length
    return dict(N=N, D=D, H=H, W=W, Dp=Dp, Hp=Hp, Wp=Wp,
                mp=mp, R=R, tm=tm, mo=mo, wlen=wlen, lx=lx)


def _interior_mask(g):
    # 1.0 on real voxels, 0.0 on the zero-padding halo and on the lane-pad tail.
    m = jnp.zeros((g["N"], g["Dp"], g["Hp"], g["Wp"]), jnp.float32)
    m = m.at[:, 1:1 + g["D"], 1:1 + g["H"], 1:1 + g["W"]].set(1.0)
    m = m.reshape(1, g["mp"])
    return jnp.pad(m, ((0, 0), (0, g["mo"] - g["mp"])))


def _flatten_padded(x5, g):
    # (Cp, N, D, H, W) -> (Cp, mo) flat layout with zero halo + zero lane tail.
    cp = x5.shape[0]
    xp = jnp.pad(x5, ((0, 0), (0, 0), (1, 1), (1, 1), (1, 1)))
    flat = xp.reshape(cp, g["mp"])
    return jnp.pad(flat, ((0, 0), (0, g["mo"] - g["mp"])))


def _windows(x_ext, grid, tm, wlen):
    # (Cp, lx) -> (grid, Cp, wlen) overlapping tile+halo windows (host-side gather,
    # ~1.2x duplication instead of the previous 27x im2col).
    idx = jnp.arange(grid)[:, None] * tm + jnp.arange(wlen)[None, :]
    return jnp.transpose(x_ext[:, idx], (1, 0, 2))


# ------------------------------ Pallas kernels ------------------------------

def _conv_kernel(x_ref, w_ref, b_ref, alpha_ref, mask_ref, o_ref, *,
                 offsets, tm, apply_prelu):
    # x_ref:    (1, Cinp, wlen)   tile + halo window (voxels on lanes)
    # w_ref:    (Coutp, 27*Cinp)  weights, tap-major / cin-minor along K
    # b_ref:    (Coutp, 1)
    # alpha_ref:(1,) in SMEM      shared PReLU parameter
    # mask_ref: (1, tm)           interior mask (zeroes halo + tail lanes)
    # o_ref:    (Coutp, tm)       lane-dense output tile
    xw = x_ref[0]                                            # (Cinp, wlen)
    patch = jnp.concatenate([xw[:, off:off + tm] for off in offsets], axis=0)
    y = jnp.dot(w_ref[...], patch, preferred_element_type=jnp.float32)
    y = y + b_ref[...]
    if apply_prelu:
        a = alpha_ref[0]
        y = jnp.where(y >= 0.0, y, a * y)
    o_ref[...] = (y * mask_ref[...]).astype(o_ref.dtype)


def _maxpool_kernel(x_ref, o_ref, *, offsets, tm):
    # 2x2x2 window max expressed as 8 shifted slices of the tile+halo window.
    xw = x_ref[0]                                            # (Cp, wlen)
    y = xw[:, offsets[0]:offsets[0] + tm]
    for off in offsets[1:]:
        y = jnp.maximum(y, xw[:, off:off + tm])
    o_ref[...] = y


# ------------------------------ host wrappers -------------------------------

def conv3d_bias_act(act, mask, w, b, alpha, g, apply_prelu):
    # act: (Cinp, mo) flat activation (halo + tail already zero); w: (Cout, Cin, 3,3,3)
    cin_p = act.shape[0]
    Hp, Wp = g["Hp"], g["Wp"]
    mo, tm, R, wlen, lx = g["mo"], g["tm"], g["R"], g["wlen"], g["lx"]
    grid = mo // tm
    cout = w.shape[0]
    cout_p = _round_up(cout, 8)

    # Weights -> (Coutp, 27*Cinp): rows tap-major (kd,kh,kw), cin-minor; zero-padded.
    wt = jnp.transpose(w, (2, 3, 4, 1, 0)).astype(jnp.float32)       # (3,3,3,Cin,Cout)
    wt = jnp.pad(wt, ((0, 0), (0, 0), (0, 0),
                      (0, cin_p - w.shape[1]), (0, cout_p - cout)))
    w2 = jnp.reshape(wt, (27 * cin_p, cout_p)).T                      # (Coutp, 27*Cinp)
    b2 = jnp.pad(b.astype(jnp.float32), (0, cout_p - cout)).reshape(cout_p, 1)

    # Tile + halo windows (front pad R so every tap offset is non-negative).
    x_ext = jnp.pad(act, ((0, 0), (R, lx - R - mo)))
    x_win = _windows(x_ext, grid, tm, wlen)                           # (grid, Cinp, wlen)

    offsets = tuple(R + (kd - 1) * Hp * Wp + (kh - 1) * Wp + (kw - 1)
                    for kd in range(3) for kh in range(3) for kw in range(3))

    kernel = functools.partial(_conv_kernel, offsets=offsets, tm=tm,
                               apply_prelu=apply_prelu)
    flops = 2 * mo * (27 * cin_p) * cout_p
    bytes_acc = 4 * (x_win.size + w2.size + b2.size + mask.size + cout_p * mo)

    return pl.pallas_call(
        kernel,
        out_shape=jax.ShapeDtypeStruct((cout_p, mo), jnp.float32),
        grid=(grid,),
        in_specs=[
            pl.BlockSpec((1, cin_p, wlen), lambda i: (i, 0, 0)),      # act window
            pl.BlockSpec((cout_p, 27 * cin_p), lambda i: (0, 0)),     # weights (resident)
            pl.BlockSpec((cout_p, 1), lambda i: (0, 0)),              # bias
            pl.BlockSpec(memory_space=pltpu.MemorySpace.SMEM),        # PReLU alpha
            pl.BlockSpec((1, tm), lambda i: (0, i)),                  # interior mask
        ],
        out_specs=pl.BlockSpec((cout_p, tm), lambda i: (0, i)),       # lane-dense out
        compiler_params=pltpu.CompilerParams(
            dimension_semantics=("parallel",),
            vmem_limit_bytes=_VMEM_LIMIT),
        cost_estimate=pl.CostEstimate(flops=flops, transcendentals=0,
                                      bytes_accessed=bytes_acc),
    )(x_win, w2, b2, alpha, mask)


def maxpool3d_2x(act, g):
    # act: (Cp, mo) flat activation at resolution g; returns pooled (Cp, N, Do, Ho, Wo).
    N, D, H, W = g["N"], g["D"], g["H"], g["W"]
    Dp, Hp, Wp = g["Dp"], g["Hp"], g["Wp"]
    mp, mo, tm, R = g["mp"], g["mo"], g["tm"], g["R"]
    cp = act.shape[0]
    grid = mo // tm
    wlen = _round_up(tm + R, 128)
    lx = mo - tm + wlen

    x_ext = jnp.pad(act, ((0, 0), (0, lx - mo)))
    x_win = _windows(x_ext, grid, tm, wlen)                           # (grid, Cp, wlen)
    offsets = tuple(dd * Hp * Wp + dh * Wp + dw
                    for dd in (0, 1) for dh in (0, 1) for dw in (0, 1))

    out = pl.pallas_call(
        functools.partial(_maxpool_kernel, offsets=offsets, tm=tm),
        out_shape=jax.ShapeDtypeStruct((cp, mo), jnp.float32),
        grid=(grid,),
        in_specs=[pl.BlockSpec((1, cp, wlen), lambda i: (i, 0, 0))],
        out_specs=pl.BlockSpec((cp, tm), lambda i: (0, i)),
        compiler_params=pltpu.CompilerParams(
            dimension_semantics=("parallel",),
            vmem_limit_bytes=_VMEM_LIMIT),
        cost_estimate=pl.CostEstimate(flops=7 * cp * mo, transcendentals=0,
                                      bytes_accessed=4 * (x_win.size + cp * mo)),
    )(x_win)

    # Host-side 1/8 subsample back to the pooled grid (floors odd dims like PyTorch).
    Do, Ho, Wo = D // 2, H // 2, W // 2
    y5 = out[:, :mp].reshape(cp, N, Dp, Hp, Wp)
    return y5[:, :, 1:1 + 2 * Do:2, 1:1 + 2 * Ho:2, 1:1 + 2 * Wo:2]


def downscale3d_forward(x_ncdhw, params):
    N, cin, D, H, W = x_ncdhw.shape
    alpha = params["alpha"]
    cp0 = _round_up(cin, 8)
    x5 = jnp.transpose(x_ncdhw, (1, 0, 2, 3, 4)).astype(jnp.float32)  # (C,N,D,H,W)
    x5 = jnp.pad(x5, ((0, cp0 - cin), (0, 0), (0, 0), (0, 0), (0, 0)))

    g1 = _geom(N, D, H, W)
    m1 = _interior_mask(g1)
    x = _flatten_padded(x5, g1)
    x = conv3d_bias_act(x, m1, params["w1"], params["b1"], alpha, g1, True)   # layer1+PReLU
    x = conv3d_bias_act(x, m1, params["w2"], params["b2"], alpha, g1, True)   # layer2+PReLU
    x = conv3d_bias_act(x, m1, params["w7"], params["b7"], alpha, g1, True)   # layer7+PReLU
    x5 = maxpool3d_2x(x, g1)                                                  # layer3

    g2 = _geom(N, D // 2, H // 2, W // 2)
    m2 = _interior_mask(g2)
    x = _flatten_padded(x5, g2)
    x = conv3d_bias_act(x, m2, params["w4"], params["b4"], alpha, g2, True)   # layer4+PReLU
    x5 = maxpool3d_2x(x, g2)                                                  # layer5

    g3 = _geom(N, D // 4, H // 4, W // 4)
    m3 = _interior_mask(g3)
    x = _flatten_padded(x5, g3)
    x = conv3d_bias_act(x, m3, params["w6"], params["b6"], alpha, g3, False)  # layer6

    # (Coutp, mo) -> NCDHW, dropping channel / halo / lane-tail padding.
    Dp, Hp, Wp = g3["Dp"], g3["Hp"], g3["Wp"]
    y = x[:cin, :g3["mp"]].reshape(cin, N, Dp, Hp, Wp)
    y = y[:, :, 1:1 + D // 4, 1:1 + H // 4, 1:1 + W // 4]
    return jnp.transpose(y, (1, 0, 2, 3, 4))


# ------------------------- params / reference / main ------------------------

def init_params(key, in_channels, out_channels, k=3):
    def conv_init(kk, cout, cin):
        kw, kb = jax.random.split(kk)
        fan_in = cin * k * k * k
        w = jax.random.normal(kw, (cout, cin, k, k, k), jnp.float32) / jnp.sqrt(fan_in)
        b = 0.01 * jax.random.normal(kb, (cout,), jnp.float32)
        return w, b

    keys = jax.random.split(key, 5)
    w1, b1 = conv_init(keys[0], out_channels, in_channels)
    w2, b2 = conv_init(keys[1], out_channels * 2, out_channels)
    w7, b7 = conv_init(keys[2], out_channels * 2, out_channels * 2)
    w4, b4 = conv_init(keys[3], out_channels, out_channels * 2)
    w6, b6 = conv_init(keys[4], in_channels, out_channels)
    # torch.nn.PReLU() default: one shared parameter, init 0.25 (used after every conv
    # except the last one, matching the PyTorch forward).
    alpha = jnp.array([0.25], jnp.float32)
    return dict(w1=w1, b1=b1, w2=w2, b2=b2, w7=w7, b7=b7,
                w4=w4, b4=b4, w6=w6, b6=b6, alpha=alpha)


def _ref_conv3d(x_ncdhw, w, b):
    y = jax.lax.conv_general_dilated(
        x_ncdhw, w, window_strides=(1, 1, 1), padding=((1, 1), (1, 1), (1, 1)),
        dimension_numbers=("NCDHW", "OIDHW", "NCDHW"))
    return y + b[None, :, None, None, None]


def _ref_prelu(x, alpha):
    return jnp.where(x >= 0, x, alpha[0] * x)


def _ref_maxpool(x):
    return jax.lax.reduce_window(x, -jnp.inf, jax.lax.max,
                                 (1, 1, 2, 2, 2), (1, 1, 2, 2, 2), "VALID")


def downscale3d_ref(x, p):
    a = p["alpha"]
    x = _ref_prelu(_ref_conv3d(x, p["w1"], p["b1"]), a)
    x = _ref_prelu(_ref_conv3d(x, p["w2"], p["b2"]), a)
    x = _ref_prelu(_ref_conv3d(x, p["w7"], p["b7"]), a)
    x = _ref_maxpool(x)
    x = _ref_prelu(_ref_conv3d(x, p["w4"], p["b4"]), a)
    x = _ref_maxpool(x)
    x = _ref_conv3d(x, p["w6"], p["b6"])
    return x


if __name__ == "__main__":
    key = jax.random.PRNGKey(0)
    k_x, k_p = jax.random.split(key)

    in_channels, out_channels = 2, 4
    N, D, H, W = 2, 8, 8, 8
    x = jax.random.normal(k_x, (N, in_channels, D, H, W), jnp.float32)  # NCDHW
    params = init_params(k_p, in_channels, out_channels)

    fwd = jax.jit(downscale3d_forward)
    out = jax.block_until_ready(fwd(x, params))
    assert out.shape == (N, in_channels, D // 4, H // 4, W // 4), out.shape

    # Both the Pallas path and the XLA reference use default (bf16-pass) MXU
    # precision, hence the slightly widened tolerance.
    ref = jax.block_until_ready(downscale3d_ref(x, params))
    err = float(jnp.max(jnp.abs(out - ref)))
    assert jnp.allclose(out, ref, atol=2e-2, rtol=2e-2), err

    print("KERNEL_OK")
</pallas_src>

<mosaic_0001>
module attributes {stable_mosaic.version = 11 : i64} {
  func.func @_conv_kernel(%arg0: i32, %arg1: memref<1x8x1280xf32, #tpu.memory_space<vmem>>, %arg2: memref<8x216xf32, #tpu.memory_space<vmem>>, %arg3: memref<8x1xf32, #tpu.memory_space<vmem>>, %arg4: memref<1xf32, #tpu.memory_space<smem>>, %arg5: memref<1x1024xf32, #tpu.memory_space<vmem>>, %arg6: memref<8x1024xf32, #tpu.memory_space<vmem>>) attributes {dimension_semantics = [#tpu.dimension_semantics<parallel>], iteration_bounds = array<i64: 2>, scalar_prefetch = 0 : i64, scratch_operands = 0 : i64, tpu.core_type = #tpu.core_type<tc>, window_params = [{transform_indices = @transform_0, window_bounds = array<i64: 1, 8, 1280>}, {pipeline_mode = #tpu.pipeline_mode<synchronous>, transform_indices = @transform_1, window_bounds = array<i64: 8, 216>}, {pipeline_mode = #tpu.pipeline_mode<synchronous>, transform_indices = @transform_2, window_bounds = array<i64: 8, 1>}, {transform_indices = @transform_3, window_bounds = array<i64: 1>}, {transform_indices = @transform_4, window_bounds = array<i64: 1, 1024>}, {transform_indices = @transform_5, window_bounds = array<i64: 8, 1024>}]} {
    %c0 = arith.constant 0 : index
    %c0_0 = arith.constant 0 : index
    %c0_1 = arith.constant 0 : index
    %0 = vector.load %arg1[%c0, %c0_0, %c0_1] : memref<1x8x1280xf32, #tpu.memory_space<vmem>>, vector<1x8x1280xf32>
    %1 = vector.shape_cast %0 : vector<1x8x1280xf32> to vector<8x1280xf32>
    %2 = vector.extract_strided_slice %1 {offsets = [0, 0], sizes = [8, 1024], strides = [1, 1]} : vector<8x1280xf32> to vector<8x1024xf32>
    %3 = vector.extract_strided_slice %1 {offsets = [0, 1], sizes = [8, 1024], strides = [1, 1]} : vector<8x1280xf32> to vector<8x1024xf32>
    %4 = vector.extract_strided_slice %1 {offsets = [0, 2], sizes = [8, 1024], strides = [1, 1]} : vector<8x1280xf32> to vector<8x1024xf32>
    %5 = vector.extract_strided_slice %1 {offsets = [0, 10], sizes = [8, 1024], strides = [1, 1]} : vector<8x1280xf32> to vector<8x1024xf32>
    %6 = vector.extract_strided_slice %1 {offsets = [0, 11], sizes = [8, 1024], strides = [1, 1]} : vector<8x1280xf32> to vector<8x1024xf32>
    %7 = vector.extract_strided_slice %1 {offsets = [0, 12], sizes = [8, 1024], strides = [1, 1]} : vector<8x1280xf32> to vector<8x1024xf32>
    %8 = vector.extract_strided_slice %1 {offsets = [0, 20], sizes = [8, 1024], strides = [1, 1]} : vector<8x1280xf32> to vector<8x1024xf32>
    %9 = vector.extract_strided_slice %1 {offsets = [0, 21], sizes = [8, 1024], strides = [1, 1]} : vector<8x1280xf32> to vector<8x1024xf32>
    %10 = vector.extract_strided_slice %1 {offsets = [0, 22], sizes = [8, 1024], strides = [1, 1]} : vector<8x1280xf32> to vector<8x1024xf32>
    %11 = vector.extract_strided_slice %1 {offsets = [0, 100], sizes = [8, 1024], strides = [1, 1]} : vector<8x1280xf32> to vector<8x1024xf32>
    %12 = vector.extract_strided_slice %1 {offsets = [0, 101], sizes = [8, 1024], strides = [1, 1]} : vector<8x1280xf32> to vector<8x1024xf32>
    %13 = vector.extract_strided_slice %1 {offsets = [0, 102], sizes = [8, 1024], strides = [1, 1]} : vector<8x1280xf32> to vector<8x1024xf32>
    %14 = vector.extract_strided_slice %1 {offsets = [0, 110], sizes = [8, 1024], strides = [1, 1]} : vector<8x1280xf32> to vector<8x1024xf32>
    %15 = vector.extract_strided_slice %1 {offsets = [0, 111], sizes = [8, 1024], strides = [1, 1]} : vector<8x1280xf32> to vector<8x1024xf32>
    %16 = vector.extract_strided_slice %1 {offsets = [0, 112], sizes = [8, 1024], strides = [1, 1]} : vector<8x1280xf32> to vector<8x1024xf32>
    %17 = vector.extract_strided_slice %1 {offsets = [0, 120], sizes = [8, 1024], strides = [1, 1]} : vector<8x1280xf32> to vector<8x1024xf32>
    %18 = vector.extract_strided_slice %1 {offsets = [0, 121], sizes = [8, 1024], strides = [1, 1]} : vector<8x1280xf32> to vector<8x1024xf32>
    %19 = vector.extract_strided_slice %1 {offsets = [0, 122], sizes = [8, 1024], strides = [1, 1]} : vector<8x1280xf32> to vector<8x1024xf32>
    %20 = vector.extract_strided_slice %1 {offsets = [0, 200], sizes = [8, 1024], strides = [1, 1]} : vector<8x1280xf32> to vector<8x1024xf32>
    %21 = vector.extract_strided_slice %1 {offsets = [0, 201], sizes = [8, 1024], strides = [1, 1]} : vector<8x1280xf32> to vector<8x1024xf32>
    %22 = vector.extract_strided_slice %1 {offsets = [0, 202], sizes = [8, 1024], strides = [1, 1]} : vector<8x1280xf32> to vector<8x1024xf32>
    %23 = vector.extract_strided_slice %1 {offsets = [0, 210], sizes = [8, 1024], strides = [1, 1]} : vector<8x1280xf32> to vector<8x1024xf32>
    %24 = vector.extract_strided_slice %1 {offsets = [0, 211], sizes = [8, 1024], strides = [1, 1]} : vector<8x1280xf32> to vector<8x1024xf32>
    %25 = vector.extract_strided_slice %1 {offsets = [0, 212], sizes = [8, 1024], strides = [1, 1]} : vector<8x1280xf32> to vector<8x1024xf32>
    %26 = vector.extract_strided_slice %1 {offsets = [0, 220], sizes = [8, 1024], strides = [1, 1]} : vector<8x1280xf32> to vector<8x1024xf32>
    %27 = vector.extract_strided_slice %1 {offsets = [0, 221], sizes = [8, 1024], strides = [1, 1]} : vector<8x1280xf32> to vector<8x1024xf32>
    %28 = vector.extract_strided_slice %1 {offsets = [0, 222], sizes = [8, 1024], strides = [1, 1]} : vector<8x1280xf32> to vector<8x1024xf32>
    %29 = tpu.concatenate %2, %3, %4, %5, %6, %7, %8, %9, %10, %11, %12, %13, %14, %15, %16, %17 in 0 : vector<8x1024xf32>, vector<8x1024xf32>, vector<8x1024xf32>, vector<8x1024xf32>, vector<8x1024xf32>, vector<8x1024xf32>, vector<8x1024xf32>, vector<8x1024xf32>, vector<8x1024xf32>, vector<8x1024xf32>, vector<8x1024xf32>, vector<8x1024xf32>, vector<8x1024xf32>, vector<8x1024xf32>, vector<8x1024xf32>, vector<8x1024xf32> -> vector<128x1024xf32>
    %30 = tpu.concatenate %18, %19, %20, %21, %22, %23, %24, %25, %26, %27, %28 in 0 : vector<8x1024xf32>, vector<8x1024xf32>, vector<8x1024xf32>, vector<8x1024xf32>, vector<8x1024xf32>, vector<8x1024xf32>, vector<8x1024xf32>, vector<8x1024xf32>, vector<8x1024xf32>, vector<8x1024xf32>, vector<8x1024xf32> -> vector<88x1024xf32>
    %31 = tpu.concatenate %29, %30 in 0 : vector<128x1024xf32>, vector<88x1024xf32> -> vector<216x1024xf32>
    %c0_2 = arith.constant 0 : index
    %c0_3 = arith.constant 0 : index
    %32 = vector.load %arg2[%c0_2, %c0_3] : memref<8x216xf32, #tpu.memory_space<vmem>>, vector<8x216xf32>
    %cst = arith.constant dense<0.000000e+00> : vector<8x1024xf32>
    %33 = tpu.matmul %32, %31, %cst {dimension_numbers = #tpu.dot_dimension_numbers<[1], [0], [0], [1], [0, 0, 1, 1], [], []>} : vector<8x216xf32>, vector<216x1024xf32>, vector<8x1024xf32> -> vector<8x1024xf32>
    %c0_4 = arith.constant 0 : index
    %c0_5 = arith.constant 0 : index
    %34 = vector.load %arg3[%c0_4, %c0_5] : memref<8x1xf32, #tpu.memory_space<vmem>>, vector<8x1xf32>
    %35 = vector.broadcast %34 : vector<8x1xf32> to vector<8x1024xf32>
    %36 = arith.addf %33, %35 : vector<8x1024xf32>
    %c0_6 = arith.constant 0 : index
    %37 = memref.load %arg4[%c0_6] : memref<1xf32, #tpu.memory_space<smem>>
    %cst_7 = arith.constant 0.000000e+00 : f32
    %38 = vector.broadcast %cst_7 : f32 to vector<8x1024xf32>
    %39 = arith.cmpf oge, %36, %38 : vector<8x1024xf32>
    %40 = vector.broadcast %37 : f32 to vector<8x1024xf32>
    %41 = arith.mulf %40, %36 : vector<8x1024xf32>
    %42 = arith.select %39, %36, %41 : vector<8x1024xi1>, vector<8x1024xf32>
    %c0_8 = arith.constant 0 : index
    %c0_9 = arith.constant 0 : index
    %43 = vector.load %arg5[%c0_8, %c0_9] : memref<1x1024xf32, #tpu.memory_space<vmem>>, vector<1x1024xf32>
    %44 = vector.broadcast %43 : vector<1x1024xf32> to vector<8x1024xf32>
    %45 = arith.mulf %42, %44 : vector<8x1024xf32>
    %c0_10 = arith.constant 0 : index
    %c0_11 = arith.constant 0 : index
    %46 = vector.load %arg6[%c0_10, %c0_11] : memref<8x1024xf32, #tpu.memory_space<vmem>>, vector<8x1024xf32>
    tpu.vector_store %arg6[%c0_10, %c0_11], %45 {strides = array<i32>} : memref<8x1024xf32, #tpu.memory_space<vmem>>, vector<8x1024xf32>,
    return
  }
  func.func @transform_0(%arg0: i32) -> (i32, i32, i32) {
    %c0_i32 = arith.constant 0 : i32
    %c0_i32_0 = arith.constant 0 : i32
    %c0_i32_1 = arith.constant 0 : i32
    return %arg0, %c0_i32, %c0_i32_0 : i32, i32, i32
  }
  func.func @transform_1(%arg0: i32) -> (i32, i32) {
    %c0_i32 = arith.constant 0 : i32
    %c0_i32_0 = arith.constant 0 : i32
    %c0_i32_1 = arith.constant 0 : i32
    return %c0_i32, %c0_i32_0 : i32, i32
  }
  func.func @transform_2(%arg0: i32) -> (i32, i32) {
    %c0_i32 = arith.constant 0 : i32
    %c0_i32_0 = arith.constant 0 : i32
    %c0_i32_1 = arith.constant 0 : i32
    return %c0_i32, %c0_i32_0 : i32, i32
  }
  func.func @transform_3(%arg0: i32) -> i32 {
    %c0_i32 = arith.constant 0 : i32
    %c0_i32_0 = arith.constant 0 : i32
    return %c0_i32 : i32
  }
  func.func @transform_4(%arg0: i32) -> (i32, i32) {
    %c0_i32 = arith.constant 0 : i32
    %c0_i32_0 = arith.constant 0 : i32
    return %c0_i32, %arg0 : i32, i32
  }
  func.func @transform_5(%arg0: i32) -> (i32, i32) {
    %c0_i32 = arith.constant 0 : i32
    %c0_i32_0 = arith.constant 0 : i32
    return %c0_i32, %arg0 : i32, i32
  }
}

module attributes {stable_mosaic.version = 11 : i64} {
  func.func @_maxpool_kernel(%arg0: i32, %arg1: memref<1x8x1152xf32, #tpu.memory_space<vmem>>, %arg2: memref<8x1024xf32, #tpu.memory_space<vmem>>) attributes {dimension_semantics = [#tpu.dimension_semantics<parallel>], iteration_bounds = array<i64: 2>, scalar_prefetch = 0 : i64, scratch_operands = 0 : i64, tpu.core_type = #tpu.core_type<tc>, window_params = [{transform_indices = @transform_0, window_bounds = array<i64: 1, 8, 1152>}, {transform_indices = @transform_1, window_bounds = array<i64: 8, 1024>}]} {
    %c0 = arith.constant 0 : index
    %c0_0 = arith.constant 0 : index
    %c0_1 = arith.constant 0 : index
    %0 = vector.load %arg1[%c0, %c0_0, %c0_1] : memref<1x8x1152xf32, #tpu.memory_space<vmem>>, vector<1x8x1152xf32>
    %1 = vector.shape_cast %0 : vector<1x8x1152xf32> to vector<8x1152xf32>
    %2 = vector.extract_strided_slice %1 {offsets = [0, 0], sizes = [8, 1024], strides = [1, 1]} : vector<8x1152xf32> to vector<8x1024xf32>
    %3 = vector.extract_strided_slice %1 {offsets = [0, 1], sizes = [8, 1024], strides = [1, 1]} : vector<8x1152xf32> to vector<8x1024xf32>
    %4 = arith.maximumf %2, %3 : vector<8x1024xf32>
    %5 = vector.extract_strided_slice %1 {offsets = [0, 10], sizes = [8, 1024], strides = [1, 1]} : vector<8x1152xf32> to vector<8x1024xf32>
    %6 = arith.maximumf %4, %5 : vector<8x1024xf32>
    %7 = vector.extract_strided_slice %1 {offsets = [0, 11], sizes = [8, 1024], strides = [1, 1]} : vector<8x1152xf32> to vector<8x1024xf32>
    %8 = arith.maximumf %6, %7 : vector<8x1024xf32>
    %9 = vector.extract_strided_slice %1 {offsets = [0, 100], sizes = [8, 1024], strides = [1, 1]} : vector<8x1152xf32> to vector<8x1024xf32>
    %10 = arith.maximumf %8, %9 : vector<8x1024xf32>
    %11 = vector.extract_strided_slice %1 {offsets = [0, 101], sizes = [8, 1024], strides = [1, 1]} : vector<8x1152xf32> to vector<8x1024xf32>
    %12 = arith.maximumf %10, %11 : vector<8x1024xf32>
    %13 = vector.extract_strided_slice %1 {offsets = [0, 110], sizes = [8, 1024], strides = [1, 1]} : vector<8x1152xf32> to vector<8x1024xf32>
    %14 = arith.maximumf %12, %13 : vector<8x1024xf32>
    %15 = vector.extract_strided_slice %1 {offsets = [0, 111], sizes = [8, 1024], strides = [1, 1]} : vector<8x1152xf32> to vector<8x1024xf32>
    %16 = arith.maximumf %14, %15 : vector<8x1024xf32>
    %c0_2 = arith.constant 0 : index
    %c0_3 = arith.constant 0 : index
    %17 = vector.load %arg2[%c0_2, %c0_3] : memref<8x1024xf32, #tpu.memory_space<vmem>>, vector<8x1024xf32>
    tpu.vector_store %arg2[%c0_2, %c0_3], %16 {strides = array<i32>} : memref<8x1024xf32, #tpu.memory_space<vmem>>, vector<8x1024xf32>,
    return
  }
  func.func @transform_0(%arg0: i32) -> (i32, i32, i32) {
    %c0_i32 = arith.constant 0 : i32
    %c0_i32_0 = arith.constant 0 : i32
    %c0_i32_1 = arith.constant 0 : i32
    return %arg0, %c0_i32, %c0_i32_0 : i32, i32, i32
  }
  func.func @transform_1(%arg0: i32) -> (i32, i32) {
    %c0_i32 = arith.constant 0 : i32
    %c0_i32_0 = arith.constant 0 : i32
    return %c0_i32, %arg0 : i32, i32
  }
}

module attributes {stable_mosaic.version = 11 : i64} {
  func.func @_conv_kernel(%arg0: i32, %arg1: memref<1x8x384xf32, #tpu.memory_space<vmem>>, %arg2: memref<8x216xf32, #tpu.memory_space<vmem>>, %arg3: memref<8x1xf32, #tpu.memory_space<vmem>>, %arg4: memref<1xf32, #tpu.memory_space<smem>>, %arg5: memref<1x256xf32, #tpu.memory_space<vmem>>, %arg6: memref<8x256xf32, #tpu.memory_space<vmem>>) attributes {dimension_semantics = [#tpu.dimension_semantics<parallel>], iteration_bounds = array<i64: 2>, scalar_prefetch = 0 : i64, scratch_operands = 0 : i64, tpu.core_type = #tpu.core_type<tc>, window_params = [{transform_indices = @transform_0, window_bounds = array<i64: 1, 8, 384>}, {pipeline_mode = #tpu.pipeline_mode<synchronous>, transform_indices = @transform_1, window_bounds = array<i64: 8, 216>}, {pipeline_mode = #tpu.pipeline_mode<synchronous>, transform_indices = @transform_2, window_bounds = array<i64: 8, 1>}, {transform_indices = @transform_3, window_bounds = array<i64: 1>}, {transform_indices = @transform_4, window_bounds = array<i64: 1, 256>}, {transform_indices = @transform_5, window_bounds = array<i64: 8, 256>}]} {
    %c0 = arith.constant 0 : index
    %c0_0 = arith.constant 0 : index
    %c0_1 = arith.constant 0 : index
    %0 = vector.load %arg1[%c0, %c0_0, %c0_1] : memref<1x8x384xf32, #tpu.memory_space<vmem>>, vector<1x8x384xf32>
    %1 = vector.shape_cast %0 : vector<1x8x384xf32> to vector<8x384xf32>
    %2 = vector.extract_strided_slice %1 {offsets = [0, 0], sizes = [8, 256], strides = [1, 1]} : vector<8x384xf32> to vector<8x256xf32>
    %3 = vector.extract_strided_slice %1 {offsets = [0, 1], sizes = [8, 256], strides = [1, 1]} : vector<8x384xf32> to vector<8x256xf32>
    %4 = vector.extract_strided_slice %1 {offsets = [0, 2], sizes = [8, 256], strides = [1, 1]} : vector<8x384xf32> to vector<8x256xf32>
    %5 = vector.extract_strided_slice %1 {offsets = [0, 6], sizes = [8, 256], strides = [1, 1]} : vector<8x384xf32> to vector<8x256xf32>
    %6 = vector.extract_strided_slice %1 {offsets = [0, 7], sizes = [8, 256], strides = [1, 1]} : vector<8x384xf32> to vector<8x256xf32>
    %7 = vector.extract_strided_slice %1 {offsets = [0, 8], sizes = [8, 256], strides = [1, 1]} : vector<8x384xf32> to vector<8x256xf32>
    %8 = vector.extract_strided_slice %1 {offsets = [0, 12], sizes = [8, 256], strides = [1, 1]} : vector<8x384xf32> to vector<8x256xf32>
    %9 = vector.extract_strided_slice %1 {offsets = [0, 13], sizes = [8, 256], strides = [1, 1]} : vector<8x384xf32> to vector<8x256xf32>
    %10 = vector.extract_strided_slice %1 {offsets = [0, 14], sizes = [8, 256], strides = [1, 1]} : vector<8x384xf32> to vector<8x256xf32>
    %11 = vector.extract_strided_slice %1 {offsets = [0, 36], sizes = [8, 256], strides = [1, 1]} : vector<8x384xf32> to vector<8x256xf32>
    %12 = vector.extract_strided_slice %1 {offsets = [0, 37], sizes = [8, 256], strides = [1, 1]} : vector<8x384xf32> to vector<8x256xf32>
    %13 = vector.extract_strided_slice %1 {offsets = [0, 38], sizes = [8, 256], strides = [1, 1]} : vector<8x384xf32> to vector<8x256xf32>
    %14 = vector.extract_strided_slice %1 {offsets = [0, 42], sizes = [8, 256], strides = [1, 1]} : vector<8x384xf32> to vector<8x256xf32>
    %15 = vector.extract_strided_slice %1 {offsets = [0, 43], sizes = [8, 256], strides = [1, 1]} : vector<8x384xf32> to vector<8x256xf32>
    %16 = vector.extract_strided_slice %1 {offsets = [0, 44], sizes = [8, 256], strides = [1, 1]} : vector<8x384xf32> to vector<8x256xf32>
    %17 = vector.extract_strided_slice %1 {offsets = [0, 48], sizes = [8, 256], strides = [1, 1]} : vector<8x384xf32> to vector<8x256xf32>
    %18 = vector.extract_strided_slice %1 {offsets = [0, 49], sizes = [8, 256], strides = [1, 1]} : vector<8x384xf32> to vector<8x256xf32>
    %19 = vector.extract_strided_slice %1 {offsets = [0, 50], sizes = [8, 256], strides = [1, 1]} : vector<8x384xf32> to vector<8x256xf32>
    %20 = vector.extract_strided_slice %1 {offsets = [0, 72], sizes = [8, 256], strides = [1, 1]} : vector<8x384xf32> to vector<8x256xf32>
    %21 = vector.extract_strided_slice %1 {offsets = [0, 73], sizes = [8, 256], strides = [1, 1]} : vector<8x384xf32> to vector<8x256xf32>
    %22 = vector.extract_strided_slice %1 {offsets = [0, 74], sizes = [8, 256], strides = [1, 1]} : vector<8x384xf32> to vector<8x256xf32>
    %23 = vector.extract_strided_slice %1 {offsets = [0, 78], sizes = [8, 256], strides = [1, 1]} : vector<8x384xf32> to vector<8x256xf32>
    %24 = vector.extract_strided_slice %1 {offsets = [0, 79], sizes = [8, 256], strides = [1, 1]} : vector<8x384xf32> to vector<8x256xf32>
    %25 = vector.extract_strided_slice %1 {offsets = [0, 80], sizes = [8, 256], strides = [1, 1]} : vector<8x384xf32> to vector<8x256xf32>
    %26 = vector.extract_strided_slice %1 {offsets = [0, 84], sizes = [8, 256], strides = [1, 1]} : vector<8x384xf32> to vector<8x256xf32>
    %27 = vector.extract_strided_slice %1 {offsets = [0, 85], sizes = [8, 256], strides = [1, 1]} : vector<8x384xf32> to vector<8x256xf32>
    %28 = vector.extract_strided_slice %1 {offsets = [0, 86], sizes = [8, 256], strides = [1, 1]} : vector<8x384xf32> to vector<8x256xf32>
    %29 = tpu.concatenate %2, %3, %4, %5, %6, %7, %8, %9, %10, %11, %12, %13, %14, %15, %16, %17 in 0 : vector<8x256xf32>, vector<8x256xf32>, vector<8x256xf32>, vector<8x256xf32>, vector<8x256xf32>, vector<8x256xf32>, vector<8x256xf32>, vector<8x256xf32>, vector<8x256xf32>, vector<8x256xf32>, vector<8x256xf32>, vector<8x256xf32>, vector<8x256xf32>, vector<8x256xf32>, vector<8x256xf32>, vector<8x256xf32> -> vector<128x256xf32>
    %30 = tpu.concatenate %18, %19, %20, %21, %22, %23, %24, %25, %26, %27, %28 in 0 : vector<8x256xf32>, vector<8x256xf32>, vector<8x256xf32>, vector<8x256xf32>, vector<8x256xf32>, vector<8x256xf32>, vector<8x256xf32>, vector<8x256xf32>, vector<8x256xf32>, vector<8x256xf32>, vector<8x256xf32> -> vector<88x256xf32>
    %31 = tpu.concatenate %29, %30 in 0 : vector<128x256xf32>, vector<88x256xf32> -> vector<216x256xf32>
    %c0_2 = arith.constant 0 : index
    %c0_3 = arith.constant 0 : index
    %32 = vector.load %arg2[%c0_2, %c0_3] : memref<8x216xf32, #tpu.memory_space<vmem>>, vector<8x216xf32>
    %cst = arith.constant dense<0.000000e+00> : vector<8x256xf32>
    %33 = tpu.matmul %32, %31, %cst {dimension_numbers = #tpu.dot_dimension_numbers<[1], [0], [0], [1], [0, 0, 1, 1], [], []>} : vector<8x216xf32>, vector<216x256xf32>, vector<8x256xf32> -> vector<8x256xf32>
    %c0_4 = arith.constant 0 : index
    %c0_5 = arith.constant 0 : index
    %34 = vector.load %arg3[%c0_4, %c0_5] : memref<8x1xf32, #tpu.memory_space<vmem>>, vector<8x1xf32>
    %35 = vector.broadcast %34 : vector<8x1xf32> to vector<8x256xf32>
    %36 = arith.addf %33, %35 : vector<8x256xf32>
    %c0_6 = arith.constant 0 : index
    %37 = memref.load %arg4[%c0_6] : memref<1xf32, #tpu.memory_space<smem>>
    %cst_7 = arith.constant 0.000000e+00 : f32
    %38 = vector.broadcast %cst_7 : f32 to vector<8x256xf32>
    %39 = arith.cmpf oge, %36, %38 : vector<8x256xf32>
    %40 = vector.broadcast %37 : f32 to vector<8x256xf32>
    %41 = arith.mulf %40, %36 : vector<8x256xf32>
    %42 = arith.select %39, %36, %41 : vector<8x256xi1>, vector<8x256xf32>
    %c0_8 = arith.constant 0 : index
    %c0_9 = arith.constant 0 : index
    %43 = vector.load %arg5[%c0_8, %c0_9] : memref<1x256xf32, #tpu.memory_space<vmem>>, vector<1x256xf32>
    %44 = vector.broadcast %43 : vector<1x256xf32> to vector<8x256xf32>
    %45 = arith.mulf %42, %44 : vector<8x256xf32>
    %c0_10 = arith.constant 0 : index
    %c0_11 = arith.constant 0 : index
    %46 = vector.load %arg6[%c0_10, %c0_11] : memref<8x256xf32, #tpu.memory_space<vmem>>, vector<8x256xf32>
    tpu.vector_store %arg6[%c0_10, %c0_11], %45 {strides = array<i32>} : memref<8x256xf32, #tpu.memory_space<vmem>>, vector<8x256xf32>,
    return
  }
  func.func @transform_0(%arg0: i32) -> (i32, i32, i32) {
    %c0_i32 = arith.constant 0 : i32
    %c0_i32_0 = arith.constant 0 : i32
    %c0_i32_1 = arith.constant 0 : i32
    return %arg0, %c0_i32, %c0_i32_0 : i32, i32, i32
  }
  func.func @transform_1(%arg0: i32) -> (i32, i32) {
    %c0_i32 = arith.constant 0 : i32
    %c0_i32_0 = arith.constant 0 : i32
    %c0_i32_1 = arith.constant 0 : i32
    return %c0_i32, %c0_i32_0 : i32, i32
  }
  func.func @transform_2(%arg0: i32) -> (i32, i32) {
    %c0_i32 = arith.constant 0 : i32
    %c0_i32_0 = arith.constant 0 : i32
    %c0_i32_1 = arith.constant 0 : i32
    return %c0_i32, %c0_i32_0 : i32, i32
  }
  func.func @transform_3(%arg0: i32) -> i32 {
    %c0_i32 = arith.constant 0 : i32
    %c0_i32_0 = arith.constant 0 : i32
    return %c0_i32 : i32
  }
  func.func @transform_4(%arg0: i32) -> (i32, i32) {
    %c0_i32 = arith.constant 0 : i32
    %c0_i32_0 = arith.constant 0 : i32
    return %c0_i32, %arg0 : i32, i32
  }
  func.func @transform_5(%arg0: i32) -> (i32, i32) {
    %c0_i32 = arith.constant 0 : i32
    %c0_i32_0 = arith.constant 0 : i32
    return %c0_i32, %arg0 : i32, i32
  }
}

module attributes {stable_mosaic.version = 11 : i64} {
  func.func @_maxpool_kernel(%arg0: i32, %arg1: memref<1x8x384xf32, #tpu.memory_space<vmem>>, %arg2: memref<8x256xf32, #tpu.memory_space<vmem>>) attributes {dimension_semantics = [#tpu.dimension_semantics<parallel>], iteration_bounds = array<i64: 2>, scalar_prefetch = 0 : i64, scratch_operands = 0 : i64, tpu.core_type = #tpu.core_type<tc>, window_params = [{transform_indices = @transform_0, window_bounds = array<i64: 1, 8, 384>}, {transform_indices = @transform_1, window_bounds = array<i64: 8, 256>}]} {
    %c0 = arith.constant 0 : index
    %c0_0 = arith.constant 0 : index
    %c0_1 = arith.constant 0 : index
    %0 = vector.load %arg1[%c0, %c0_0, %c0_1] : memref<1x8x384xf32, #tpu.memory_space<vmem>>, vector<1x8x384xf32>
    %1 = vector.shape_cast %0 : vector<1x8x384xf32> to vector<8x384xf32>
    %2 = vector.extract_strided_slice %1 {offsets = [0, 0], sizes = [8, 256], strides = [1, 1]} : vector<8x384xf32> to vector<8x256xf32>
    %3 = vector.extract_strided_slice %1 {offsets = [0, 1], sizes = [8, 256], strides = [1, 1]} : vector<8x384xf32> to vector<8x256xf32>
    %4 = arith.maximumf %2, %3 : vector<8x256xf32>
    %5 = vector.extract_strided_slice %1 {offsets = [0, 6], sizes = [8, 256], strides = [1, 1]} : vector<8x384xf32> to vector<8x256xf32>
    %6 = arith.maximumf %4, %5 : vector<8x256xf32>
    %7 = vector.extract_strided_slice %1 {offsets = [0, 7], sizes = [8, 256], strides = [1, 1]} : vector<8x384xf32> to vector<8x256xf32>
    %8 = arith.maximumf %6, %7 : vector<8x256xf32>
    %9 = vector.extract_strided_slice %1 {offsets = [0, 36], sizes = [8, 256], strides = [1, 1]} : vector<8x384xf32> to vector<8x256xf32>
    %10 = arith.maximumf %8, %9 : vector<8x256xf32>
    %11 = vector.extract_strided_slice %1 {offsets = [0, 37], sizes = [8, 256], strides = [1, 1]} : vector<8x384xf32> to vector<8x256xf32>
    %12 = arith.maximumf %10, %11 : vector<8x256xf32>
    %13 = vector.extract_strided_slice %1 {offsets = [0, 42], sizes = [8, 256], strides = [1, 1]} : vector<8x384xf32> to vector<8x256xf32>
    %14 = arith.maximumf %12, %13 : vector<8x256xf32>
    %15 = vector.extract_strided_slice %1 {offsets = [0, 43], sizes = [8, 256], strides = [1, 1]} : vector<8x384xf32> to vector<8x256xf32>
    %16 = arith.maximumf %14, %15 : vector<8x256xf32>
    %c0_2 = arith.constant 0 : index
    %c0_3 = arith.constant 0 : index
    %17 = vector.load %arg2[%c0_2, %c0_3] : memref<8x256xf32, #tpu.memory_space<vmem>>, vector<8x256xf32>
    tpu.vector_store %arg2[%c0_2, %c0_3], %16 {strides = array<i32>} : memref<8x256xf32, #tpu.memory_space<vmem>>, vector<8x256xf32>,
    return
  }
  func.func @transform_0(%arg0: i32) -> (i32, i32, i32) {
    %c0_i32 = arith.constant 0 : i32
    %c0_i32_0 = arith.constant 0 : i32
    %c0_i32_1 = arith.constant 0 : i32
    return %arg0, %c0_i32, %c0_i32_0 : i32, i32, i32
  }
  func.func @transform_1(%arg0: i32) -> (i32, i32) {
    %c0_i32 = arith.constant 0 : i32
    %c0_i32_0 = arith.constant 0 : i32
    return %c0_i32, %arg0 : i32, i32
  }
}

module attributes {stable_mosaic.version = 11 : i64} {
  func.func @_conv_kernel(%arg0: i32, %arg1: memref<1x8x256xf32, #tpu.memory_space<vmem>>, %arg2: memref<8x216xf32, #tpu.memory_space<vmem>>, %arg3: memref<8x1xf32, #tpu.memory_space<vmem>>, %arg4: memref<1xf32, #tpu.memory_space<smem>>, %arg5: memref<1x128xf32, #tpu.memory_space<vmem>>, %arg6: memref<8x128xf32, #tpu.memory_space<vmem>>) attributes {dimension_semantics = [#tpu.dimension_semantics<parallel>], iteration_bounds = array<i64: 1>, scalar_prefetch = 0 : i64, scratch_operands = 0 : i64, tpu.core_type = #tpu.core_type<tc>, window_params = [{transform_indices = @transform_0, window_bounds = array<i64: 1, 8, 256>}, {pipeline_mode = #tpu.pipeline_mode<synchronous>, transform_indices = @transform_1, window_bounds = array<i64: 8, 216>}, {pipeline_mode = #tpu.pipeline_mode<synchronous>, transform_indices = @transform_2, window_bounds = array<i64: 8, 1>}, {transform_indices = @transform_3, window_bounds = array<i64: 1>}, {transform_indices = @transform_4, window_bounds = array<i64: 1, 128>}, {transform_indices = @transform_5, window_bounds = array<i64: 8, 128>}]} {
    %c0 = arith.constant 0 : index
    %c0_0 = arith.constant 0 : index
    %c0_1 = arith.constant 0 : index
    %0 = vector.load %arg1[%c0, %c0_0, %c0_1] : memref<1x8x256xf32, #tpu.memory_space<vmem>>, vector<1x8x256xf32>
    %1 = vector.shape_cast %0 : vector<1x8x256xf32> to vector<8x256xf32>
    %2 = vector.extract_strided_slice %1 {offsets = [0, 0], sizes = [8, 128], strides = [1, 1]} : vector<8x256xf32> to vector<8x128xf32>
    %3 = vector.extract_strided_slice %1 {offsets = [0, 1], sizes = [8, 128], strides = [1, 1]} : vector<8x256xf32> to vector<8x128xf32>
    %4 = vector.extract_strided_slice %1 {offsets = [0, 2], sizes = [8, 128], strides = [1, 1]} : vector<8x256xf32> to vector<8x128xf32>
    %5 = vector.extract_strided_slice %1 {offsets = [0, 4], sizes = [8, 128], strides = [1, 1]} : vector<8x256xf32> to vector<8x128xf32>
    %6 = vector.extract_strided_slice %1 {offsets = [0, 5], sizes = [8, 128], strides = [1, 1]} : vector<8x256xf32> to vector<8x128xf32>
    %7 = vector.extract_strided_slice %1 {offsets = [0, 6], sizes = [8, 128], strides = [1, 1]} : vector<8x256xf32> to vector<8x128xf32>
    %8 = vector.extract_strided_slice %1 {offsets = [0, 8], sizes = [8, 128], strides = [1, 1]} : vector<8x256xf32> to vector<8x128xf32>
    %9 = vector.extract_strided_slice %1 {offsets = [0, 9], sizes = [8, 128], strides = [1, 1]} : vector<8x256xf32> to vector<8x128xf32>
    %10 = vector.extract_strided_slice %1 {offsets = [0, 10], sizes = [8, 128], strides = [1, 1]} : vector<8x256xf32> to vector<8x128xf32>
    %11 = vector.extract_strided_slice %1 {offsets = [0, 16], sizes = [8, 128], strides = [1, 1]} : vector<8x256xf32> to vector<8x128xf32>
    %12 = vector.extract_strided_slice %1 {offsets = [0, 17], sizes = [8, 128], strides = [1, 1]} : vector<8x256xf32> to vector<8x128xf32>
    %13 = vector.extract_strided_slice %1 {offsets = [0, 18], sizes = [8, 128], strides = [1, 1]} : vector<8x256xf32> to vector<8x128xf32>
    %14 = vector.extract_strided_slice %1 {offsets = [0, 20], sizes = [8, 128], strides = [1, 1]} : vector<8x256xf32> to vector<8x128xf32>
    %15 = vector.extract_strided_slice %1 {offsets = [0, 21], sizes = [8, 128], strides = [1, 1]} : vector<8x256xf32> to vector<8x128xf32>
    %16 = vector.extract_strided_slice %1 {offsets = [0, 22], sizes = [8, 128], strides = [1, 1]} : vector<8x256xf32> to vector<8x128xf32>
    %17 = vector.extract_strided_slice %1 {offsets = [0, 24], sizes = [8, 128], strides = [1, 1]} : vector<8x256xf32> to vector<8x128xf32>
    %18 = vector.extract_strided_slice %1 {offsets = [0, 25], sizes = [8, 128], strides = [1, 1]} : vector<8x256xf32> to vector<8x128xf32>
    %19 = vector.extract_strided_slice %1 {offsets = [0, 26], sizes = [8, 128], strides = [1, 1]} : vector<8x256xf32> to vector<8x128xf32>
    %20 = vector.extract_strided_slice %1 {offsets = [0, 32], sizes = [8, 128], strides = [1, 1]} : vector<8x256xf32> to vector<8x128xf32>
    %21 = vector.extract_strided_slice %1 {offsets = [0, 33], sizes = [8, 128], strides = [1, 1]} : vector<8x256xf32> to vector<8x128xf32>
    %22 = vector.extract_strided_slice %1 {offsets = [0, 34], sizes = [8, 128], strides = [1, 1]} : vector<8x256xf32> to vector<8x128xf32>
    %23 = vector.extract_strided_slice %1 {offsets = [0, 36], sizes = [8, 128], strides = [1, 1]} : vector<8x256xf32> to vector<8x128xf32>
    %24 = vector.extract_strided_slice %1 {offsets = [0, 37], sizes = [8, 128], strides = [1, 1]} : vector<8x256xf32> to vector<8x128xf32>
    %25 = vector.extract_strided_slice %1 {offsets = [0, 38], sizes = [8, 128], strides = [1, 1]} : vector<8x256xf32> to vector<8x128xf32>
    %26 = vector.extract_strided_slice %1 {offsets = [0, 40], sizes = [8, 128], strides = [1, 1]} : vector<8x256xf32> to vector<8x128xf32>
    %27 = vector.extract_strided_slice %1 {offsets = [0, 41], sizes = [8, 128], strides = [1, 1]} : vector<8x256xf32> to vector<8x128xf32>
    %28 = vector.extract_strided_slice %1 {offsets = [0, 42], sizes = [8, 128], strides = [1, 1]} : vector<8x256xf32> to vector<8x128xf32>
    %29 = tpu.concatenate %2, %3, %4, %5, %6, %7, %8, %9, %10, %11, %12, %13, %14, %15, %16, %17 in 0 : vector<8x128xf32>, vector<8x128xf32>, vector<8x128xf32>, vector<8x128xf32>, vector<8x128xf32>, vector<8x128xf32>, vector<8x128xf32>, vector<8x128xf32>, vector<8x128xf32>, vector<8x128xf32>, vector<8x128xf32>, vector<8x128xf32>, vector<8x128xf32>, vector<8x128xf32>, vector<8x128xf32>, vector<8x128xf32> -> vector<128x128xf32>
    %30 = tpu.concatenate %18, %19, %20, %21, %22, %23, %24, %25, %26, %27, %28 in 0 : vector<8x128xf32>, vector<8x128xf32>, vector<8x128xf32>, vector<8x128xf32>, vector<8x128xf32>, vector<8x128xf32>, vector<8x128xf32>, vector<8x128xf32>, vector<8x128xf32>, vector<8x128xf32>, vector<8x128xf32> -> vector<88x128xf32>
    %31 = tpu.concatenate %29, %30 in 0 : vector<128x128xf32>, vector<88x128xf32> -> vector<216x128xf32>
    %c0_2 = arith.constant 0 : index
    %c0_3 = arith.constant 0 : index
    %32 = vector.load %arg2[%c0_2, %c0_3] : memref<8x216xf32, #tpu.memory_space<vmem>>, vector<8x216xf32>
    %cst = arith.constant dense<0.000000e+00> : vector<8x128xf32>
    %33 = tpu.matmul %32, %31, %cst {dimension_numbers = #tpu.dot_dimension_numbers<[1], [0], [0], [1], [0, 0, 1, 1], [], []>} : vector<8x216xf32>, vector<216x128xf32>, vector<8x128xf32> -> vector<8x128xf32>
    %c0_4 = arith.constant 0 : index
    %c0_5 = arith.constant 0 : index
    %34 = vector.load %arg3[%c0_4, %c0_5] : memref<8x1xf32, #tpu.memory_space<vmem>>, vector<8x1xf32>
    %35 = vector.broadcast %34 : vector<8x1xf32> to vector<8x128xf32>
    %36 = arith.addf %33, %35 : vector<8x128xf32>
    %c0_6 = arith.constant 0 : index
    %c0_7 = arith.constant 0 : index
    %37 = vector.load %arg5[%c0_6, %c0_7] : memref<1x128xf32, #tpu.memory_space<vmem>>, vector<1x128xf32>
    %38 = vector.broadcast %37 : vector<1x128xf32> to vector<8x128xf32>
    %39 = arith.mulf %36, %38 : vector<8x128xf32>
    %c0_8 = arith.constant 0 : index
    %c0_9 = arith.constant 0 : index
    %40 = vector.load %arg6[%c0_8, %c0_9] : memref<8x128xf32, #tpu.memory_space<vmem>>, vector<8x128xf32>
    tpu.vector_store %arg6[%c0_8, %c0_9], %39 {strides = array<i32>} : memref<8x128xf32, #tpu.memory_space<vmem>>, vector<8x128xf32>,
    return
  }
  func.func @transform_0(%arg0: i32) -> (i32, i32, i32) {
    %c0_i32 = arith.constant 0 : i32
    %c0_i32_0 = arith.constant 0 : i32
    %c0_i32_1 = arith.constant 0 : i32
    return %arg0, %c0_i32, %c0_i32_0 : i32, i32, i32
  }
  func.func @transform_1(%arg0: i32) -> (i32, i32) {
    %c0_i32 = arith.constant 0 : i32
    %c0_i32_0 = arith.constant 0 : i32
    %c0_i32_1 = arith.constant 0 : i32
    return %c0_i32, %c0_i32_0 : i32, i32
  }
  func.func @transform_2(%arg0: i32) -> (i32, i32) {
    %c0_i32 = arith.constant 0 : i32
    %c0_i32_0 = arith.constant 0 : i32
    %c0_i32_1 = arith.constant 0 : i32
    return %c0_i32, %c0_i32_0 : i32, i32
  }
  func.func @transform_3(%arg0: i32) -> i32 {
    %c0_i32 = arith.constant 0 : i32
    %c0_i32_0 = arith.constant 0 : i32
    return %c0_i32 : i32
  }
  func.func @transform_4(%arg0: i32) -> (i32, i32) {
    %c0_i32 = arith.constant 0 : i32
    %c0_i32_0 = arith.constant 0 : i32
    return %c0_i32, %arg0 : i32, i32
  }
  func.func @transform_5(%arg0: i32) -> (i32, i32) {
    %c0_i32 = arith.constant 0 : i32
    %c0_i32_0 = arith.constant 0 : i32
    return %c0_i32, %arg0 : i32, i32
  }
}

</mosaic_0001>

<bundles_post_ra>
// kernel: downscale3d_forward.7
= control target key start
LH: loop header
LB: loop body
LE: loop exit
PB: predicated region body
PF: predicated region fallthrough
CT: control target
= control target key end

     0   :  { %s2641_s20 = smov 0   ;;  %s4502_s0 = inlined_call_operand.vmem [shape: f32[2,8,1280], index: 0, kind: input, shape index: {}]   ;;  %s4503_s1 = inlined_call_operand.vmem [shape: f32[8,216], index: 1, kind: input, shape index: {}]   ;;  %s4504_s2 = inlined_call_operand.vmem [shape: f32[8,1], index: 2, kind: input, shape index: {}]   ;;  %s4505_s3 = inlined_call_operand.<no memory space> [shape: f32[1], index: 3, kind: input, shape index: {}]   ;;  %s4506_s4 = inlined_call_operand.vmem [shape: f32[1,2048], index: 4, kind: input, shape index: {}]   ;;  %s4507_s5 = inlined_call_operand.vmem [shape: f32[8,2048], index: 5, kind: output, shape index: {}]  }
   0x1   :  { %10 = sst [smem:[#allocation2]] %s4505_s3 }
   0x2 LB: > { %s2647_s21 = sadd.s32 4294967295, %s2582_s20   ;;  %p1822_p0 = scmp.ge.s32.totalorder %s2582_s20, 1  ;;  %s2582_s20 = sphi %s2641_s20, %s16_s20  }
   0x3   : > { %p198_p1 = scmp.lt.s32.totalorder %s2582_s20, 3 }
   0x5   : > { %p199_p2 = pnand %p1822_p0, %p198_p1 }
   0x7   : > { %202 = sbr.rel (%p199_p2) target bundleno = 805 (0x325), region = 40 }
   0xc   : > { %p230_p3 = scmp.lt.s32.totalorder %s2647_s21, 1  ;;  %s2584_s26 = smov 127   ;;  %vm318_vm0 = vcmask 1031168   ;;  %vm353_vm1 = vcmask 965632   ;;  %vm388_vm2 = vcmask 957440   ;;  %vm423_vm3 = vcmask 949248  }
   0xd   : > { %s2585_s27 = smov 126   ;;  %s2586_s28 = smov 118   ;;  %vm458_vm4 = vcmask 883712   ;;  %vm493_vm5 = vcmask 875520   ;;  %vm563_vm6 = vcmask 228352   ;;  %vm528_vm7 = vcmask 867328  }
   0xe   : > { %s231_s3 = scalar_select %p230_p3, %s2647_s21, 1  ;;  %vm598_vm8 = vcmask 220160   ;;  %vm633_vm9 = vcmask 211968   ;;  %vm668_vm10 = vcmask 146432   ;;  %vm703_vm11 = vcmask 138240  }
   0xf   : > { %s2587_s29 = smov 117   ;;  %s2588_s30 = smov 116   ;;  %vm738_vm12 = vcmask 130048   ;;  %vm809_vm13 = vcmask 400384   ;;  %vm773_vm14 = vcmask 64512   ;;  %vm283_vm15 = vcmask 1039360  }
  0x10   : > { %s1837_s22 = smul.u32 80, %s231_s3  ;;  %s2589_s6 = smov 108  }
  0x11   : > { %s2590_s7 = smov 107   ;;  %s2591_s8 = smov 106  }
  0x12   : > { %s2656_s25 = scalar_lea.vmem %s4502_s0, %s1837_s22  ;;  %s2592_s9 = smov 28  }
  0x13   : > { %v2659_v0 = vld [vmem:[%s2656_s25 + $0x40] sm:$0xff]  ;;  %v2665_v2 = vld [vmem:[%s2656_s25 + $0x28] sm:$0xff]  ;;  %v2682_v7 = vld [vmem:[%s2656_s25 + $0x30] sm:$0xff]  ;;  %s2593_s10 = smov 27   ;;  %s2594_s11 = smov 26  }
  0x14   : > { %v2662_v1 = vld [vmem:[%s2656_s25 + $0x20] sm:$0xff]  ;;  %281 = vrot.lane.b32.xlu2 %v2659_v0, %s2584_s26  ;;  %v2674_v5 = vld [vmem:[%s2656_s25 + $0x8] sm:$0xff]  ;;  %v2685_v8 = vld [vmem:[%s2656_s25 + $0x38] sm:$0xff]  ;;  %s2595_s12 = smov 18   ;;  %s2596_s13 = smov 17  }
  0x15   : > { %v2670_v3 = vpack.i.bf16 %v2665_v2, %v2662_v1  ;;  %v246_v4 = vld [vmem:[%s2656_s25] sm:$0xff]  ;;  %v2688_v9 = vld [vmem:[%s2656_s25 + $0x10] sm:$0xff]  ;;  %v2691_v10 = vld [vmem:[%s2656_s25 + $0x18] sm:$0xff]  ;;  %v2695_v11 = vpack.i.bf16 %v2685_v8, %v2682_v7  ;;  %s2597_s14 = smov 16   ;;  %s2598_s15 = smov 8  }
  0x16   : > { %v2677_v6 = vpack.i.bf16 %v2674_v5, %v246_v4  ;;  %v2699_v12 = vpack.i.bf16 %v2691_v10, %v2688_v9  ;;  %v2743_v15 = vld [vmem:[%s2656_s25 + $0x48] sm:$0xff]  ;;  %s2599_s16 = smov 49   ;;  %s2600_s17 = smov 48  }
  0x17   : > { %1881 = vrot.lane.b32.xlu1 %v2670_v3, %s2584_s26  ;;  %v2050_v17 = vpack.i.bf16 %v2743_v15, %v2659_v0  ;;  %s2601_s18 = smov 47   ;;  %s2602_s19 = smov 39  }
  0x18   : > { %1871 = vrot.lane.b32.xlu0 %v2677_v6, %s2584_s26  ;;  %s2603_s3 = smov 38   ;;  %s2604_s22 = smov 37  }
  0x19   : > { %s2605_s23 = smov 29   ;;  %s2606_s24 = smov 7  }
  0x1c   : > { %1891 = vrot.lane.b32.xlu2 %v2677_v6, %s2585_s27 }
  0x1f   : > { %1886 = vrot.lane.b32.xlu1 %v2695_v11, %s2584_s26 }
  0x20   : > { %1876 = vrot.lane.b32.xlu0 %v2699_v12, %s2584_s26 }
  0x24   : > { %1906 = vrot.lane.b32.xlu2 %v2695_v11, %s2585_s27 }
  0x27   : > { %1901 = vrot.lane.b32.xlu1 %v2670_v3, %s2585_s27 }
  0x28   : > { %1896 = vrot.lane.b32.xlu0 %v2699_v12, %s2585_s27 }
  0x2c   : > { %1916 = vrot.lane.b32.xlu2 %v2699_v12, %s2586_s28 }
  0x2f   : > { %1911 = vrot.lane.b32.xlu1 %v2677_v6, %s2586_s28 }
  0x30   : > { %316 = vrot.lane.b32.xlu0 %v2659_v0, %s2585_s27 }
  0x34   : > { %351 = vrot.lane.b32.xlu2 %v2659_v0, %s2586_s28 }
  0x37   : > { %1926 = vrot.lane.b32.xlu1 %v2695_v11, %s2586_s28 }
  0x38   : > { %1921 = vrot.lane.b32.xlu0 %v2670_v3, %s2586_s28 }
  0x3c   : > { %1941 = vrot.lane.b32.xlu2 %v2670_v3, %s2587_s29 }
  0x3f   : > { %1936 = vrot.lane.b32.xlu1 %v2699_v12, %s2587_s29 }
  0x40   : > { %1931 = vrot.lane.b32.xlu0 %v2677_v6, %s2587_s29 }
  0x44   : > { %1951 = vrot.lane.b32.xlu2 %v2677_v6, %s2588_s30 }
  0x47   : > { %386 = vrot.lane.b32.xlu1 %v2659_v0, %s2587_s29 }
  0x48   : > { %1946 = vrot.lane.b32.xlu0 %v2695_v11, %s2587_s29 }
  0x4c   : > { %1966 = vrot.lane.b32.xlu2 %v2695_v11, %s2588_s30 }
  0x4f   : > { %1961 = vrot.lane.b32.xlu1 %v2670_v3, %s2588_s30 }
  0x50   : > { %1956 = vrot.lane.b32.xlu0 %v2699_v12, %s2588_s30 }
  0x54   : > { %1976 = vrot.lane.b32.xlu2 %v2699_v12, %s2589_s6 }
  0x57   : > { %1971 = vrot.lane.b32.xlu1 %v2677_v6, %s2589_s6 }
  0x58   : > { %421 = vrot.lane.b32.xlu0 %v2659_v0, %s2588_s30 }
  0x5c   : > { %456 = vrot.lane.b32.xlu2 %v2659_v0, %s2589_s6 }
  0x5f   : > { %1986 = vrot.lane.b32.xlu1 %v2695_v11, %s2589_s6 }
  0x60   : > { %1981 = vrot.lane.b32.xlu0 %v2670_v3, %s2589_s6 }
  0x64   : > { %2001 = vrot.lane.b32.xlu2 %v2670_v3, %s2590_s7 }
  0x67   : > { %1996 = vrot.lane.b32.xlu1 %v2699_v12, %s2590_s7 }
  0x68   : > { %1991 = vrot.lane.b32.xlu0 %v2677_v6, %s2590_s7 }
  0x6c   : > { %2011 = vrot.lane.b32.xlu2 %v2677_v6, %s2591_s8 }
  0x6e   : > { %v2732_v13 = vpop.permute.xlu2 %281 }
  0x6f   : > { %491 = vrot.lane.b32.xlu1 %v2659_v0, %s2590_s7 }
  0x70   : > { %2006 = vrot.lane.b32.xlu0 %v2695_v11, %s2590_s7  ;;  %s1824_s7 = sshll.u32 %s2647_s21, 3 }
  0x71   : > { %p236_p4 = scmp.lt.s32.totalorder %s1824_s7, 15 }
  0x73   : > { %s4828_s7 = smov (!%p236_p4, %s1824_s7), 15 }
  0x74   : > { %2026 = vrot.lane.b32.xlu2 %v2695_v11, %s2591_s8  ;;  %s1826_s21 = sshll.u32 %s4828_s7, 3 }
  0x76   : > { %v2738_v14 = vpop.permute.xlu2 %1891 }
  0x77   : > { %2021 = vrot.lane.b32.xlu1 %v2670_v3, %s2591_s8 }
  0x78   : > { %2016 = vrot.lane.b32.xlu0 %v2699_v12, %s2591_s8 }
  0x7c   : > { %2036 = vrot.lane.b32.xlu2 %v2699_v12, %s2592_s9 }
  0x7e   : > { %v2746_v16 = vpop.permute.xlu2 %1906 }
  0x7f   : > { %2031 = vrot.lane.b32.xlu1 %v2677_v6, %s2592_s9  ;;  %4582 = vst [vmem:[#allocation3_spill] sm:$0xff] %v2746_v16 }
  0x80   : > { %526 = vrot.lane.b32.xlu0 %v2659_v0, %s2591_s8  ;;  %s1693_s8 = sld [smem:[#allocation2]] }
  0x84   : > { %2051 = vrot.lane.b32.xlu2 %v2050_v17, %s2592_s9 }
  0x86   : > { %v2752_v18 = vpop.permute.xlu2 %1916 }
  0x87   : > { %2046 = vrot.lane.b32.xlu1 %v2695_v11, %s2592_s9  ;;  %v4513_v26 = vunpack.i.h.bf16 %v2752_v18  ;;  %v4516_v27 = vunpack.i.l.bf16 %v2752_v18 }
  0x88   : > { %2041 = vrot.lane.b32.xlu0 %v2670_v3, %s2592_s9 }
  0x89   : > { %v2755_v19 = vpop.permute.xlu1 %1881  ;;  %v2785_v33 = vsel %vm353_vm1, %v4516_v27, %v4513_v26 }
  0x8a   : > { %v2757_v20 = vpop.permute.xlu0 %1871  ;;  %4584 = vst [vmem:[#allocation5_spill] sm:$0xff] %v2785_v33 }
  0x8c   : > { %2066 = vrot.lane.b32.xlu2 %v2670_v3, %s2593_s10 }
  0x8e   : > { %v352_v21 = vpop.permute.xlu2 %351 }
  0x8f   : > { %2061 = vrot.lane.b32.xlu1 %v2699_v12, %s2593_s10 }
  0x90   : > { %2056 = vrot.lane.b32.xlu0 %v2677_v6, %s2593_s10 }
  0x91   : > { %v2762_v22 = vpop.permute.xlu1 %1886 }
  0x92   : > { %v2764_v23 = vpop.permute.xlu0 %1876 }
  0x94   : > { %2081 = vrot.lane.b32.xlu2 %v2677_v6, %s2594_s11 }
  0x96   : > { %v2767_v24 = vpop.permute.xlu2 %1941 }
  0x97   : > { %2076 = vrot.lane.b32.xlu1 %v2050_v17, %s2593_s10  ;;  %v1944_v41 = vunpack.i.h.bf16 %v2767_v24  ;;  %v1943_v42 = vunpack.i.l.bf16 %v2767_v24 }
  0x98   : > { %2071 = vrot.lane.b32.xlu0 %v2695_v11, %s2593_s10 }
  0x99   : > { %v2770_v25 = vpop.permute.xlu1 %1901  ;;  %v2825_v47 = vsel %vm388_vm2, %v1943_v42, %v1944_v41 }
  0x9a   : > { %4583 = vst [vmem:[#allocation4_spill] sm:$0xff] %v2770_v25  ;;  %v4509_v28 = vunpack.i.h.bf16 %v2770_v25  ;;  %v4512_v29 = vunpack.i.l.bf16 %v2770_v25  ;;  %v2776_v30 = vpop.permute.xlu0 %1896 }
  0x9b   : > { %v4511_v31 = vunpack.i.h.bf16 %v2776_v30  ;;  %v4515_v32 = vunpack.i.l.bf16 %v2776_v30  ;;  %4590 = vst [vmem:[#allocation11_spill] sm:$0xff] %v2825_v47 }
  0x9c   : > { %v2792_v34 = vsel %vm318_vm0, %v4512_v29, %v4509_v28  ;;  %2096 = vrot.lane.b32.xlu2 %v2695_v11, %s2594_s11 }
  0x9d   : > { %4585 = vst [vmem:[#allocation6_spill] sm:$0xff] %v2792_v34  ;;  %v2800_v35 = vsel %vm318_vm0, %v4515_v32, %v4511_v31  ;;  %v2994_v34 = vpack.i.bf16 %v2659_v0, %v2685_v8 }
  0x9e   : > { %4586 = vst [vmem:[#allocation7_spill] sm:$0xff] %v2800_v35  ;;  %v2803_v36 = vpop.permute.xlu2 %1951 }
  0x9f   : > { %2091 = vrot.lane.b32.xlu1 %v2670_v3, %s2594_s11 }
  0xa0   : > { %2086 = vrot.lane.b32.xlu0 %v2699_v12, %s2594_s11 }
  0xa1   : > { %v2806_v37 = vpop.permute.xlu1 %1911 }
  0xa2   : > { %v2808_v38 = vpop.permute.xlu0 %316 }
  0xa3   : > { %4587 = vst [vmem:[#allocation8_spill] sm:$0xff] %v2808_v38 }
  0xa4   : > { %2106 = vrot.lane.b32.xlu2 %v2699_v12, %s2595_s12 }
  0xa6   : > { %v2812_v39 = vpop.permute.xlu2 %1966 }
  0xa7   : > { %2101 = vrot.lane.b32.xlu1 %v2677_v6, %s2595_s12  ;;  %v1969_v61 = vunpack.i.h.bf16 %v2812_v39  ;;  %v1968_v62 = vunpack.i.l.bf16 %v2812_v39 }
  0xa8   : > { %631 = vrot.lane.b32.xlu0 %v2659_v0, %s2594_s11  ;;  %s238_s11 = scalar_lea.vmem %s4506_s4, %s4828_s7 }
  0xa9   : > { %v2815_v40 = vpop.permute.xlu1 %1926 }
  0xaa   : > { %4588 = vst [vmem:[#allocation9_spill] sm:$0xff] %v2815_v40  ;;  %v4508_v43 = vunpack.i.h.bf16 %v2815_v40  ;;  %v2820_v44 = vpop.permute.xlu0 %1921 }
  0xab   : > { %4589 = vst [vmem:[#allocation10_spill] sm:$0xff] %v2820_v44  ;;  %v4510_v45 = vunpack.i.h.bf16 %v2820_v44  ;;  %v4514_v46 = vunpack.i.l.bf16 %v2820_v44 }
  0xac   : > { %v2830_v48 = vsel %vm353_vm1, %v4508_v43, %v352_v21  ;;  %666 = vrot.lane.b32.xlu2 %v2659_v0, %s2595_s12  ;;  %v2864_v21 = vsel %vm423_vm3, %v1968_v62, %v1969_v61 }
  0xad   : > { %4591 = vst [vmem:[#allocation12_spill] sm:$0xff] %v2830_v48  ;;  %v2838_v49 = vsel %vm353_vm1, %v4514_v46, %v4510_v45 }
  0xae   : > { %4592 = vst [vmem:[#allocation13_spill] sm:$0xff] %v2838_v49  ;;  %v2841_v50 = vpop.permute.xlu2 %1976 }
  0xaf   : > { %2116 = vrot.lane.b32.xlu1 %v2695_v11, %s2595_s12  ;;  %4595 = vst [vmem:[#allocation16_spill] sm:$0xff] %v2864_v21 }
  0xb0   : > { %2111 = vrot.lane.b32.xlu0 %v2670_v3, %s2595_s12 }
  0xb1   : > { %v1937_v51 = vpop.permute.xlu1 %1936 }
  0xb2   : > { %v1939_v52 = vunpack.i.h.bf16 %v1937_v51  ;;  %v1938_v53 = vunpack.i.l.bf16 %v1937_v51  ;;  %v2844_v54 = vpop.permute.xlu0 %1931 }
  0xb3   : > { %v4517_v55 = vunpack.i.h.bf16 %v2844_v54 }
  0xb4   : > { %v2848_v56 = vsel %vm388_vm2, %v1939_v52, %v1943_v42  ;;  %v2851_v57 = vsel %vm388_vm2, %v1938_v53, %v1939_v52  ;;  %2131 = vrot.lane.b32.xlu2 %v2670_v3, %s2596_s13  ;;  %v4518_v52 = vunpack.i.h.bf16 %v2803_v36 }
  0xb5   : > { %4593 = vst [vmem:[#allocation14_spill] sm:$0xff] %v2848_v56  ;;  %v2857_v58 = vsel %vm388_vm2, %v4517_v55, %v1938_v53 }
  0xb6   : > { %4594 = vst [vmem:[#allocation15_spill] sm:$0xff] %v2851_v57  ;;  %v457_v59 = vpop.permute.xlu2 %456 }
  0xb7   : > { %2126 = vrot.lane.b32.xlu1 %v2699_v12, %s2596_s13 }
  0xb8   : > { %2121 = vrot.lane.b32.xlu0 %v2677_v6, %s2596_s13 }
  0xb9   : > { %v387_v60 = vpop.permute.xlu1 %386 }
  0xba   : > { %v1947_v63 = vpop.permute.xlu0 %1946 }
  0xbb   : > { %v1949_v4 = vunpack.i.h.bf16 %v1947_v63  ;;  %v1948_v17 = vunpack.i.l.bf16 %v1947_v63  ;;  %v1979_v63 = vunpack.i.h.bf16 %v2841_v50 }
  0xbc   : > { %2141 = vrot.lane.b32.xlu2 %v2677_v6, %s2597_s14 }
  0xbd   : > { %v2869_v24 = vsel %vm388_vm2, %v1944_v41, %v1948_v17  ;;  %v2872_v42 = vsel %vm388_vm2, %v1948_v17, %v1949_v4  ;;  %v2875_v51 = vsel %vm388_vm2, %v1949_v4, %v387_v60  ;;  %v1978_v41 = vunpack.i.l.bf16 %v2841_v50 }
  0xbe   : > { %4596 = vst [vmem:[#allocation17_spill] sm:$0xff] %v2869_v24  ;;  %v2878_v39 = vpop.permute.xlu2 %2001 }
  0xbf   : > { %4597 = vst [vmem:[#allocation18_spill] sm:$0xff] %v2872_v42  ;;  %701 = vrot.lane.b32.xlu1 %v2659_v0, %s2596_s13  ;;  %v2885_v60 = vsel %vm458_vm4, %v1978_v41, %v1979_v63  ;;  %v2004_v27 = vunpack.i.h.bf16 %v2878_v39 }
  0xc0   : > { %4598 = vst [vmem:[#allocation19_spill] sm:$0xff] %v2875_v51  ;;  %2136 = vrot.lane.b32.xlu0 %v2695_v11, %s2596_s13  ;;  %s4471_s13 = scalar_lea.vmem %s4507_s5, %s1826_s21 }
  0xc1   : > { %v1962_v53 = vpop.permute.xlu1 %1961  ;;  %4599 = vst [vmem:[#allocation20_spill] sm:$0xff] %v2885_v60 }
  0xc2   : > { %v1964_v43 = vunpack.i.h.bf16 %v1962_v53  ;;  %v1963_v28 = vunpack.i.l.bf16 %v1962_v53  ;;  %v1957_v17 = vpop.permute.xlu0 %1956 }
  0xc3   : > { %v1959_v45 = vunpack.i.h.bf16 %v1957_v17  ;;  %v1958_v31 = vunpack.i.l.bf16 %v1957_v17 }
  0xc4   : > { %v2888_v4 = vsel %vm423_vm3, %v1963_v28, %v1964_v43  ;;  %v2891_v29 = vsel %vm423_vm3, %v1964_v43, %v1968_v62  ;;  %2156 = vrot.lane.b32.xlu2 %v2695_v11, %s2597_s14 }
  0xc5   : > { %4600 = vst [vmem:[#allocation21_spill] sm:$0xff] %v2888_v4  ;;  %v2898_v50 = vsel %vm423_vm3, %v4518_v52, %v1958_v31  ;;  %v2901_v53 = vsel %vm423_vm3, %v1959_v45, %v1963_v28  ;;  %v2904_v17 = vsel %vm423_vm3, %v1958_v31, %v1959_v45 }
  0xc6   : > { %4601 = vst [vmem:[#allocation22_spill] sm:$0xff] %v2891_v29  ;;  %v2908_v26 = vpop.permute.xlu2 %2011 }
  0xc7   : > { %4602 = vst [vmem:[#allocation23_spill] sm:$0xff] %v2901_v53  ;;  %2151 = vrot.lane.b32.xlu1 %v2670_v3, %s2597_s14 }
  0xc8   : > { %4603 = vst [vmem:[#allocation24_spill] sm:$0xff] %v2904_v17  ;;  %2146 = vrot.lane.b32.xlu0 %v2699_v12, %s2597_s14 }
  0xc9   : > { %v2912_v43 = vpop.permute.xlu1 %1971 }
  0xca   : > { %v4519_v62 = vunpack.i.h.bf16 %v2912_v43  ;;  %v422_v46 = vpop.permute.xlu0 %421 }
  0xcb   : > { %v2916_v32 = vsel %vm423_vm3, %v1969_v61, %v422_v46  ;;  %v2003_v46 = vunpack.i.l.bf16 %v2878_v39 }
  0xcc   : > { %4604 = vst [vmem:[#allocation25_spill] sm:$0xff] %v2916_v32  ;;  %v2921_v28 = vsel %vm458_vm4, %v4519_v62, %v1978_v41  ;;  %2166 = vrot.lane.b32.xlu2 %v2699_v12, %s2598_s15 }
  0xcd   : > { %v2932_v38 = vsel %vm493_vm5, %v2003_v46, %v2004_v27 }
  0xce   : > { %v2925_v31 = vpop.permute.xlu2 %2026  ;;  %4605 = vst [vmem:[#allocation26_spill] sm:$0xff] %v2932_v38 }
  0xcf   : > { %2161 = vrot.lane.b32.xlu1 %v2677_v6, %s2598_s15 }
  0xd0   : > { %736 = vrot.lane.b32.xlu0 %v2659_v0, %s2597_s14 }
  0xd1   : > { %v1987_v45 = vpop.permute.xlu1 %1986 }
  0xd2   : > { %v1989_v61 = vunpack.i.h.bf16 %v1987_v45  ;;  %v1988_v55 = vunpack.i.l.bf16 %v1987_v45  ;;  %v1982_v52 = vpop.permute.xlu0 %1981 }
  0xd3   : > { %v1984_v41 = vunpack.i.h.bf16 %v1982_v52  ;;  %v1983_v62 = vunpack.i.l.bf16 %v1982_v52 }
  0xd4   : > { %v2935_v48 = vsel %vm458_vm4, %v1988_v55, %v1989_v61  ;;  %v2938_v51 = vsel %vm458_vm4, %v1989_v61, %v457_v59  ;;  %771 = vrot.lane.b32.xlu2 %v2659_v0, %s2598_s15  ;;  %v2956_v59 = vpack.i.bf16 %v2682_v7, %v2665_v2 }
  0xd5   : > { %4606 = vst [vmem:[#allocation27_spill] sm:$0xff] %v2935_v48  ;;  %v2942_v32 = vsel %vm458_vm4, %v1979_v63, %v1983_v62  ;;  %v2945_v39 = vsel %vm458_vm4, %v1983_v62, %v1984_v41  ;;  %v2948_v52 = vsel %vm458_vm4, %v1984_v41, %v1988_v55  ;;  %v2963_v55 = vpack.i.bf16 %v2662_v1, %v2691_v10 }
  0xd6   : > { %4607 = vst [vmem:[#allocation28_spill] sm:$0xff] %v2938_v51  ;;  %v2951_v45 = vpop.permute.xlu2 %2036  ;;  %v2967_v41 = vpack.i.bf16 %v2688_v9, %v2674_v5 }
  0xd7   : > { %4608 = vst [vmem:[#allocation29_spill] sm:$0xff] %v2945_v39  ;;  %2176 = vrot.lane.b32.xlu1 %v2695_v11, %s2598_s15  ;;  %v2039_v24 = vunpack.i.h.bf16 %v2951_v45 }
  0xd8   : > { %4609 = vst [vmem:[#allocation30_spill] sm:$0xff] %v2948_v52  ;;  %2171 = vrot.lane.b32.xlu0 %v2670_v3, %s2598_s15 }
  0xd9   : > { %v1997_v42 = vpop.permute.xlu1 %1996 }
  0xda   : > { %v1999_v61 = vunpack.i.h.bf16 %v1997_v42  ;;  %v1998_v63 = vunpack.i.l.bf16 %v1997_v42  ;;  %v2958_v51 = vpop.permute.xlu0 %1991  ;;  %v2029_v42 = vunpack.i.h.bf16 %v2925_v31 }
  0xdb   : > { %v4520_v62 = vunpack.i.h.bf16 %v2958_v51 }
  0xdc   : > { %v2970_v21 = vsel %vm493_vm5, %v1999_v61, %v2003_v46  ;;  %v2973_v2 = vsel %vm493_vm5, %v1998_v63, %v1999_v61  ;;  %2191 = vrot.lane.b32.xlu2 %v2956_v59, %s2599_s16  ;;  %v2028_v46 = vunpack.i.l.bf16 %v2925_v31 }
  0xdd   : > { %4610 = vst [vmem:[#allocation31_spill] sm:$0xff] %v2973_v2  ;;  %v2979_v7 = vsel %vm493_vm5, %v4520_v62, %v1998_v63 }
  0xde   : > { %v2982_v1 = vpop.permute.xlu2 %2051 }
  0xdf   : > { %2186 = vrot.lane.b32.xlu1 %v2963_v55, %s2599_s16  ;;  %v2054_v5 = vunpack.i.h.bf16 %v2982_v1  ;;  %v2053_v9 = vunpack.i.l.bf16 %v2982_v1  ;;  %v2997_v1 = vsel %vm528_vm7, %v2028_v46, %v2029_v42 }
  0xe0   : > { %2181 = vrot.lane.b32.xlu0 %v2967_v41, %s2599_s16  ;;  %4612 = vst [vmem:[#allocation33_spill] sm:$0xff] %v2997_v1 }
  0xe1   : > { %v492_v10 = vpop.permute.xlu1 %491  ;;  %v2990_v61 = vsel %vm563_vm6, %v2053_v9, %v2054_v5 }
  0xe2   : > { %4611 = vst [vmem:[#allocation32_spill] sm:$0xff] %v2990_v61  ;;  %v2007_v63 = vpop.permute.xlu0 %2006 }
  0xe3   : > { %v2009_v62 = vunpack.i.h.bf16 %v2007_v63  ;;  %v2008_v48 = vunpack.i.l.bf16 %v2007_v63 }
  0xe4   : > { %2201 = vrot.lane.b32.xlu2 %v2967_v41, %s2600_s17 }
  0xe5   : > { %v3002_v31 = vsel %vm493_vm5, %v2004_v27, %v2008_v48  ;;  %v3005_v5 = vsel %vm493_vm5, %v2008_v48, %v2009_v62  ;;  %v3008_v63 = vsel %vm493_vm5, %v2009_v62, %v492_v10 }
  0xe6   : > { %4613 = vst [vmem:[#allocation34_spill] sm:$0xff] %v3002_v31  ;;  %v3011_v0 = vpop.permute.xlu2 %2066 }
  0xe7   : > { %4614 = vst [vmem:[#allocation35_spill] sm:$0xff] %v3005_v5  ;;  %807 = vrot.lane.b32.xlu1 %v2743_v15, %s2599_s16  ;;  %v4524_v8 = vunpack.i.h.bf16 %v3011_v0  ;;  %v2068_v1 = vunpack.i.l.bf16 %v3011_v0  ;;  %v4525_v5 = vunpack.i.l.bf16 %v2951_v45 }
  0xe8   : > { %4615 = vst [vmem:[#allocation36_spill] sm:$0xff] %v3008_v63  ;;  %2196 = vrot.lane.b32.xlu0 %v2994_v34, %s2599_s16 }
  0xe9   : > { %v2022_v48 = vpop.permute.xlu1 %2021  ;;  %v3022_v49 = vsel %vm598_vm8, %v2068_v1, %v4524_v8  ;;  %v3027_v47 = vsel %vm563_vm6, %v4525_v5, %v2039_v24 }
  0xea   : > { %v2024_v62 = vunpack.i.h.bf16 %v2022_v48  ;;  %v2023_v10 = vunpack.i.l.bf16 %v2022_v48  ;;  %v2017_v63 = vpop.permute.xlu0 %2016  ;;  %4616 = vst [vmem:[#allocation37_spill] sm:$0xff] %v3022_v49  ;;  %v4620_v48 = vunpack.i.h.bf16 %v2908_v26 }
  0xeb   : > { %v2019_v16 = vunpack.i.h.bf16 %v2017_v63  ;;  %v2018_v29 = vunpack.i.l.bf16 %v2017_v63  ;;  %4617 = vst [vmem:[#allocation38_spill] sm:$0xff] %v3027_v47 }
  0xec   : > { %v3030_v27 = vsel %vm528_vm7, %v2023_v10, %v2024_v62  ;;  %v3033_v40 = vsel %vm528_vm7, %v2024_v62, %v2028_v46  ;;  %2216 = vrot.lane.b32.xlu2 %v2994_v34, %s2600_s17 }
  0xed   : > { %4618 = vst [vmem:[#allocation39_spill] sm:$0xff] %v3030_v27  ;;  %v3040_v8 = vsel %vm528_vm7, %v4620_v48, %v2018_v29  ;;  %v3043_v63 = vsel %vm528_vm7, %v2019_v16, %v2023_v10  ;;  %v3046_v5 = vsel %vm528_vm7, %v2018_v29, %v2019_v16 }
  0xee   : > { %4619 = vst [vmem:[#allocation40_spill] sm:$0xff] %v3033_v40  ;;  %v3050_v52 = vpop.permute.xlu2 %2081 }
  0xef   : > { %4621 = vst [vmem:[#allocation41_spill] sm:$0xff] %v3046_v5  ;;  %2211 = vrot.lane.b32.xlu1 %v2956_v59, %s2600_s17 }
  0xf0   : > { %2206 = vrot.lane.b32.xlu0 %v2963_v55, %s2600_s17 }
  0xf1   : > { %v3054_v46 = vpop.permute.xlu1 %2031 }
  0xf2   : > { %v527_v62 = vpop.permute.xlu0 %526 }
  0xf3   : > { %v3057_v48 = vsel %vm528_vm7, %v2029_v42, %v527_v62 }
  0xf4   : > { %4622 = vst [vmem:[#allocation42_spill] sm:$0xff] %v3057_v48  ;;  %2226 = vrot.lane.b32.xlu2 %v2963_v55, %s2601_s18 }
  0xf6   : > { %v3061_v16 = vpop.permute.xlu2 %2096 }
  0xf7   : > { %2221 = vrot.lane.b32.xlu1 %v2967_v41, %s2601_s18  ;;  %v2098_v35 = vunpack.i.l.bf16 %v3061_v16 }
  0xf8   : > { %834 = vrot.lane.b32.xlu0 %v2743_v15, %s2600_s17 }
  0xf9   : > { %v2047_v29 = vpop.permute.xlu1 %2046 }
  0xfa   : > { %v2049_v10 = vunpack.i.h.bf16 %v2047_v29  ;;  %v2048_v4 = vunpack.i.l.bf16 %v2047_v29  ;;  %v2042_v31 = vpop.permute.xlu0 %2041 }
  0xfb   : > { %v2044_v39 = vunpack.i.h.bf16 %v2042_v31  ;;  %v2043_v40 = vunpack.i.l.bf16 %v2042_v31 }
  0xfc   : > { %v3066_v38 = vsel %vm563_vm6, %v2048_v4, %v2049_v10  ;;  %v3069_v42 = vsel %vm563_vm6, %v2049_v10, %v2053_v9  ;;  %861 = vrot.lane.b32.xlu2 %v2743_v15, %s2601_s18 }
  0xfd   : > { %4623 = vst [vmem:[#allocation43_spill] sm:$0xff] %v3066_v38  ;;  %v3073_v62 = vsel %vm563_vm6, %v2039_v24, %v2043_v40  ;;  %v3076_v48 = vsel %vm563_vm6, %v2043_v40, %v2044_v39  ;;  %v3079_v27 = vsel %vm563_vm6, %v2044_v39, %v2048_v4  ;;  %v2099_v39 = vunpack.i.h.bf16 %v3061_v16 }
  0xfe   : > { %4624 = vst [vmem:[#allocation44_spill] sm:$0xff] %v3069_v42  ;;  %v3082_v31 = vpop.permute.xlu2 %2106  ;;  %v4630_v16 = vunpack.i.h.bf16 %v3011_v0 }
  0xff   : > { %4625 = vst [vmem:[#allocation45_spill] sm:$0xff] %v3076_v48  ;;  %2236 = vrot.lane.b32.xlu1 %v2994_v34, %s2601_s18  ;;  %v2109_v42 = vunpack.i.h.bf16 %v3082_v31  ;;  %v4532_v38 = vunpack.i.l.bf16 %v3082_v31 }
 0x100   : > { %4626 = vst [vmem:[#allocation46_spill] sm:$0xff] %v3079_v27  ;;  %2231 = vrot.lane.b32.xlu0 %v2956_v59, %s2601_s18 }
 0x101   : > { %v3085_v29 = vpop.permute.xlu1 %2061 }
 0x102   : > { %v4526_v9 = vunpack.i.h.bf16 %v3085_v29  ;;  %v3088_v10 = vpop.permute.xlu0 %2056 }
 0x104   : > { %v3093_v40 = vsel %vm598_vm8, %v4526_v9, %v2068_v1  ;;  %2251 = vrot.lane.b32.xlu2 %v2956_v59, %s2602_s19  ;;  %v3104_v9 = vsel %vm633_vm9, %v2098_v35, %v2099_v39 }
 0x105   : > { %4628 = vst [vmem:[#allocation48_spill] sm:$0xff] %v3104_v9 }
 0x106   : > { %v667_v24 = vpop.permute.xlu2 %666 }
 0x107   : > { %2246 = vrot.lane.b32.xlu1 %v2963_v55, %s2602_s19 }
 0x108   : > { %2241 = vrot.lane.b32.xlu0 %v2967_v41, %s2602_s19 }
 0x109   : > { %v2077_v4 = vpop.permute.xlu1 %2076 }
 0x10a   : > { %v2079_v33 = vunpack.i.h.bf16 %v2077_v4  ;;  %v2078_v57 = vunpack.i.l.bf16 %v2077_v4  ;;  %v2072_v17 = vpop.permute.xlu0 %2071 }
 0x10b   : > { %v2074_v60 = vunpack.i.h.bf16 %v2072_v17  ;;  %v2073_v2 = vunpack.i.l.bf16 %v2072_v17 }
 0x10c   : > { %v3101_v1 = vsel %vm598_vm8, %v2078_v57, %v2079_v33  ;;  %2261 = vrot.lane.b32.xlu2 %v2967_v41, %s2603_s3 }
 0x10d   : > { %4627 = vst [vmem:[#allocation47_spill] sm:$0xff] %v3101_v1  ;;  %v3109_v5 = vsel %vm598_vm8, %v2073_v2, %v2074_v60  ;;  %v3114_v4 = vsel %vm598_vm8, %v4630_v16, %v2073_v2  ;;  %v3117_v17 = vsel %vm598_vm8, %v2074_v60, %v2078_v57  ;;  %v3132_v60 = vsel %vm668_vm10, %v4532_v38, %v2109_v42 }
 0x10e   : > { %4629 = vst [vmem:[#allocation49_spill] sm:$0xff] %v3109_v5  ;;  %v3120_v33 = vpop.permute.xlu2 %2131 }
 0x10f   : > { %4631 = vst [vmem:[#allocation50_spill] sm:$0xff] %v3114_v4  ;;  %888 = vrot.lane.b32.xlu1 %v2743_v15, %s2602_s19 }
 0x110   : > { %4632 = vst [vmem:[#allocation51_spill] sm:$0xff] %v3117_v17  ;;  %2256 = vrot.lane.b32.xlu0 %v2994_v34, %s2602_s19 }
 0x111   : > { %v2092_v9 = vpop.permute.xlu1 %2091  ;;  %4633 = vst [vmem:[#allocation52_spill] sm:$0xff] %v3132_v60 }
 0x112   : > { %v2094_v1 = vunpack.i.h.bf16 %v2092_v9  ;;  %v2093_v48 = vunpack.i.l.bf16 %v2092_v9  ;;  %v3125_v0 = vpop.permute.xlu0 %2086 }
 0x113   : > { %v2089_v2 = vunpack.i.h.bf16 %v3125_v0  ;;  %v4533_v57 = vunpack.i.l.bf16 %v3125_v0 }
 0x114   : > { %v3135_v16 = vsel %vm633_vm9, %v2093_v48, %v2094_v1  ;;  %v3138_v17 = vsel %vm633_vm9, %v2094_v1, %v2098_v35  ;;  %2276 = vrot.lane.b32.xlu2 %v2994_v34, %s2603_s3 }
 0x115   : > { %4634 = vst [vmem:[#allocation53_spill] sm:$0xff] %v3135_v16  ;;  %v3143_v9 = vsel %vm633_vm9, %v2089_v2, %v2093_v48  ;;  %v3148_v4 = vsel %vm633_vm9, %v4533_v57, %v2089_v2  ;;  %v2134_v57 = vunpack.i.h.bf16 %v3120_v33  ;;  %v4538_v16 = vunpack.i.l.bf16 %v3120_v33 }
 0x116   : > { %4635 = vst [vmem:[#allocation54_spill] sm:$0xff] %v3138_v17  ;;  %v3152_v38 = vpop.permute.xlu2 %2141 }
 0x117   : > { %4636 = vst [vmem:[#allocation55_spill] sm:$0xff] %v3148_v4  ;;  %2271 = vrot.lane.b32.xlu1 %v2956_v59, %s2603_s3 }
 0x118   : > { %2266 = vrot.lane.b32.xlu0 %v2963_v55, %s2603_s3 }
 0x119   : > { %v3156_v35 = vpop.permute.xlu1 %2101 }
 0x11a   : > { %v632_v1 = vpop.permute.xlu0 %631 }
 0x11b   : > { %v3159_v17 = vsel %vm633_vm9, %v2099_v39, %v632_v1 }
 0x11c   : > { %4637 = vst [vmem:[#allocation56_spill] sm:$0xff] %v3159_v17  ;;  %2286 = vrot.lane.b32.xlu2 %v2963_v55, %s2604_s22  ;;  %v3172_v17 = vsel %vm703_vm11, %v4538_v16, %v2134_v57 }
 0x11d   : > { %4638 = vst [vmem:[#allocation57_spill] sm:$0xff] %v3172_v17 }
 0x11e   : > { %v3163_v48 = vpop.permute.xlu2 %2156 }
 0x11f   : > { %2281 = vrot.lane.b32.xlu1 %v2967_v41, %s2604_s22 }
 0x120   : > { %915 = vrot.lane.b32.xlu0 %v2743_v15, %s2603_s3 }
 0x121   : > { %v2117_v2 = vpop.permute.xlu1 %2116 }
 0x122   : > { %v2119_v4 = vunpack.i.h.bf16 %v2117_v2  ;;  %v2118_v60 = vunpack.i.l.bf16 %v2117_v2  ;;  %v2112_v27 = vpop.permute.xlu0 %2111 }
 0x123   : > { %v2114_v39 = vunpack.i.h.bf16 %v2112_v27  ;;  %v2113_v1 = vunpack.i.l.bf16 %v2112_v27 }
 0x124   : > { %v3175_v5 = vsel %vm668_vm10, %v2118_v60, %v2119_v4  ;;  %v3178_v49 = vsel %vm668_vm10, %v2119_v4, %v667_v24  ;;  %942 = vrot.lane.b32.xlu2 %v2743_v15, %s2604_s22 }
 0x125   : > { %4639 = vst [vmem:[#allocation58_spill] sm:$0xff] %v3175_v5  ;;  %v3182_v47 = vsel %vm668_vm10, %v2109_v42, %v2113_v1  ;;  %v3185_v2 = vsel %vm668_vm10, %v2113_v1, %v2114_v39  ;;  %v3188_v27 = vsel %vm668_vm10, %v2114_v39, %v2118_v60 }
 0x126   : > { %4640 = vst [vmem:[#allocation59_spill] sm:$0xff] %v3178_v49  ;;  %v3191_v16 = vpop.permute.xlu2 %2166  ;;  %v2159_v49 = vunpack.i.h.bf16 %v3163_v48 }
 0x127   : > { %4641 = vst [vmem:[#allocation60_spill] sm:$0xff] %v3185_v2  ;;  %2296 = vrot.lane.b32.xlu1 %v2994_v34, %s2604_s22 }
 0x128   : > { %4642 = vst [vmem:[#allocation61_spill] sm:$0xff] %v3188_v27  ;;  %2291 = vrot.lane.b32.xlu0 %v2956_v59, %s2604_s22  ;;  %v2158_v27 = vunpack.i.l.bf16 %v3163_v48 }
 0x129   : > { %v3194_v5 = vpop.permute.xlu1 %2126 }
 0x12a   : > { %v4540_v24 = vunpack.i.h.bf16 %v3194_v5  ;;  %v4541_v4 = vunpack.i.l.bf16 %v3194_v5  ;;  %v3198_v42 = vpop.permute.xlu0 %2121 }
 0x12b   : > { %v2124_v53 = vunpack.i.h.bf16 %v3198_v42 }
 0x12c   : > { %v3205_v60 = vsel %vm703_vm11, %v4541_v4, %v4540_v24  ;;  %2311 = vrot.lane.b32.xlu2 %v2956_v59, %s2605_s23  ;;  %v3215_v24 = vsel %vm738_vm12, %v2158_v27, %v2159_v49  ;;  %v1883_v4 = vunpack.i.l.bf16 %v2755_v19 }
 0x12d   : > { %4643 = vst [vmem:[#allocation62_spill] sm:$0xff] %v3205_v60 }
 0x12e   : > { %v3209_v39 = vpop.permute.xlu2 %771  ;;  %4644 = vst [vmem:[#allocation63_spill] sm:$0xff] %v3215_v24 }
 0x12f   : > { %2306 = vrot.lane.b32.xlu1 %v2963_v55, %s2605_s23 }
 0x130   : > { %2301 = vrot.lane.b32.xlu0 %v2967_v41, %s2605_s23 }
 0x131   : > { %v702_v1 = vpop.permute.xlu1 %701 }
 0x132   : > { %v2137_v2 = vpop.permute.xlu0 %2136 }
 0x133   : > { %v2139_v17 = vunpack.i.h.bf16 %v2137_v2  ;;  %v2138_v61 = vunpack.i.l.bf16 %v2137_v2  ;;  %v1884_v2 = vunpack.i.h.bf16 %v2755_v19 }
 0x134   : > { %2321 = vrot.lane.b32.xlu2 %v2677_v6, %s2606_s24 }
 0x135   : > { %v3220_v59 = vsel %vm703_vm11, %v2134_v57, %v2138_v61  ;;  %v3223_v55 = vsel %vm703_vm11, %v2138_v61, %v2139_v17  ;;  %v3226_v41 = vsel %vm703_vm11, %v2139_v17, %v702_v1  ;;  %v1879_v61 = vunpack.i.h.bf16 %v2764_v23 }
 0x136   : > { %4645 = vst [vmem:[#allocation64_spill] sm:$0xff] %v3220_v59  ;;  %v3229_v48 = vpop.permute.xlu2 %2191  ;;  %v4649_v59 = vunpack.i.h.bf16 %v3191_v16  ;;  %v1873_v57 = vunpack.i.l.bf16 %v2757_v20 }
 0x137   : > { %4646 = vst [vmem:[#allocation65_spill] sm:$0xff] %v3223_v55  ;;  %969 = vrot.lane.b32.xlu1 %v2743_v15, %s2605_s23  ;;  %v4542_v24 = vunpack.i.h.bf16 %v3229_v48  ;;  %v4543_v6 = vunpack.i.l.bf16 %v3229_v48  ;;  %v2168_v15 = vunpack.i.l.bf16 %v3191_v16 }
 0x138   : > { %4647 = vst [vmem:[#allocation66_spill] sm:$0xff] %v3226_v41  ;;  %2316 = vrot.lane.b32.xlu0 %v2994_v34, %s2605_s23 }
 0x139   : > { %v3238_v17 = vpop.permute.xlu1 %2151  ;;  %v3246_v19 = vsel %vm809_vm13, %v4543_v6, %v4542_v24  ;;  %v3257_v60 = vsel %vm773_vm14, %v2168_v15, %v4649_v59 }
 0x13a   : > { %4648 = vst [vmem:[#allocation67_spill] sm:$0xff] %v3246_v19  ;;  %v2154_v1 = vunpack.i.h.bf16 %v3238_v17  ;;  %v4547_v34 = vunpack.i.l.bf16 %v3238_v17  ;;  %v3250_v41 = vpop.permute.xlu0 %2146  ;;  %v1874_v19 = vunpack.i.h.bf16 %v2757_v20 }
 0x13b   : > { %v2148_v55 = vunpack.i.l.bf16 %v3250_v41  ;;  %4650 = vst [vmem:[#allocation68_spill] sm:$0xff] %v3257_v60  ;;  %v4653_v25 = vunpack.i.h.bf16 %v3250_v41  ;;  %v1878_v60 = vunpack.i.l.bf16 %v2764_v23  ;;  %v1889_v23 = vunpack.i.h.bf16 %v2762_v22 }
 0x13c   : > { %v3262_v24 = vsel %vm738_vm12, %v4547_v34, %v2154_v1  ;;  %v3265_v6 = vsel %vm738_vm12, %v2154_v1, %v2158_v27  ;;  %2336 = vrot.lane.b32.xlu2 %v2695_v11, %s2606_s24  ;;  %v2143_v34 = vunpack.i.l.bf16 %v3152_v38  ;;  %v3286_v11 = vsel %vm283_vm15, %v1879_v61, %v1883_v4 }
 0x13d   : > { %4651 = vst [vmem:[#allocation69_spill] sm:$0xff] %v3262_v24  ;;  %v3274_v59 = vsel %vm738_vm12, %v2148_v55, %v4653_v25  ;;  %v3289_v25 = vsel %vm283_vm15, %v1883_v4, %v1884_v2  ;;  %v1888_v1 = vunpack.i.l.bf16 %v2762_v22  ;;  %v3295_v24 = vsel %vm283_vm15, %v1873_v57, %v1874_v19 }
 0x13e   : > { %4652 = vst [vmem:[#allocation70_spill] sm:$0xff] %v3265_v6  ;;  %v3280_v27 = vpop.permute.xlu2 %2201  ;;  %v2144_v6 = vunpack.i.h.bf16 %v3152_v38  ;;  %v3298_v44 = vsel %vm283_vm15, %v1874_v19, %v1878_v60  ;;  %v2350_v22 = vpack.i.bf16 %v3289_v25, %v3286_v11  ;;  %v3309_v57 = vsel %vm283_vm15, %v1878_v60, %v1879_v61 }
 0x13f   : > { %4654 = vst [vmem:[#allocation71_spill] sm:$0xff] %v3274_v59  ;;  %2331 = vrot.lane.b32.xlu1 %v2670_v3, %s2606_s24  ;;  %v4657_v4 = vunpack.i.l.bf16 %v3280_v27  ;;  %v2123_v19 = vunpack.i.l.bf16 %v3198_v42  ;;  %v2345_v42 = vpack.i.bf16 %v3309_v57, %v3298_v44  ;;  %v3328_v61 = vsel %vm283_vm15, %v1889_v23, %v2732_v13 }
 0x140   : > { %4655 = vst [vmem:[#allocation72_spill] sm:$0xff] %v3280_v27  ;;  %2326 = vrot.lane.b32.xlu0 %v2699_v12, %s2606_s24  ;;  %v739_v38 = vsel %vm738_vm12, %v2143_v34, %v2144_v6  ;;  %v2567_v34 = vld [vmem:[%s2656_s25 + $0x40] sm:$0xff] }
 0x141   : > { %4656 = vst [vmem:[#allocation73_spill] sm:$0xff] %v3289_v25  ;;  %v2162_v3 = vpop.permute.xlu1 %2161  ;;  %v3303_v56 = vpack.i.bf16 %v3073_v62, %v4657_v4  ;;  %v2103_v25 = vunpack.i.l.bf16 %v3156_v35  ;;  %v2340_v60 = vpack.i.bf16 %v3295_v24, %v2567_v34 }
 0x142   : > { %v2164_v20 = vunpack.i.h.bf16 %v2162_v3  ;;  %v2163_v59 = vunpack.i.l.bf16 %v2162_v3  ;;  %v737_v12 = vpop.permute.xlu0 %736  ;;  %4659 = vst [vmem:[#allocation75_spill] sm:$0xff] %v3309_v57 }
 0x143   : > { %4658 = vst [vmem:[#allocation74_spill] sm:$0xff] %v3303_v56  ;;  %v3312_v3 = vsel %vm738_vm12, %v2159_v49, %v737_v12  ;;  %v2104_v56 = vunpack.i.h.bf16 %v3156_v35  ;;  %v740_v49 = vsel %vm738_vm12, %v2144_v6, %v2148_v55  ;;  %v2084_v35 = vunpack.i.h.bf16 %v3050_v52 }
 0x144   : > { %4660 = vst [vmem:[#allocation76_spill] sm:$0xff] %v3312_v3  ;;  %v774_v27 = vsel %vm773_vm14, %v2163_v59, %v2164_v20  ;;  %v775_v4 = vsel %vm773_vm14, %v2164_v20, %v2168_v15  ;;  %2351 = vrot.lane.b32.xlu2 %v2350_v22, %s2606_s24  ;;  %v3331_v15 = vsel %vm283_vm15, %v1884_v2, %v1888_v1  ;;  %v2083_v59 = vunpack.i.l.bf16 %v3050_v52 }
 0x145   : > { %1373 = vmatpush.msra.mxu0 %v774_v27  ;;  %1413 = vmatpush.msra.mxu2 %v775_v4  ;;  %4661 = vst [vmem:[#allocation77_spill] sm:$0xff] %v3328_v61  ;;  %v2063_v27 = vunpack.i.l.bf16 %v3085_v29  ;;  %v3339_v55 = vsel %vm283_vm15, %v1888_v1, %v1889_v23  ;;  %v704_v2 = vsel %vm703_vm11, %v2123_v19, %v2124_v53  ;;  %v4664_v52 = vunpack.i.l.bf16 %v3194_v5 }
 0x146   : > { %4662 = vst [vmem:[#allocation78_spill] sm:$0xff] %v3331_v15  ;;  %v3336_v20 = vpop.permute.xlu2 %2216  ;;  %v2058_v23 = vunpack.i.l.bf16 %v3088_v10  ;;  %vm836_vm15 = vcmask 392192   ;;  %v669_v4 = vsel %vm668_vm10, %v2103_v25, %v2104_v56  ;;  %v2033_v25 = vunpack.i.l.bf16 %v3054_v46 }
 0x147   : > { %1374 = vmatpush.msra.mxu0 %v739_v38  ;;  %1414 = vmatpush.msra.mxu2 %v740_v49  ;;  %4663 = vst [vmem:[#allocation79_spill] sm:$0xff] %v3339_v55  ;;  %v4553_v6 = vunpack.i.h.bf16 %v3336_v20  ;;  %v4554_v12 = vunpack.i.l.bf16 %v3336_v20  ;;  %v705_v22 = vsel %vm703_vm11, %v2124_v53, %v4664_v52  ;;  %v3350_v38 = vunpack.i.h.bf16 %v3088_v10 }
 0x148   : > { %2346 = vrot.lane.b32.xlu1 %v2345_v42, %s2606_s24  ;;  %2341 = vrot.lane.b32.xlu0 %v2340_v60, %s2606_s24  ;;  %v4665_v49 = vunpack.i.l.bf16 %v3082_v31  ;;  %v3367_v42 = vunpack.i.h.bf16 %v3054_v46  ;;  %v2360_v46 = vpack.i.bf16 %v2732_v13, %v3328_v61 }
 0x149   : > { %v2177_v1 = vpop.permute.xlu1 %2176  ;;  %1375 = vmatpush.msra.mxu0 %v704_v2  ;;  %1415 = vmatpush.msra.mxu2 %v705_v22  ;;  %v3359_v19 = vsel %vm836_vm15, %v4554_v12, %v4553_v6  ;;  %v634_v22 = vsel %vm633_vm9, %v2083_v59, %v2084_v35 }
 0x14a   : > { %v2179_v34 = vunpack.i.h.bf16 %v2177_v1  ;;  %v2178_v53 = vunpack.i.l.bf16 %v2177_v1  ;;  %v3361_v60 = vpop.permute.xlu0 %2171  ;;  %v670_v10 = vsel %vm668_vm10, %v2104_v56, %v4665_v49  ;;  %v4666_v1 = vunpack.i.l.bf16 %v3125_v0 }
 0x14b   : > { %v2174_v2 = vunpack.i.h.bf16 %v3361_v60  ;;  %v4555_v52 = vunpack.i.l.bf16 %v3361_v60  ;;  %1376 = vmatpush.msra.mxu0 %v669_v4  ;;  %1416 = vmatpush.msra.mxu2 %v670_v10  ;;  %v599_v4 = vsel %vm598_vm8, %v2058_v23, %v3350_v38  ;;  %v4671_v23 = vunpack.i.l.bf16 %v2951_v45 }
 0x14c   : > { %v635_v6 = vsel %vm633_vm9, %v2084_v35, %v4666_v1  ;;  %v3377_v31 = vsel %vm773_vm14, %v2178_v53, %v2179_v34  ;;  %v3381_v56 = vsel %vm773_vm14, %v2179_v34, %v3209_v39  ;;  %v2013_v35 = vunpack.i.l.bf16 %v2908_v26 }
 0x14d   : > { %4667 = vst [vmem:[#allocation80_spill] sm:$0xff] %v3377_v31  ;;  %1377 = vmatpush.msra.mxu0 %v634_v22  ;;  %1417 = vmatpush.msra.mxu2 %v635_v6  ;;  %v3388_v59 = vsel %vm773_vm14, %v4555_v52, %v2174_v2  ;;  %v3391_v0 = vsel %vm773_vm14, %v2174_v2, %v2178_v53  ;;  %v1993_v34 = vunpack.i.l.bf16 %v2958_v51  ;;  %v1973_v2 = vunpack.i.l.bf16 %v2912_v43 }
 0x14e   : > { %4668 = vst [vmem:[#allocation81_spill] sm:$0xff] %v3381_v56  ;;  %v600_v39 = vsel %vm598_vm8, %v3350_v38, %v2063_v27  ;;  %v2355_v6 = vpack.i.bf16 %v3339_v55, %v3331_v15  ;;  %v3400_v13 = vpop.permute.xlu2 %2226  ;;  %v564_v53 = vsel %vm563_vm6, %v2033_v25, %v3367_v42  ;;  %v565_v49 = vsel %vm563_vm6, %v3367_v42, %v4671_v23 }
 0x14f   : > { %4669 = vst [vmem:[#allocation82_spill] sm:$0xff] %v3388_v59  ;;  %1378 = vmatpush.msra.mxu0 %v599_v4  ;;  %1418 = vmatpush.msra.mxu2 %v600_v39  ;;  %v4673_v25 = vunpack.i.h.bf16 %v3085_v29  ;;  %v4675_v23 = vunpack.i.h.bf16 %v2958_v51  ;;  %v1933_v29 = vunpack.i.l.bf16 %v2844_v54  ;;  %vm971_vm6 = vcmask 236544   ;;  %v4708_v59 = vld [vmem:[#allocation74_spill] sm:$0xff] }
 0x150   : > { %4670 = vst [vmem:[#allocation83_spill] sm:$0xff] %v3391_v0  ;;  %2361 = vrot.lane.b32.xlu1 %v2360_v46, %s2606_s24  ;;  %2356 = vrot.lane.b32.xlu0 %v2355_v6, %s2606_s24  ;;  %v4672_v46 = vunpack.i.h.bf16 %v2908_v26  ;;  %v4707_v0 = vld [vmem:[#allocation38_spill] sm:$0xff] }
 0x151   : > { %v2187_v10 = vpop.permute.xlu1 %2186  ;;  %1379 = vmatpush.msra.mxu0 %v564_v53  ;;  %1419 = vmatpush.msra.mxu2 %v565_v49  ;;  %v3418_v45 = vsel %vm598_vm8, %v2063_v27, %v4673_v25  ;;  %v1953_v53 = vunpack.i.l.bf16 %v2803_v36  ;;  %vm1369_vm8 = vcmask 719872  }
 0x152   : > { %v2189_v22 = vunpack.i.h.bf16 %v2187_v10  ;;  %v2188_v1 = vunpack.i.l.bf16 %v2187_v10  ;;  %v2182_v4 = vpop.permute.xlu0 %2181  ;;  %v529_v6 = vsel %vm528_vm7, %v2013_v35, %v4672_v46  ;;  %4674 = vst [vmem:[#allocation84_spill] sm:$0xff] %v3418_v45  ;;  %v494_v10 = vsel %vm493_vm5, %v1993_v34, %v4675_v23 }
 0x153   : > { %v2184_v12 = vunpack.i.h.bf16 %v2182_v4  ;;  %v2183_v52 = vunpack.i.l.bf16 %v2182_v4  ;;  %1380 = vmatpush.msra.mxu0 %v529_v6  ;;  %1420 = vmatpush.msra.mxu2 %v3040_v8  ;;  %v4676_v35 = vunpack.i.l.bf16 %v3229_v48  ;;  %v2375_v34 = vpack.i.bf16 %v565_v49, %v3418_v45 }
 0x154   : > { %v3426_v26 = vsel %vm809_vm13, %v2188_v1, %v2189_v22  ;;  %v4677_v46 = vunpack.i.h.bf16 %v2912_v43  ;;  %v1894_v49 = vunpack.i.h.bf16 %v2738_v14  ;;  %vm944_vm5 = vcmask 302080  }
 0x155   : > { %v3431_v4 = vsel %vm809_vm13, %v2189_v22, %v4676_v35  ;;  %v810_v27 = vsel %vm809_vm13, %v2183_v52, %v2184_v12  ;;  %1381 = vmatpush.msra.mxu0 %v494_v10  ;;  %1421 = vmatpush.msra.mxu2 %v2979_v7  ;;  %v811_v8 = vsel %vm809_vm13, %v2184_v12, %v2188_v1  ;;  %v1914_v22 = vunpack.i.h.bf16 %v2806_v37 }
 0x156   : > { %v2365_v51 = vpack.i.bf16 %v810_v27, %v2183_v52  ;;  %v459_v6 = vsel %vm458_vm4, %v1973_v2, %v4677_v46  ;;  %v2370_v25 = vpack.i.bf16 %v600_v39, %v811_v8  ;;  %v3441_v23 = vpop.permute.xlu2 %861  ;;  %v1913_v10 = vunpack.i.l.bf16 %v2806_v37 }
 0x157   : > { %1382 = vmatpush.msra.mxu0 %v459_v6  ;;  %1422 = vmatpush.msra.mxu2 %v2921_v28  ;;  %v4678_v7 = vunpack.i.h.bf16 %v2803_v36  ;;  %v1893_v52 = vunpack.i.l.bf16 %v2738_v14  ;;  %v4679_v28 = vunpack.i.h.bf16 %v2844_v54  ;;  %vm917_vm4 = vcmask 310272  }
 0x158   : > { %2366 = vrot.lane.b32.xlu2 %v2365_v51, %s2606_s24  ;;  %2376 = vrot.lane.b32.xlu1 %v2375_v34, %s2606_s24  ;;  %v354_v36 = vsel %vm353_vm1, %v1913_v10, %v1914_v22  ;;  %vm1184_vm7 = vcmask 56320  }
 0x159   : > { %v424_v43 = vsel %vm423_vm3, %v1953_v53, %v4678_v7  ;;  %2371 = vrot.lane.b32.xlu0 %v2370_v25, %s2606_s24  ;;  %v808_v12 = vpop.permute.xlu1 %807  ;;  %1423 = vmatpush.msra.mxu2 %v2898_v50  ;;  %v389_v37 = vsel %vm388_vm2, %v1933_v29, %v4679_v28  ;;  %v4680_v53 = vunpack.i.h.bf16 %v3229_v48  ;;  %v4681_v50 = vunpack.i.l.bf16 %v2752_v18 }
 0x15a   : > { %1383 = vmatpush.msra.mxu0 %v424_v43  ;;  %v2197_v39 = vpop.permute.xlu0 %2196  ;;  %v4682_v48 = vunpack.i.l.bf16 %v2776_v30  ;;  %vm890_vm2 = vcmask 318464   ;;  %v2568_v43 = vld [vmem:[%s2656_s25] sm:$0xff]  ;;  %vm863_vm3 = vcmask 384000  }
 0x15b   : > { %v2199_v2 = vunpack.i.h.bf16 %v2197_v39  ;;  %v2198_v1 = vunpack.i.l.bf16 %v2197_v39  ;;  %1424 = vmatpush.msra.mxu2 %v2857_v58  ;;  %v355_v54 = vsel %vm353_vm1, %v1914_v22, %v4681_v50  ;;  %v319_v58 = vsel %vm318_vm0, %v1893_v52, %v1894_v49 }
 0x15c   : > { %1384 = vmatpush.msra.mxu0 %v389_v37  ;;  %v320_v8 = vsel %vm318_vm0, %v1894_v49, %v4682_v48  ;;  %v4685_v39 = vunpack.i.l.bf16 %v3336_v20  ;;  %v4686_v49 = vunpack.i.l.bf16 %v3238_v17  ;;  %v4689_v50 = vunpack.i.h.bf16 %v3194_v5 }
 0x15d   : > { %v3463_v35 = vsel %vm809_vm13, %v4680_v53, %v2198_v1  ;;  %v3469_v29 = vsel %vm809_vm13, %v2198_v1, %v2199_v2  ;;  %v3472_v14 = vsel %vm809_vm13, %v2199_v2, %v808_v12  ;;  %1425 = vmatpush.msra.mxu2 %v355_v54  ;;  %v4683_v12 = vunpack.i.l.bf16 %v3361_v60 }
 0x15e   : > { %1385 = vmatpush.msra.mxu0 %v354_v36  ;;  %v3475_v27 = vpop.permute.xlu2 %2251  ;;  %v4687_v2 = vunpack.i.h.bf16 %v3250_v41  ;;  %v4688_v53 = vunpack.i.l.bf16 %v3120_v33  ;;  %v2228_v17 = vunpack.i.l.bf16 %v3400_v13  ;;  %v4695_v5 = vunpack.i.h.bf16 %v2752_v18 }
 0x15f   : > { %v2254_v51 = vunpack.i.h.bf16 %v3475_v27  ;;  %v2253_v34 = vunpack.i.l.bf16 %v3475_v27  ;;  %1426 = vmatpush.msra.mxu2 %v320_v8  ;;  %v4690_v8 = vunpack.i.h.bf16 %v3336_v20  ;;  %v4698_v1 = vunpack.i.h.bf16 %v2776_v30 }
 0x160   : > { %1386 = vmatpush.msra.mxu0 %v319_v58  ;;  %v742_v60 = vsel %vm738_vm12, %v4687_v2, %v4686_v49  ;;  %v707_v54 = vsel %vm703_vm11, %v4689_v50, %v4688_v53  ;;  %v4696_v53 = vld [vmem:[#allocation4_spill] sm:$0xff] }
 0x161   : > { %v2212_v46 = vpop.permute.xlu1 %2211  ;;  %v3488_v6 = vsel %vm890_vm2, %v2253_v34, %v2254_v51  ;;  %1427 = vmatpush.msra.mxu2 %v3298_v44  ;;  %v2569_v44 = vld [vmem:[%s2656_s25 + $0x8] sm:$0xff]  ;;  %v4697_v2 = vunpack.i.l.bf16 %v4696_v53 }
 0x162   : > { %1387 = vmatpush.msra.mxu0 %v3295_v24  ;;  %v2214_v25 = vunpack.i.h.bf16 %v2212_v46  ;;  %v2213_v22 = vunpack.i.l.bf16 %v2212_v46  ;;  %v3490_v10 = vpop.permute.xlu0 %2206  ;;  %v4684_v24 = vunpack.i.h.bf16 %v3191_v16 }
 0x163   : > { %v2209_v7 = vunpack.i.h.bf16 %v3490_v10  ;;  %1428 = vmatpush.msra.mxu2 %v2569_v44 }
 0x164   : > { %1388 = vmatpush.msra.mxu0 %v2568_v43  ;;  %v777_v52 = vsel %vm773_vm14, %v4684_v24, %v4683_v12  ;;  %v3503_v28 = vsel %vm836_vm15, %v2214_v25, %v4685_v39  ;;  %v3506_v37 = vsel %vm836_vm15, %v2213_v22, %v2214_v25 }
 0x165   : > { %v3515_v16 = vsel %vm836_vm15, %v2209_v7, %v2213_v22  ;;  %v2229_v22 = vunpack.i.h.bf16 %v3400_v13 }
 0x166   : > { %1493 = vmatpush.msrb.mxu0 %v777_v52  ;;  %v3519_v36 = vpop.permute.xlu2 %2261 }
 0x168   : > { %1494 = vmatpush.msrb.mxu0 %v742_v60 }
 0x169   : > { %v3527_v41 = vpop.permute.xlu1 %2221 }
 0x16a   : > { %1495 = vmatpush.msrb.mxu0 %v707_v54  ;;  %v4556_v58 = vunpack.i.h.bf16 %v3527_v41  ;;  %v835_v48 = vpop.permute.xlu0 %834  ;;  %v4691_v54 = vld [vmem:[#allocation23_spill] sm:$0xff] }
 0x16b   : > { %v3534_v46 = vsel %vm836_vm15, %v4690_v8, %v835_v48 }
 0x16c   : > { %1496 = vmatpush.msrb.mxu0 %v3182_v47  ;;  %v3542_v33 = vsel %vm863_vm3, %v4556_v58, %v2228_v17 }
 0x16e   : > { %1497 = vmatpush.msrb.mxu0 %v3143_v9  ;;  %v3545_v25 = vpop.permute.xlu2 %2276  ;;  %v4557_v9 = vunpack.i.l.bf16 %v3490_v10 }
 0x16f   : > { %v2279_v47 = vunpack.i.h.bf16 %v3545_v25  ;;  %v2278_v20 = vunpack.i.l.bf16 %v3545_v25 }
 0x170   : > { %1498 = vmatpush.msrb.mxu0 %v3093_v40 }
 0x171   : > { %v2237_v43 = vpop.permute.xlu1 %2236  ;;  %v3555_v12 = vsel %vm917_vm4, %v2278_v20, %v2279_v47 }
 0x172   : > { %1499 = vmatpush.msrb.mxu0 %v3073_v62  ;;  %v2239_v24 = vunpack.i.h.bf16 %v2237_v43  ;;  %v2238_v52 = vunpack.i.l.bf16 %v2237_v43  ;;  %v3557_v39 = vpop.permute.xlu0 %2231 }
 0x173   : > { %v4559_v44 = vunpack.i.h.bf16 %v3557_v39  ;;  %v4558_v62 = vunpack.i.l.bf16 %v3557_v39 }
 0x174   : > { %1500 = vmatpush.msrb.mxu0 %v3043_v63  ;;  %v3563_v13 = vsel %vm863_vm3, %v2238_v52, %v2239_v24  ;;  %v3567_v49 = vsel %vm863_vm3, %v2239_v24, %v3441_v23  ;;  %v4693_v24 = vld [vmem:[#allocation10_spill] sm:$0xff] }
 0x175   : > { %v3577_v63 = vsel %vm863_vm3, %v4559_v44, %v2238_v52  ;;  %v3590_v23 = vsel %vm863_vm3, %v2229_v22, %v4558_v62  ;;  %v4694_v52 = vunpack.i.l.bf16 %v4693_v24 }
 0x176   : > { %1501 = vmatpush.msrb.mxu0 %v2970_v21  ;;  %v3585_v21 = vsel %vm836_vm15, %v4557_v9, %v2209_v7  ;;  %v3599_v7 = vsel %vm863_vm3, %v2228_v17, %v2229_v22  ;;  %v2570_v22 = vld [vmem:[%s2656_s25 + $0x18] sm:$0xff] }
 0x177   : > { %v357_v60 = vsel %vm353_vm1, %v4695_v5, %v4694_v52 }
 0x178   : > { %1502 = vmatpush.msrb.mxu0 %v2942_v32  ;;  %v4692_v32 = vld [vmem:[#allocation14_spill] sm:$0xff] }
 0x179   : > { %v2247_v48 = vpop.permute.xlu1 %2246 }
 0x17a   : > { %1503 = vmatpush.msrb.mxu0 %v4691_v54  ;;  %v2249_v8 = vunpack.i.h.bf16 %v2247_v48  ;;  %v3595_v43 = vpop.permute.xlu0 %2241 }
 0x17b   : > { %v2244_v55 = vunpack.i.h.bf16 %v3595_v43  ;;  %v4565_v3 = vunpack.i.l.bf16 %v3595_v43 }
 0x17c   : > { %1504 = vmatpush.msrb.mxu0 %v4692_v32  ;;  %v3609_v54 = vsel %vm890_vm2, %v2249_v8, %v2253_v34  ;;  %v322_v32 = vsel %vm318_vm0, %v4698_v1, %v4697_v2  ;;  %v3620_v34 = vpop.permute.xlu2 %2286 }
 0x17d   : > { %v4564_v62 = vunpack.i.l.bf16 %v3620_v34 }
 0x17e   : > { %1505 = vmatpush.msrb.mxu0 %v357_v60 }
 0x180   : > { %1506 = vmatpush.msrb.mxu0 %v322_v32 }
 0x181   : > { %v889_v18 = vpop.permute.xlu1 %888 }
 0x182   : > { %1507 = vmatpush.msrb.mxu0 %v3286_v11  ;;  %v2257_v5 = vpop.permute.xlu0 %2256  ;;  %v4699_v11 = vld [vmem:[#allocation67_spill] sm:$0xff] }
 0x183   : > { %v2259_v60 = vunpack.i.h.bf16 %v2257_v5  ;;  %v2258_v52 = vunpack.i.l.bf16 %v2257_v5  ;;  %v2248_v5 = vunpack.i.l.bf16 %v2247_v48 }
 0x184   : > { %1508 = vmatpush.msrb.mxu0 %v2570_v22  ;;  %v943_v32 = vpop.permute.xlu2 %942 }
 0x185   : > { %v3623_v50 = vsel %vm890_vm2, %v2259_v60, %v889_v18  ;;  %v3626_v30 = vsel %vm890_vm2, %v2258_v52, %v2259_v60  ;;  %v3631_v1 = vsel %vm890_vm2, %v2254_v51, %v2258_v52  ;;  %v4700_v51 = vld [vmem:[#allocation32_spill] sm:$0xff]  ;;  %v3649_v2 = vsel %vm890_vm2, %v2248_v5, %v2249_v8 }
 0x189   : > { %v2272_v22 = vpop.permute.xlu1 %2271 }
 0x18a   : > { %v2274_v17 = vunpack.i.h.bf16 %v2272_v22  ;;  %v2273_v58 = vunpack.i.l.bf16 %v2272_v22  ;;  %v3637_v18 = vpop.permute.xlu0 %2266 }
 0x18b   : > { %v4560_v60 = vunpack.i.h.bf16 %v3637_v18 }
 0x18c   : > { %v3641_v9 = vsel %vm917_vm4, %v2273_v58, %v2274_v17  ;;  %v3644_v27 = vsel %vm917_vm4, %v2274_v17, %v2278_v20  ;;  %v3679_v25 = vpop.permute.xlu2 %2311 }
 0x18d   : > { %v3654_v48 = vsel %vm917_vm4, %v4560_v60, %v2273_v58 }
 0x191   : > { %v3659_v44 = vpop.permute.xlu1 %2281 }
 0x192   : > { %v2284_v20 = vunpack.i.h.bf16 %v3659_v44  ;;  %v4563_v17 = vunpack.i.l.bf16 %v3659_v44  ;;  %v916_v8 = vpop.permute.xlu0 %915 }
 0x193   : > { %v3666_v52 = vsel %vm917_vm4, %v2279_v47, %v916_v8 }
 0x194   : > { %v945_v22 = vsel %vm944_vm5, %v4563_v17, %v2284_v20  ;;  %v946_v60 = vsel %vm944_vm5, %v2284_v20, %v4564_v62  ;;  %v891_v17 = vsel %vm890_vm2, %v4565_v3, %v2244_v55  ;;  %v892_v20 = vsel %vm890_vm2, %v2244_v55, %v2248_v5  ;;  %v3721_v55 = vpop.permute.xlu2 %2321 }
 0x195   : > { %v2390_v61 = vpack.i.bf16 %v946_v60, %v945_v22  ;;  %v4701_v22 = vunpack.i.h.bf16 %v3557_v39  ;;  %v4702_v62 = vunpack.i.l.bf16 %v3557_v39  ;;  %v2405_v5 = vpack.i.bf16 %v892_v20, %v891_v17  ;;  %v4703_v60 = vld [vmem:[#allocation72_spill] sm:$0xff] }
 0x196   : > { %v2204_v15 = vunpack.i.h.bf16 %v4703_v60  ;;  %v4705_v3 = vunpack.i.l.bf16 %v4703_v60  ;;  %v4706_v17 = vunpack.i.l.bf16 %v3490_v10  ;;  %v2264_v60 = vunpack.i.h.bf16 %v3519_v36 }
 0x197   : > { %2391 = vrot.lane.b32.xlu1 %v2390_v61, %s2606_s24  ;;  %v3693_v61 = vsel %vm863_vm3, %v4702_v62, %v4701_v22 }
 0x198   : > { %v837_v53 = vsel %vm836_vm15, %v4705_v3, %v2204_v15  ;;  %v838_v20 = vsel %vm836_vm15, %v2204_v15, %v4706_v17  ;;  %v2263_v3 = vunpack.i.l.bf16 %v3519_v36 }
 0x199   : > { %v2297_v47 = vpop.permute.xlu1 %2296 }
 0x19a   : > { %v2299_v8 = vunpack.i.h.bf16 %v2297_v47  ;;  %v2298_v58 = vunpack.i.l.bf16 %v2297_v47  ;;  %v3681_v56 = vpop.permute.xlu0 %2291 }
 0x19b   : > { %v4704_v39 = vunpack.i.h.bf16 %v3681_v56 }
 0x19c   : > { %v3696_v31 = vsel %vm944_vm5, %v2298_v58, %v2299_v8  ;;  %v3699_v47 = vsel %vm944_vm5, %v2299_v8, %v943_v32  ;;  %v3739_v36 = vpop.permute.xlu2 %2336 }
 0x19d   : > { %v3709_v62 = vsel %vm944_vm5, %v4704_v39, %v2298_v58  ;;  %v2420_v39 = vpack.i.bf16 %v838_v20, %v837_v53  ;;  %v2268_v53 = vunpack.i.l.bf16 %v3637_v18 }
 0x19f   : > { %2406 = vrot.lane.b32.xlu1 %v2405_v5, %s2606_s24 }
 0x1a1   : > { %v3712_v22 = vpop.permute.xlu1 %2306 }
 0x1a2   : > { %v4568_v32 = vunpack.i.l.bf16 %v3712_v22  ;;  %v2302_v8 = vpop.permute.xlu0 %2301 }
 0x1a3   : > { %v2304_v24 = vunpack.i.h.bf16 %v2302_v8  ;;  %v2303_v58 = vunpack.i.l.bf16 %v2302_v8 }
 0x1a4   : > { %v3771_v45 = vpop.permute.xlu2 %2351 }
 0x1a5   : > { %v972_v5 = vsel %vm971_vm6, %v2303_v58, %v2304_v24  ;;  %v973_v57 = vsel %vm971_vm6, %v2304_v24, %v4568_v32  ;;  %v918_v24 = vsel %vm917_vm4, %v2263_v3, %v2264_v60  ;;  %v4710_v32 = vunpack.i.h.bf16 %v3527_v41 }
 0x1a6   : > { %v2380_v10 = vpack.i.bf16 %v972_v5, %v4707_v0  ;;  %v2385_v15 = vpack.i.bf16 %v3350_v38, %v973_v57  ;;  %v919_v5 = vsel %vm917_vm4, %v2264_v60, %v2268_v53  ;;  %v2395_v38 = vpack.i.bf16 %v918_v24, %v3367_v42 }
 0x1a7   : > { %2421 = vrot.lane.b32.xlu1 %v2420_v39, %s2606_s24  ;;  %v2289_v39 = vunpack.i.h.bf16 %v3620_v34  ;;  %v2223_v60 = vunpack.i.l.bf16 %v3527_v41  ;;  %v2415_v0 = vpack.i.bf16 %v2263_v3, %v3542_v33  ;;  %v4572_v41 = vunpack.i.l.bf16 %v3771_v45 }
 0x1a8   : > { %2381 = vrot.lane.b32.xlu2 %v2380_v10, %s2606_s24  ;;  %2386 = vrot.lane.b32.xlu0 %v2385_v15, %s2606_s24  ;;  %v2293_v10 = vunpack.i.l.bf16 %v3681_v56  ;;  %v2400_v15 = vpack.i.bf16 %v2303_v58, %v919_v5  ;;  %v4709_v58 = vunpack.i.h.bf16 %v3637_v18  ;;  %v4571_v18 = vunpack.i.h.bf16 %v3739_v36 }
 0x1a9   : > { %v970_v8 = vpop.permute.xlu1 %969 }
 0x1aa   : > { %v3735_v17 = vpop.permute.xlu0 %2316  ;;  %v948_v24 = vsel %vm944_vm5, %v2289_v39, %v2293_v10  ;;  %v920_v5 = vsel %vm917_vm4, %v2268_v53, %v4709_v58 }
 0x1ab   : > { %v4569_v20 = vunpack.i.h.bf16 %v3735_v17 }
 0x1ad   : > { %v3745_v57 = vsel %vm971_vm6, %v4569_v20, %v970_v8  ;;  %v2450_v20 = vpack.i.bf16 %v920_v5, %v948_v24  ;;  %v4713_v5 = vld [vmem:[#allocation37_spill] sm:$0xff] }
 0x1af   : > { %2436 = vrot.lane.b32.xlu1 %v4708_v59, %s2606_s24  ;;  %v864_v59 = vsel %vm863_vm3, %v2223_v60, %v4710_v32 }
 0x1b0   : > { %2396 = vrot.lane.b32.xlu2 %v2395_v38, %s2606_s24  ;;  %2401 = vrot.lane.b32.xlu0 %v2400_v15, %s2606_s24  ;;  %v4711_v38 = vunpack.i.l.bf16 %v3659_v44 }
 0x1b1   : > { %v3757_v8 = vpop.permute.xlu1 %2331 }
 0x1b2   : > { %v3759_v42 = vpop.permute.xlu0 %2326  ;;  %v2410_v15 = vpack.i.bf16 %v864_v59, %v4711_v38  ;;  %v2430_v59 = vpack.i.bf16 %v4713_v5, %v3093_v40  ;;  %v4714_v38 = vunpack.i.l.bf16 %v3595_v43  ;;  %v4717_v43 = vunpack.i.l.bf16 %v3712_v22 }
 0x1b7   : > { %2451 = vrot.lane.b32.xlu1 %v2450_v20, %s2606_s24 }
 0x1b8   : > { %2411 = vrot.lane.b32.xlu2 %v2410_v15, %s2606_s24  ;;  %2416 = vrot.lane.b32.xlu0 %v2415_v0, %s2606_s24  ;;  %v2425_v15 = vpack.i.bf16 %v2223_v60, %v4714_v38  ;;  %v4718_v38 = vunpack.i.l.bf16 %v3620_v34 }
 0x1ba   : > { %v3778_v53 = vpop.permute.xlu1 %2346  ;;  %v2342_v32 = vpop.permute.xlu0 %2341 }
 0x1bb   : > { %v4574_v44 = vunpack.i.h.bf16 %v3778_v53  ;;  %v4573_v24 = vunpack.i.l.bf16 %v3778_v53  ;;  %v2344_v33 = vunpack.i.h.bf16 %v2342_v32  ;;  %v2343_v3 = vunpack.i.l.bf16 %v2342_v32 }
 0x1bc   : > { %v2309_v32 = vunpack.i.h.bf16 %v3712_v22  ;;  %v4721_v22 = vunpack.i.h.bf16 %v3771_v45 }
 0x1bd   : > { %v3785_v20 = vsel %vm1184_vm7, %v2344_v33, %v4573_v24  ;;  %v3792_v0 = vsel %vm1184_vm7, %v4574_v44, %v4572_v41  ;;  %v3797_v58 = vsel %vm1184_vm7, %v4571_v18, %v2343_v3  ;;  %v4715_v33 = vpack.i.bf16 %v3585_v21, %v3590_v23  ;;  %v4719_v24 = vld [vmem:[#allocation49_spill] sm:$0xff]  ;;  %v4720_v44 = vld [vmem:[#allocation46_spill] sm:$0xff] }
 0x1be   : > { %4712 = vst [vmem:[#allocation23_spill] sm:$0xff] %v3797_v58  ;;  %v2313_v3 = vunpack.i.l.bf16 %v3679_v25  ;;  %v974_v60 = vsel %vm971_vm6, %v4717_v43, %v2309_v32  ;;  %v947_v21 = vsel %vm944_vm5, %v4718_v38, %v2289_v39  ;;  %v2480_v18 = vpack.i.bf16 %v4720_v44, %v4719_v24  ;;  %v4722_v39 = vld [vmem:[#allocation45_spill] sm:$0xff] }
 0x1bf   : > { %2466 = vrot.lane.b32.xlu1 %v4715_v33, %s2606_s24  ;;  %v2440_v38 = vpack.i.bf16 %v974_v60, %v4722_v39  ;;  %v4724_v60 = vld [vmem:[#allocation47_spill] sm:$0xff] }
 0x1c0   : > { %2426 = vrot.lane.b32.xlu2 %v2425_v15, %s2606_s24  ;;  %2431 = vrot.lane.b32.xlu0 %v2430_v59, %s2606_s24  ;;  %v975_v33 = vsel %vm971_vm6, %v2309_v32, %v2313_v3 }
 0x1c1   : > { %v2445_v32 = vpack.i.bf16 %v947_v21, %v975_v33 }
 0x1c2   : > { %v3812_v41 = vpop.permute.xlu1 %2361  ;;  %v3814_v40 = vpop.permute.xlu0 %2356 }
 0x1c3   : > { %4716 = vst [vmem:[#allocation14_spill] sm:$0xff] %v3812_v41  ;;  %v4578_v23 = vunpack.i.l.bf16 %v3812_v41  ;;  %v4580_v59 = vunpack.i.h.bf16 %v3814_v40  ;;  %v4575_v15 = vunpack.i.l.bf16 %v3814_v40 }
 0x1c5   : > { %v3833_v43 = vsel %vm1184_vm7, %v4721_v22, %v4575_v15  ;;  %v3840_v34 = vsel %vm1184_vm7, %v4580_v59, %v4578_v23  ;;  %v4723_v22 = vunpack.i.h.bf16 %v3681_v56  ;;  %v4725_v56 = vpack.i.bf16 %v3649_v2, %v3654_v48 }
 0x1c6   : > { %v4729_v2 = vpack.i.bf16 %v3426_v26, %v3515_v16  ;;  %v2328_v48 = vunpack.i.l.bf16 %v3759_v42 }
 0x1c7   : > { %2481 = vrot.lane.b32.xlu1 %v2480_v18, %s2606_s24  ;;  %v949_v15 = vsel %vm944_vm5, %v2293_v10, %v4723_v22  ;;  %v2318_v18 = vunpack.i.l.bf16 %v3735_v17  ;;  %v4726_v10 = vpack.i.bf16 %v3599_v7, %v3609_v54  ;;  %v4728_v22 = vld [vmem:[#allocation50_spill] sm:$0xff]  ;;  %v2324_v7 = vunpack.i.h.bf16 %v3721_v55 }
 0x1c8   : > { %2441 = vrot.lane.b32.xlu2 %v2440_v38, %s2606_s24  ;;  %2446 = vrot.lane.b32.xlu0 %v2445_v32, %s2606_s24  ;;  %v2495_v21 = vpack.i.bf16 %v949_v15, %v4724_v60  ;;  %v4727_v15 = vunpack.i.h.bf16 %v3735_v17  ;;  %v2475_v60 = vpack.i.bf16 %v4728_v22, %v3431_v4  ;;  %v4581_v54 = vunpack.i.l.bf16 %v3757_v8  ;;  %v4730_v17 = vld [vmem:[#allocation43_spill] sm:$0xff] }
 0x1c9   : > { %v3897_v26 = vsel %vm1184_vm7, %v2324_v7, %v2328_v48 }
 0x1ca   : > { %v3846_v58 = vpop.permute.xlu1 %2376  ;;  %v978_v38 = vsel %vm971_vm6, %v2318_v18, %v4727_v15  ;;  %v2334_v15 = vunpack.i.h.bf16 %v3757_v8 }
 0x1cb   : > { %v2378_v24 = vunpack.i.l.bf16 %v3846_v58  ;;  %v3852_v41 = vpop.permute.xlu0 %2371  ;;  %v2510_v32 = vpack.i.bf16 %v978_v38, %v3644_v27  ;;  %v2329_v27 = vunpack.i.h.bf16 %v3759_v42 }
 0x1cc   : > { %v2374_v23 = vunpack.i.h.bf16 %v3852_v41 }
 0x1cd   : > { %v3904_v16 = vsel %vm1184_vm7, %v2329_v27, %v4581_v54 }
 0x1ce   : > { %v1266_v33 = vsel %vm1184_vm7, %v2374_v23, %v2378_v24 }
 0x1cf   : > { %1438 = vmatpush.msra.mxu3 %v1266_v33  ;;  %2496 = vrot.lane.b32.xlu1 %v2495_v21, %s2606_s24  ;;  %v2314_v21 = vunpack.i.h.bf16 %v3679_v25 }
 0x1d0   : > { %2456 = vrot.lane.b32.xlu2 %v4725_v56, %s2606_s24  ;;  %2461 = vrot.lane.b32.xlu0 %v4726_v10, %s2606_s24  ;;  %v4731_v56 = vld [vmem:[#allocation51_spill] sm:$0xff] }
 0x1d1   : > { %v976_v4 = vsel %vm971_vm6, %v2313_v3, %v2314_v21  ;;  %v977_v25 = vsel %vm971_vm6, %v2314_v21, %v2318_v18  ;;  %v4732_v3 = vpack.i.bf16 %v3693_v61, %v3699_v47  ;;  %v4579_v18 = vunpack.i.l.bf16 %v3739_v36 }
 0x1d2   : > { %v2485_v33 = vpack.i.bf16 %v976_v4, %v4730_v17  ;;  %v2490_v10 = vpack.i.bf16 %v4731_v56, %v977_v25  ;;  %v4734_v61 = vpack.i.bf16 %v3626_v30, %v3503_v28  ;;  %v4735_v47 = vpack.i.bf16 %v3641_v9, %v4700_v51 }
 0x1d3   : > { %v3919_v38 = vsel %vm1184_vm7, %v2334_v15, %v4579_v18  ;;  %v4736_v21 = vpack.i.bf16 %v3359_v19, %v3567_v49  ;;  %v4738_v28 = vpack.i.bf16 %v3696_v31, %v3631_v1  ;;  %v4739_v9 = vpack.i.bf16 %v3555_v12, %v3577_v63  ;;  %v3952_v49 = vpop.permute.xlu2 %2366 }
 0x1d4   : > { %v4740_v19 = vpack.i.bf16 %v3506_v37, %v3666_v52  ;;  %v4742_v31 = vpack.i.bf16 %v3563_v13, %v3463_v35  ;;  %v2379_v12 = vunpack.i.h.bf16 %v3846_v58 }
 0x1d7   : > { %2511 = vrot.lane.b32.xlu1 %v2510_v32, %s2606_s24  ;;  %v4733_v32 = vld [vmem:[#allocation44_spill] sm:$0xff] }
 0x1d8   : > { %2471 = vrot.lane.b32.xlu2 %v4729_v2, %s2606_s24  ;;  %2476 = vrot.lane.b32.xlu0 %v2475_v60, %s2606_s24  ;;  %v2500_v60 = vpack.i.bf16 %v4733_v32, %v3709_v62  ;;  %v4737_v62 = vpack.i.bf16 %v3488_v6, %v3745_v57  ;;  %v4741_v6 = vpack.i.bf16 %v4699_v11, %v3623_v50 }
 0x1d9   : > { %v4743_v50 = vpack.i.bf16 %v3469_v29, %v3534_v46 }
 0x1df   : > { %2526 = vrot.lane.b32.xlu1 %v4732_v3, %s2606_s24 }
 0x1e0   : > { %2486 = vrot.lane.b32.xlu2 %v2485_v33, %s2606_s24  ;;  %2491 = vrot.lane.b32.xlu0 %v2490_v10, %s2606_s24 }
 0x1e7   : > { %2541 = vrot.lane.b32.xlu1 %v4734_v61, %s2606_s24 }
 0x1e8   : > { %2501 = vrot.lane.b32.xlu2 %v2500_v60, %s2606_s24  ;;  %2506 = vrot.lane.b32.xlu0 %v4735_v47, %s2606_s24 }
 0x1ef   : > { %2556 = vrot.lane.b32.xlu1 %v4736_v21, %s2606_s24 }
 0x1f0   : > { %2516 = vrot.lane.b32.xlu2 %v4737_v62, %s2606_s24  ;;  %2521 = vrot.lane.b32.xlu0 %v4738_v28, %s2606_s24 }
 0x1f8   : > { %2531 = vrot.lane.b32.xlu2 %v4739_v9, %s2606_s24  ;;  %2536 = vrot.lane.b32.xlu0 %v4740_v19, %s2606_s24 }
 0x200   : > { %2546 = vrot.lane.b32.xlu2 %v4741_v6, %s2606_s24  ;;  %2551 = vrot.lane.b32.xlu0 %v4742_v31, %s2606_s24 }
 0x202   : > { %v3962_v30 = vpop.permute.xlu2 %2381 }
 0x203   : > { %v2383_v63 = vunpack.i.l.bf16 %v3962_v30  ;;  %v2384_v52 = vunpack.i.h.bf16 %v3962_v30 }
 0x205   : > { %v1258_v37 = vsel %vm1184_vm7, %v2379_v12, %v2383_v63 }
 0x206   : > { %1439 = vmatpush.msra.mxu3 %v1258_v37 }
 0x208   : > { %2561 = vrot.lane.b32.xlu2 %v4743_v50, %s2606_s24  ;;  %1038 = vrot.lane.b32.xlu0 %v3472_v14, %s2606_s24 }
 0x209   : > { %v3975_v35 = vpop.permute.xlu1 %2391 }
 0x20a   : > { %v2397_v13 = vpop.permute.xlu2 %2396  ;;  %v2394_v57 = vunpack.i.h.bf16 %v3975_v35  ;;  %v2393_v46 = vunpack.i.l.bf16 %v3975_v35 }
 0x20b   : > { %v2398_v29 = vunpack.i.l.bf16 %v2397_v13  ;;  %v2399_v47 = vunpack.i.h.bf16 %v2397_v13 }
 0x20c   : > { %v1242_v60 = vsel %vm1184_vm7, %v2393_v46, %v2394_v57 }
 0x20d   : > { %v1257_v3 = vsel %vm1184_vm7, %v2398_v29, %v2379_v12 }
 0x211   : > { %v3977_v1 = vpop.permute.xlu1 %2406 }
 0x212   : > { %v2412_v11 = vpop.permute.xlu2 %2411  ;;  %v2409_v21 = vunpack.i.h.bf16 %v3977_v1  ;;  %v2408_v9 = vunpack.i.l.bf16 %v3977_v1 }
 0x213   : > { %v2413_v28 = vunpack.i.l.bf16 %v2412_v11  ;;  %v2414_v13 = vunpack.i.h.bf16 %v2412_v11 }
 0x214   : > { %v1226_v50 = vsel %vm1184_vm7, %v2408_v9, %v2409_v21 }
 0x215   : > { %v1241_v37 = vsel %vm1184_vm7, %v2413_v28, %v2393_v46  ;;  %v2373_v28 = vunpack.i.l.bf16 %v3852_v41 }
 0x219   : > { %v3979_v51 = vpop.permute.xlu1 %2421 }
 0x21a   : > { %v2427_v2 = vpop.permute.xlu2 %2426  ;;  %v3983_v4 = vpop.permute.xlu0 %2386  ;;  %v2424_v29 = vunpack.i.h.bf16 %v3979_v51 }
 0x21b   : > { %v2389_v14 = vunpack.i.h.bf16 %v3983_v4  ;;  %v2388_v25 = vunpack.i.l.bf16 %v3983_v4 }
 0x21d   : > { %v1265_v33 = vsel %vm1184_vm7, %v2389_v14, %v2374_v23  ;;  %v1250_v10 = vsel %vm1184_vm7, %v2384_v52, %v2388_v25 }
 0x21e   : > { %1398 = vmatpush.msra.mxu1 %v1265_v33  ;;  %1440 = vmatpush.msra.mxu3 %v1250_v10  ;;  %v2423_v33 = vunpack.i.l.bf16 %v3979_v51 }
 0x220   : > { %1399 = vmatpush.msra.mxu1 %v1257_v3  ;;  %1441 = vmatpush.msra.mxu3 %v1242_v60 }
 0x221   : > { %v3998_v61 = vpop.permute.xlu1 %2436 }
 0x222   : > { %v4001_v23 = vpop.permute.xlu2 %2441  ;;  %v4003_v62 = vpop.permute.xlu0 %2401  ;;  %v2439_v54 = vunpack.i.h.bf16 %v3998_v61 }
 0x223   : > { %v2404_v19 = vunpack.i.h.bf16 %v4003_v62  ;;  %v2403_v6 = vunpack.i.l.bf16 %v4003_v62 }
 0x224   : > { %v1259_v58 = vsel %vm1184_vm7, %v2383_v63, %v2439_v54 }
 0x225   : > { %v1249_v31 = vsel %vm1184_vm7, %v2404_v19, %v2384_v52  ;;  %v1234_v12 = vsel %vm1184_vm7, %v2399_v47, %v2403_v6  ;;  %v2428_v52 = vunpack.i.l.bf16 %v2427_v2  ;;  %v2429_v19 = vunpack.i.h.bf16 %v2427_v2 }
 0x226   : > { %1400 = vmatpush.msra.mxu1 %v1249_v31  ;;  %1442 = vmatpush.msra.mxu3 %v1234_v12  ;;  %v4034_v12 = vld [vmem:[%s4503_s1] sm:$0xff]  ;;  %v1210_v2 = vsel %vm1184_vm7, %v2423_v33, %v2424_v29 }
 0x227   : > { %v1225_v18 = vsel %vm1184_vm7, %v2428_v52, %v2408_v9  ;;  %1389 = vmatmul.f32.vlgmr.msra.gmra.mxu0 %v4034_v12  ;;  %1429 = vmatmul.f32.vlgmr.msra.gmra.mxu2 %v4034_v12 }
 0x228   : > { %1401 = vmatpush.msra.mxu1 %v1241_v37  ;;  %1443 = vmatpush.msra.mxu3 %v1226_v50  ;;  %v2369_v37 = vunpack.i.h.bf16 %v3952_v49  ;;  %v2438_v50 = vunpack.i.l.bf16 %v3998_v61 }
 0x229   : > { %v4020_v10 = vpop.permute.xlu1 %2451 }
 0x22a   : > { %v4017_v14 = vpop.permute.xlu0 %2416  ;;  %v4024_v60 = vpop.permute.xlu2 %2456  ;;  %v1209_v59 = vsel %vm1184_vm7, %v2438_v50, %v2423_v33  ;;  %v4074_v50 = vld [vmem:[%s4503_s1 + $0x8] sm:$0xff] }
 0x22b   : > { %v2419_v3 = vunpack.i.h.bf16 %v4017_v14  ;;  %v2418_v46 = vunpack.i.l.bf16 %v4017_v14  ;;  %v2458_v4 = vunpack.i.l.bf16 %v4024_v60 }
 0x22d   : > { %v1233_v11 = vsel %vm1184_vm7, %v2419_v3, %v2399_v47  ;;  %v1218_v31 = vsel %vm1184_vm7, %v2414_v13, %v2418_v46  ;;  %v2368_v47 = vunpack.i.l.bf16 %v3952_v49  ;;  %v1217_v3 = vsel %vm1184_vm7, %v2429_v19, %v2414_v13 }
 0x22e   : > { %1402 = vmatpush.msra.mxu1 %v1233_v11  ;;  %1444 = vmatpush.msra.mxu3 %v1218_v31  ;;  %v1202_v11 = vsel %vm1184_vm7, %v2369_v37, %v2373_v28  ;;  %v4745_v49 = vunpack.i.l.bf16 %v3778_v53  ;;  %v2323_v19 = vunpack.i.l.bf16 %v3721_v55  ;;  %v2453_v55 = vunpack.i.l.bf16 %v4020_v10 }
 0x22f   : > { %1509 = vmatmul.f32.vlgmr.msrb.gmra.mxu0 %v4034_v12 }
 0x230   : > { %1403 = vmatpush.msra.mxu1 %v1225_v18  ;;  %1445 = vmatpush.msra.mxu3 %v1210_v2  ;;  %v4744_v18 = vunpack.i.h.bf16 %v3778_v53  ;;  %v2443_v2 = vunpack.i.l.bf16 %v4001_v23 }
 0x232   : > { %v4049_v31 = vpop.permute.xlu0 %2431  ;;  %1404 = vmatpush.msra.mxu1 %v1217_v3  ;;  %1446 = vmatpush.msra.mxu3 %v1202_v11  ;;  %v1194_v13 = vsel %vm1184_vm7, %v4745_v49, %v4744_v18  ;;  %v4062_v3 = vpop.permute.xlu1 %2466  ;;  %v1201_v11 = vsel %vm1184_vm7, %v2368_v47, %v2369_v37  ;;  %v4746_v47 = vld [vmem:[#allocation68_spill] sm:$0xff] }
 0x233   : > { %v2434_v9 = vunpack.i.h.bf16 %v4049_v31  ;;  %v2433_v52 = vunpack.i.l.bf16 %v4049_v31  ;;  %v4077_v61 = vpop.permute.xlu2 %2471  ;;  %v2468_v1 = vunpack.i.l.bf16 %v4062_v3 }
 0x234   : > { %1405 = vmatpush.msra.mxu1 %v1209_v59  ;;  %1447 = vmatpush.msra.mxu3 %v1194_v13  ;;  %v2444_v59 = vunpack.i.h.bf16 %v4001_v23  ;;  %v4748_v13 = vld [vmem:[#allocation62_spill] sm:$0xff] }
 0x235   : > { %v1268_v33 = vsel %vm1184_vm7, %v2433_v52, %v2434_v9  ;;  %v1267_v53 = vsel %vm1184_vm7, %v2378_v24, %v2433_v52  ;;  %v1260_v24 = vsel %vm1184_vm7, %v2439_v54, %v2443_v2  ;;  %v2454_v54 = vunpack.i.h.bf16 %v4020_v10 }
 0x236   : > { %1406 = vmatpush.msra.mxu1 %v1201_v11  ;;  %1448 = vmatpush.msra.mxu3 %v3897_v26  ;;  %v1185_v26 = vsel %vm1184_vm7, %v2323_v19, %v2324_v7  ;;  %v2459_v7 = vunpack.i.h.bf16 %v4024_v60 }
 0x237   : > { %1518 = vmatpush.msrb.mxu2 %v1268_v33  ;;  %1828 = vmatmul.msk.f32.vlgmr.msra.gmra.mxu3 %vm1369_vm8, %v4074_v50  ;;  %v1235_v19 = vsel %vm1184_vm7, %v2403_v6, %v2454_v54  ;;  %v1236_v62 = vsel %vm1184_vm7, %v2454_v54, %v2458_v4  ;;  %v2469_v6 = vunpack.i.h.bf16 %v4062_v3  ;;  %v4784_v3 = vld [vmem:[#allocation13_spill] sm:$0xff] }
 0x238   : > { %1478 = vmatpush.msrb.mxu3 %v1267_v53  ;;  %1407 = vmatpush.msra.mxu1 %v3785_v20  ;;  %v1251_v20 = vsel %vm1184_vm7, %v2388_v25, %v2444_v59  ;;  %v4747_v25 = vld [vmem:[#allocation71_spill] sm:$0xff]  ;;  %v1227_v33 = vsel %vm1184_vm7, %v2409_v21, %v2459_v7  ;;  %v2474_v21 = vunpack.i.h.bf16 %v4077_v61 }
 0x239   : > { %1519 = vmatpush.msrb.mxu2 %v1260_v24 }
 0x23a   : > { %1479 = vmatpush.msrb.mxu3 %v1259_v58  ;;  %v4092_v37 = vpop.permute.xlu0 %2446  ;;  %1408 = vmatpush.msra.mxu1 %v1185_v26  ;;  %v4114_v49 = vpop.permute.xlu1 %2481  ;;  %v4750_v58 = vld [vmem:[#allocation55_spill] sm:$0xff]  ;;  %v2473_v26 = vunpack.i.l.bf16 %v4077_v61 }
 0x23b   : > { %v2449_v30 = vunpack.i.h.bf16 %v4092_v37  ;;  %v2448_v63 = vunpack.i.l.bf16 %v4092_v37  ;;  %1827 = vmatmul.msk.f32.vlgmr.msra.gmra.mxu1 %vm1369_vm8, %v4074_v50  ;;  %v4123_v11 = vpop.permute.xlu2 %2486  ;;  %v4774_v37 = vld [vmem:[#allocation26_spill] sm:$0xff] }
 0x23c   : > { %1453 = vmatpush.msrb.mxu1 %v4746_v47  ;;  %1480 = vmatpush.msrb.mxu3 %v1251_v20  ;;  %v4751_v20 = vld [vmem:[#allocation84_spill] sm:$0xff]  ;;  %v4752_v47 = vld [vmem:[#allocation38_spill] sm:$0xff]  ;;  %v1212_v51 = vsel %vm1184_vm7, %v2469_v6, %v2473_v26  ;;  %v2488_v41 = vunpack.i.l.bf16 %v4123_v11 }
 0x23d   : > { %v1243_v52 = vsel %vm1184_vm7, %v2394_v57, %v2449_v30  ;;  %v1252_v18 = vsel %vm1184_vm7, %v2444_v59, %v2448_v63  ;;  %v1244_v35 = vsel %vm1184_vm7, %v2449_v30, %v2453_v55  ;;  %v4749_v57 = vld [vmem:[#allocation52_spill] sm:$0xff] }
 0x23e   : > { %1454 = vmatpush.msrb.mxu1 %v4747_v25  ;;  %1481 = vmatpush.msrb.mxu3 %v1243_v52  ;;  %v1211_v25 = vsel %vm1184_vm7, %v2424_v29, %v2469_v6 }
 0x23f   : > { %1520 = vmatpush.msrb.mxu2 %v1252_v18 }
 0x240   : > { %1455 = vmatpush.msrb.mxu1 %v4748_v13  ;;  %1482 = vmatpush.msrb.mxu3 %v1235_v19  ;;  %v2483_v13 = vunpack.i.l.bf16 %v4114_v49 }
 0x241   : > { %1521 = vmatpush.msrb.mxu2 %v1244_v35 }
 0x242   : > { %1456 = vmatpush.msrb.mxu1 %v4749_v57  ;;  %v4132_v53 = vpop.permute.xlu0 %2461  ;;  %1483 = vmatpush.msrb.mxu3 %v1227_v33  ;;  %v4155_v14 = vpop.permute.xlu1 %2496  ;;  %v4754_v57 = vld [vmem:[#allocation31_spill] sm:$0xff]  ;;  %v4755_v33 = vld [vmem:[#allocation20_spill] sm:$0xff] }
 0x243   : > { %1522 = vmatpush.msrb.mxu2 %v1236_v62  ;;  %v2464_v59 = vunpack.i.h.bf16 %v4132_v53  ;;  %v2463_v24 = vunpack.i.l.bf16 %v4132_v53  ;;  %v4164_v18 = vpop.permute.xlu2 %2501  ;;  %v1187_v62 = vsel %vm1184_vm7, %v2328_v48, %v2329_v27  ;;  %v4759_v27 = vld [vmem:[#allocation82_spill] sm:$0xff] }
 0x244   : > { %1457 = vmatpush.msrb.mxu1 %v4750_v58  ;;  %v4757_v58 = vunpack.i.h.bf16 %v3771_v45 }
 0x245   : > { %v1219_v54 = vsel %vm1184_vm7, %v2418_v46, %v2464_v59  ;;  %v1228_v30 = vsel %vm1184_vm7, %v2459_v7, %v2463_v24  ;;  %v1220_v52 = vsel %vm1184_vm7, %v2464_v59, %v2468_v1  ;;  %v4753_v46 = vld [vmem:[#allocation41_spill] sm:$0xff]  ;;  %v1203_v7 = vsel %vm1184_vm7, %v2373_v28, %v2474_v21 }
 0x246   : > { %1458 = vmatpush.msrb.mxu1 %v4751_v20  ;;  %1484 = vmatpush.msrb.mxu3 %v1219_v54  ;;  %v2484_v28 = vunpack.i.h.bf16 %v4114_v49  ;;  %v4758_v20 = vunpack.i.l.bf16 %v3771_v45  ;;  %v4761_v54 = vld [vmem:[#allocation69_spill] sm:$0xff]  ;;  %v2489_v45 = vunpack.i.h.bf16 %v4123_v11  ;;  %v4793_v11 = vunpack.i.l.bf16 %v3757_v8 }
 0x247   : > { %1523 = vmatpush.msrb.mxu2 %v1228_v30 }
 0x248   : > { %1459 = vmatpush.msrb.mxu1 %v4752_v47  ;;  %1485 = vmatpush.msrb.mxu3 %v1211_v25  ;;  %v1196_v42 = vsel %vm1184_vm7, %v4758_v20, %v4757_v58  ;;  %v1262_v48 = vsel %vm1184_vm7, %v2484_v28, %v2488_v41  ;;  %v2503_v47 = vunpack.i.l.bf16 %v4164_v18  ;;  %v2499_v25 = vunpack.i.h.bf16 %v4155_v14  ;;  %v4768_v58 = vld [vmem:[#allocation75_spill] sm:$0xff]  ;;  %v4769_v20 = vld [vmem:[#allocation64_spill] sm:$0xff] }
 0x249   : > { %1524 = vmatpush.msrb.mxu2 %v1220_v52 }
 0x24a   : > { %1460 = vmatpush.msrb.mxu1 %v4753_v46  ;;  %v4166_v29 = vpop.permute.xlu0 %2476  ;;  %1486 = vmatpush.msrb.mxu3 %v1203_v7  ;;  %v4762_v46 = vld [vmem:[#allocation5_spill] sm:$0xff]  ;;  %v4763_v7 = vld [vmem:[#allocation83_spill] sm:$0xff] }
 0x24b   : > { %1525 = vmatpush.msrb.mxu2 %v1212_v51  ;;  %v2479_v19 = vunpack.i.h.bf16 %v4166_v29  ;;  %v2478_v35 = vunpack.i.l.bf16 %v4166_v29  ;;  %v4208_v51 = vpop.permute.xlu2 %2516 }
 0x24c   : > { %1461 = vmatpush.msrb.mxu1 %v4754_v57  ;;  %1487 = vmatpush.msrb.mxu3 %v3792_v0  ;;  %v4756_v0 = vld [vmem:[#allocation24_spill] sm:$0xff]  ;;  %v4210_v57 = vpop.permute.xlu1 %2511 }
 0x24d   : > { %v1204_v6 = vsel %vm1184_vm7, %v2474_v21, %v2478_v35  ;;  %v1270_v59 = vsel %vm1184_vm7, %v2479_v19, %v2483_v13  ;;  %v4760_v21 = vld [vmem:[#allocation15_spill] sm:$0xff] }
 0x24e   : > { %1462 = vmatpush.msrb.mxu1 %v4755_v33  ;;  %1488 = vmatpush.msrb.mxu3 %v1187_v62  ;;  %v4764_v33 = vld [vmem:[#allocation57_spill] sm:$0xff]  ;;  %v4765_v62 = vld [vmem:[#allocation7_spill] sm:$0xff] }
 0x24f   : > { %1526 = vmatpush.msrb.mxu2 %v1204_v6  ;;  %1598 = vmatpush.msra.mxu0 %v1270_v59  ;;  %v4766_v6 = vld [vmem:[#allocation70_spill] sm:$0xff] }
 0x250   : > { %1463 = vmatpush.msrb.mxu1 %v4756_v0  ;;  %1533 = vmatpush.msra.mxu3 %v4759_v27  ;;  %v4767_v0 = vld [vmem:[#allocation60_spill] sm:$0xff]  ;;  %v4770_v27 = vld [vmem:[#allocation53_spill] sm:$0xff] }
 0x251   : > { %1527 = vmatpush.msrb.mxu2 %v1196_v42  ;;  %1599 = vmatpush.msra.mxu0 %v1262_v48  ;;  %v1246_v42 = vsel %vm1184_vm7, %v2499_v25, %v2503_v47  ;;  %v1363_v48 = vld [vmem:[%s4504_s2] sm:$0xff] }
 0x252   : > { %1464 = vmatpush.msrb.mxu1 %v4760_v21  ;;  %1534 = vmatpush.msra.mxu3 %v4761_v54  ;;  %v4199_v30 = vpop.permute.xlu0 %2491  ;;  %v2571_v21 = vld [vmem:[%s2656_s25 + $0x10] sm:$0xff] }
 0x253   : > { %1528 = vmatpush.msrb.mxu2 %v3904_v16  ;;  %v2493_v52 = vunpack.i.l.bf16 %v4199_v30  ;;  %v2607_v16 = vmov 0   ;;  %v4771_v54 = vld [vmem:[#allocation61_spill] sm:$0xff]  ;;  %1829 = vmatmul.msk.f32.vlgmr.msrb.gmra.mxu3 %vm1369_vm8, %v4074_v50  ;;  %v4252_v23 = vpop.permute.xlu2 %2531 }
 0x254   : > { %1465 = vmatpush.msrb.mxu1 %v4762_v46  ;;  %1535 = vmatpush.msra.mxu3 %v4764_v33  ;;  %v1269_v46 = vsel %vm1184_vm7, %v2434_v9, %v2479_v19  ;;  %v2513_v33 = vunpack.i.l.bf16 %v4210_v57  ;;  %v4254_v9 = vpop.permute.xlu1 %2526  ;;  %v4775_v19 = vld [vmem:[#allocation40_spill] sm:$0xff]  ;;  %v2533_v60 = vunpack.i.l.bf16 %v4252_v23  ;;  %v2534_v29 = vunpack.i.h.bf16 %v4252_v23 }
 0x255   : > { %1573 = vmatpush.msra.mxu2 %v4763_v7  ;;  %2565 = vset.pattern.permute.xlu1 %v2607_v16  ;;  %v1254_v59 = vsel %vm1184_vm7, %v2489_v45, %v2493_v52  ;;  %v4801_v23 = vld [vmem:[#allocation48_spill] sm:$0xff] }
 0x256   : > { %1466 = vmatpush.msrb.mxu1 %v4765_v62  ;;  %1536 = vmatpush.msra.mxu3 %v4767_v0  ;;  %v4778_v0 = vld [vmem:[#allocation21_spill] sm:$0xff] }
 0x257   : > { %1574 = vmatpush.msra.mxu2 %v4766_v6  ;;  %1600 = vmatpush.msra.mxu0 %v1254_v59  ;;  %v4772_v6 = vld [vmem:[#allocation54_spill] sm:$0xff]  ;;  %v1261_v59 = vsel %vm1184_vm7, %v2443_v2, %v2484_v28  ;;  %v4773_v2 = vld [vmem:[#allocation39_spill] sm:$0xff] }
 0x258   : > { %1467 = vmatpush.msrb.mxu1 %v4768_v58  ;;  %1537 = vmatpush.msra.mxu3 %v4770_v27  ;;  %v4781_v27 = vld [vmem:[#allocation11_spill] sm:$0xff] }
 0x259   : > { %1575 = vmatpush.msra.mxu2 %v4769_v20  ;;  %1601 = vmatpush.msra.mxu0 %v1246_v42  ;;  %v4780_v42 = vld [vmem:[#allocation9_spill] sm:$0xff] }
 0x25a   : > { %1468 = vmatpush.msrb.mxu1 %v2571_v21  ;;  %1538 = vmatpush.msra.mxu3 %v4713_v5  ;;  %v4234_v7 = vpop.permute.xlu0 %2506  ;;  %v1253_v5 = vsel %vm1184_vm7, %v2448_v63, %v2489_v45  ;;  %v2529_v63 = vunpack.i.h.bf16 %v4254_v9  ;;  %v4776_v45 = vld [vmem:[#allocation29_spill] sm:$0xff]  ;;  %v1928_v53 = vunpack.i.l.bf16 %v4780_v42 }
 0x25b   : > { %1576 = vmatpush.msra.mxu2 %v4771_v54  ;;  %v2509_v62 = vunpack.i.h.bf16 %v4234_v7  ;;  %1366 = vperm.xlu1 %2565, %v1363_v48   ;;  %v4290_v21 = vpop.permute.xlu2 %2546 }
 0x25c   : > { %1558 = vmatpush.msra.mxu1 %v1269_v46  ;;  %1539 = vmatpush.msra.mxu3 %v4722_v39  ;;  %v2519_v39 = vunpack.i.h.bf16 %v4208_v51  ;;  %v1221_v58 = vsel %vm1184_vm7, %v2468_v1, %v2529_v63  ;;  %v4292_v54 = vpop.permute.xlu1 %2541  ;;  %v1222_v1 = vsel %vm1184_vm7, %v2529_v63, %v2533_v60  ;;  %v4785_v46 = vld [vmem:[#allocation17_spill] sm:$0xff]  ;;  %v2504_v63 = vunpack.i.h.bf16 %v4164_v18 }
 0x25d   : > { %1577 = vmatpush.msra.mxu2 %v4772_v6  ;;  %v1238_v31 = vsel %vm1184_vm7, %v2509_v62, %v2513_v33  ;;  %v1237_v28 = vsel %vm1184_vm7, %v2458_v4, %v2509_v62  ;;  %1469 = vmatmul.f32.vlgmr.msrb.gmra.mxu1 %v4034_v12  ;;  %v4779_v4 = vld [vmem:[#allocation30_spill] sm:$0xff]  ;;  %v2494_v62 = vunpack.i.h.bf16 %v4199_v30 }
 0x25e   : > { %1559 = vmatpush.msra.mxu1 %v1261_v59  ;;  %1540 = vmatpush.msra.mxu3 %v4773_v2  ;;  %v4786_v6 = vld [vmem:[#allocation6_spill] sm:$0xff]  ;;  %v1263_v49 = vsel %vm1184_vm7, %v2488_v41, %v2504_v63  ;;  %v1189_v41 = vsel %vm1184_vm7, %v4793_v11, %v2334_v15  ;;  %v2544_v15 = vunpack.i.h.bf16 %v4292_v54  ;;  %v4818_v11 = vld [vmem:[#allocation36_spill] sm:$0xff] }
 0x25f   : > { %1578 = vmatpush.msra.mxu2 %v4728_v22  ;;  %1602 = vmatpush.msra.mxu0 %v1238_v31  ;;  %v1245_v22 = vsel %vm1184_vm7, %v2453_v55, %v2499_v25  ;;  %v4777_v55 = vld [vmem:[#allocation34_spill] sm:$0xff]  ;;  %v1229_v25 = vsel %vm1184_vm7, %v2463_v24, %v2519_v39 }
 0x260   : > { %1560 = vmatpush.msra.mxu1 %v1253_v5  ;;  %1541 = vmatpush.msra.mxu3 %v4774_v37  ;;  %v4782_v24 = vld [vmem:[#allocation22_spill] sm:$0xff] }
 0x261   : > { %1579 = vmatpush.msra.mxu2 %v4720_v44  ;;  %2566 = vset.pattern.permute.xlu0 %v2607_v16  ;;  %v4783_v16 = vld [vmem:[#allocation3_spill] sm:$0xff]  ;;  %v4787_v5 = vld [vmem:[#allocation10_spill] sm:$0xff] }
 0x262   : > { %1561 = vmatpush.msra.mxu1 %v1245_v22  ;;  %1542 = vmatpush.msra.mxu3 %v4776_v45  ;;  %v4270_v44 = vpop.permute.xlu0 %2521  ;;  %v1908_v48 = vunpack.i.l.bf16 %v4783_v16  ;;  %v4788_v31 = vunpack.i.h.bf16 %v4787_v5  ;;  %v2543_v22 = vunpack.i.l.bf16 %v4292_v54  ;;  %v4794_v5 = vld [vmem:[#allocation80_spill] sm:$0xff]  ;;  %v4805_v54 = vld [vmem:[#allocation66_spill] sm:$0xff] }
 0x263   : > { %1580 = vmatpush.msra.mxu2 %v4775_v19  ;;  %v2523_v10 = vunpack.i.l.bf16 %v4270_v44  ;;  %v4789_v19 = vld [vmem:[#allocation73_spill] sm:$0xff] }
 0x264   : > { %1562 = vmatpush.msra.mxu1 %v1237_v28  ;;  %1543 = vmatpush.msra.mxu3 %v4778_v0  ;;  %v359_v2 = vsel %vm353_vm1, %v4788_v31, %v1928_v53  ;;  %v4790_v28 = vld [vmem:[#allocation4_spill] sm:$0xff]  ;;  %v4795_v31 = vunpack.i.h.bf16 %v3814_v40 }
 0x265   : > { %1581 = vmatpush.msra.mxu2 %v4777_v55  ;;  %v1230_v20 = vsel %vm1184_vm7, %v2519_v39, %v2523_v10  ;;  %v2549_v39 = vunpack.i.h.bf16 %v4290_v21  ;;  %v4791_v45 = vunpack.i.h.bf16 %v4790_v28 }
 0x266   : > { %1563 = vmatpush.msra.mxu1 %v1229_v25  ;;  %1544 = vmatpush.msra.mxu3 %v4781_v27  ;;  %v2508_v27 = vunpack.i.l.bf16 %v4234_v7 }
 0x267   : > { %1582 = vmatpush.msra.mxu2 %v4779_v4  ;;  %1603 = vmatpush.msra.mxu0 %v1230_v20  ;;  %v324_v55 = vsel %vm318_vm0, %v4791_v45, %v1908_v48  ;;  %v2572_v4 = vld [vmem:[%s2656_s25 + $0x20] sm:$0xff]  ;;  %v2498_v20 = vunpack.i.l.bf16 %v4155_v14  ;;  %v1205_v61 = vsel %vm1184_vm7, %v2478_v35, %v2549_v39  ;;  %v2518_v14 = vunpack.i.l.bf16 %v4208_v51  ;;  %v2557_v51 = vpop.permute.xlu1 %2556 }
 0x268   : > { %1564 = vmatpush.msra.mxu1 %v1221_v58  ;;  %1545 = vmatpush.msra.mxu3 %v4784_v3  ;;  %v1271_v58 = vsel %vm1184_vm7, %v2483_v13, %v2494_v62  ;;  %v4792_v3 = vld [vmem:[#allocation78_spill] sm:$0xff]  ;;  %v2573_v13 = vld [vmem:[%s2656_s25 + $0x28] sm:$0xff]  ;;  %v1264_v30 = vsel %vm1184_vm7, %v2504_v63, %v2508_v27  ;;  %v2562_v63 = vpop.permute.xlu2 %2561  ;;  %v2558_v45 = vunpack.i.l.bf16 %v2557_v51  ;;  %v4806_v27 = vld [vmem:[#allocation59_spill] sm:$0xff] }
 0x269   : > { %1583 = vmatpush.msra.mxu2 %v4782_v24  ;;  %1604 = vmatpush.msra.mxu0 %v1222_v1  ;;  %v2524_v24 = vunpack.i.h.bf16 %v4270_v44  ;;  %v1272_v1 = vsel %vm1184_vm7, %v2494_v62, %v2498_v20  ;;  %v2563_v28 = vunpack.i.l.bf16 %v2562_v63  ;;  %v4803_v20 = vld [vmem:[#allocation14_spill] sm:$0xff] }
 0x26a   : > { %1830 = vmatmul.msk.f32.vlgmr.msrb.gmra.mxu2 %vm1369_vm8, %v4074_v50  ;;  %1546 = vmatpush.msra.mxu3 %v4786_v6  ;;  %v4303_v59 = vpop.permute.xlu0 %2536 }
 0x26b   : > { %1584 = vmatpush.msra.mxu2 %v4785_v46  ;;  %v2539_v37 = vunpack.i.h.bf16 %v4303_v59  ;;  %v2538_v6 = vunpack.i.l.bf16 %v4303_v59  ;;  %v4797_v59 = vld [vmem:[#allocation63_spill] sm:$0xff] }
 0x26c   : > { %1547 = vmatpush.msra.mxu3 %v4789_v19 }
 0x26d   : > { %1585 = vmatpush.msra.mxu2 %v359_v2  ;;  %v1213_v25 = vsel %vm1184_vm7, %v2473_v26, %v2539_v37  ;;  %v1214_v0 = vsel %vm1184_vm7, %v2539_v37, %v2543_v22  ;;  %v2514_v26 = vunpack.i.h.bf16 %v4210_v57  ;;  %v4796_v2 = vunpack.i.l.bf16 %v3814_v40 }
 0x26e   : > { %1548 = vmatpush.msra.mxu3 %v2572_v4  ;;  %1565 = vmatpush.msra.mxu1 %v1213_v25  ;;  %v2559_v37 = vunpack.i.h.bf16 %v2557_v51  ;;  %v1231_v57 = vsel %vm1184_vm7, %v2523_v10, %v2544_v15  ;;  %v1240_v19 = vsel %vm1184_vm7, %v2534_v29, %v2538_v6  ;;  %v2564_v10 = vunpack.i.h.bf16 %v2562_v63  ;;  %v4800_v25 = vld [vmem:[#allocation81_spill] sm:$0xff]  ;;  %v2575_v6 = vld [vmem:[%s2656_s25 + $0x38] sm:$0xff] }
 0x26f   : > { %1586 = vmatpush.msra.mxu2 %v324_v55  ;;  %1605 = vmatpush.msra.mxu0 %v1214_v0  ;;  %v1255_v7 = vsel %vm1184_vm7, %v2493_v52, %v2514_v26  ;;  %v2528_v52 = vunpack.i.l.bf16 %v4254_v9  ;;  %v1256_v8 = vsel %vm1184_vm7, %v2514_v26, %v2518_v14  ;;  %v2548_v9 = vunpack.i.l.bf16 %v4290_v21  ;;  %v4798_v21 = vld [vmem:[#allocation65_spill] sm:$0xff]  ;;  %v4799_v55 = vld [vmem:[#allocation58_spill] sm:$0xff] }
 0x270   : > { %1638 = vmatpush.msrb.mxu3 %v1271_v58  ;;  %1566 = vmatpush.msra.mxu1 %v1205_v61  ;;  %v2364_v61 = vunpack.i.h.bf16 %v4803_v20  ;;  %v4804_v26 = vld [vmem:[#allocation49_spill] sm:$0xff] }
 0x271   : > { %1587 = vmatpush.msra.mxu2 %v4792_v3  ;;  %1549 = vmatmul.f32.vlgmr.msra.gmra.mxu3 %v4034_v12  ;;  %v1232_v44 = vsel %vm1184_vm7, %v2544_v15, %v2548_v9  ;;  %v4808_v3 = vunpack.i.l.bf16 %v3739_v36  ;;  %v4821_v51 = vld [vmem:[#allocation25_spill] sm:$0xff]  ;;  %v4825_v15 = vld [vmem:[#allocation8_spill] sm:$0xff] }
 0x272   : > { %1639 = vmatpush.msrb.mxu3 %v1263_v49  ;;  %v2552_v35 = vpop.permute.xlu0 %2551  ;;  %1567 = vmatpush.msra.mxu1 %v3833_v43  ;;  %v1247_v43 = vsel %vm1184_vm7, %v2503_v47, %v2524_v24  ;;  %v1239_v47 = vsel %vm1184_vm7, %v2513_v33, %v2534_v29  ;;  %v1248_v33 = vsel %vm1184_vm7, %v2524_v24, %v2528_v52  ;;  %v4807_v24 = vunpack.i.h.bf16 %v3739_v36  ;;  %v4809_v29 = vld [vmem:[#allocation33_spill] sm:$0xff]  ;;  %v4813_v36 = vld [vmem:[#allocation23_spill] sm:$0xff] }
 0x273   : > { %1588 = vmatpush.msra.mxu2 %v2573_v13  ;;  %v2553_v46 = vunpack.i.l.bf16 %v2552_v35  ;;  %v2554_v18 = vunpack.i.h.bf16 %v2552_v35  ;;  %v4810_v13 = vld [vmem:[#allocation56_spill] sm:$0xff]  ;;  %v4812_v35 = vld [vmem:[#allocation35_spill] sm:$0xff] }
 0x274   : > { %1640 = vmatpush.msrb.mxu3 %v1255_v7  ;;  %1568 = vmatpush.msra.mxu1 %v1189_v41  ;;  %v1191_v49 = vsel %vm1184_vm7, %v4808_v3, %v4807_v24  ;;  %v4814_v7 = vld [vmem:[#allocation27_spill] sm:$0xff]  ;;  %v1909_v41 = vunpack.i.h.bf16 %v4783_v16 }
 0x275   : > { %1678 = vmatpush.msrb.mxu2 %v1272_v1  ;;  %v1206_v62 = vsel %vm1184_vm7, %v2549_v39, %v2553_v46  ;;  %v1198_v39 = vsel %vm1184_vm7, %v4796_v2, %v4795_v31  ;;  %v1223_v40 = vsel %vm1184_vm7, %v2533_v60, %v2554_v18  ;;  %v4802_v60 = vld [vmem:[#allocation76_spill] sm:$0xff]  ;;  %v1207_v0 = vsel %vm1184_vm7, %v2553_v46, %v2564_v10  ;;  %v4816_v46 = vld [vmem:[#allocation42_spill] sm:$0xff]  ;;  %v4459_v2 = vld [vmem:[%s238_s11] sm:$0xff] }
 0x276   : > { %1641 = vmatpush.msrb.mxu3 %v1247_v43  ;;  %1613 = vmatpush.msrb.mxu1 %v4794_v5  ;;  %v1224_v4 = vsel %vm1184_vm7, %v2554_v18, %v2558_v45  ;;  %v4815_v1 = vld [vmem:[#allocation16_spill] sm:$0xff]  ;;  %v4819_v43 = vunpack.i.h.bf16 %v4780_v42  ;;  %v325_v52 = vsel %vm318_vm0, %v1908_v48, %v1909_v41  ;;  %v4823_v42 = vld [vmem:[#allocation19_spill] sm:$0xff]  ;;  %v326_v16 = vsel %vm318_vm0, %v1909_v41, %v4825_v15  ;;  %v4826_v48 = vld [vmem:[#allocation77_spill] sm:$0xff] }
 0x277   : > { %1679 = vmatpush.msrb.mxu2 %v1264_v30  ;;  %1606 = vmatpush.msra.mxu0 %v1206_v62  ;;  %v4820_v30 = vld [vmem:[#allocation28_spill] sm:$0xff]  ;;  %v4822_v62 = vld [vmem:[#allocation79_spill] sm:$0xff] }
 0x278   : > { %1642 = vmatpush.msrb.mxu3 %v1239_v47  ;;  %1614 = vmatpush.msrb.mxu1 %v4797_v59 }
 0x279   : > { %1680 = vmatpush.msrb.mxu2 %v1256_v8  ;;  %1607 = vmatpush.msra.mxu0 %v1198_v39  ;;  %v2574_v8 = vld [vmem:[%s2656_s25 + $0x30] sm:$0xff]  ;;  %v4462_v39 = vstv %s1693_s8 }
 0x27a   : > { %1643 = vmatpush.msrb.mxu3 %v1231_v57  ;;  %1615 = vmatpush.msrb.mxu1 %v4798_v21  ;;  %v1039_v58 = vpop.permute.xlu0 %1038  ;;  %v1721_v57 = vperm.slane %v4459_v2, 0 }
 0x27b   : > { %1681 = vmatpush.msrb.mxu2 %v1248_v33  ;;  %1608 = vmatpush.msra.mxu0 %v3919_v38  ;;  %v1215_v38 = vsel %vm1184_vm7, %v2543_v22, %v2559_v37  ;;  %v1216_v22 = vsel %vm1184_vm7, %v2559_v37, %v2563_v28  ;;  %v1208_v14 = vsel %vm1184_vm7, %v2564_v10, %v1039_v58  ;;  %v1722_v33 = vperm.slane %v4459_v2, 1 }
 0x27c   : > { %1644 = vmatpush.msrb.mxu3 %v1223_v40  ;;  %1616 = vmatpush.msrb.mxu1 %v4799_v55 }
 0x27d   : > { %1682 = vmatpush.msrb.mxu2 %v1240_v19  ;;  %1653 = vmatpush.msrb.mxu0 %v4800_v25 }
 0x27e   : > { %1645 = vmatpush.msrb.mxu3 %v1215_v38  ;;  %1617 = vmatpush.msrb.mxu1 %v4801_v23  ;;  %v1723_v38 = vperm.slane %v4459_v2, 2 }
 0x27f   : > { %1683 = vmatpush.msrb.mxu2 %v1232_v44  ;;  %1654 = vmatpush.msrb.mxu0 %v4802_v60 }
 0x280   : > { %1646 = vmatpush.msrb.mxu3 %v1207_v0  ;;  %1618 = vmatpush.msrb.mxu1 %v4804_v26  ;;  %v1724_v26 = vperm.slane %v4459_v2, 3 }
 0x281   : > { %1684 = vmatpush.msrb.mxu2 %v1224_v4  ;;  %1655 = vmatpush.msrb.mxu0 %v4805_v54 }
 0x282   : > { %1647 = vmatpush.msrb.mxu3 %v3840_v34  ;;  %1619 = vmatpush.msrb.mxu1 %v4730_v17  ;;  %v4811_v34 = vunpack.i.l.bf16 %v4803_v20 }
 0x283   : > { %1685 = vmatpush.msrb.mxu2 %v1216_v22  ;;  %1656 = vmatpush.msrb.mxu0 %v4806_v27 }
 0x284   : > { %1648 = vmatpush.msrb.mxu3 %v1191_v49  ;;  %1620 = vmatpush.msrb.mxu1 %v4809_v29  ;;  %v1200_v17 = vsel %vm1184_vm7, %v4811_v34, %v2364_v61  ;;  %v1725_v29 = vperm.slane %v4459_v2, 4 }
 0x285   : > { %1686 = vmatpush.msrb.mxu2 %v1208_v14  ;;  %1657 = vmatpush.msrb.mxu0 %v4810_v13 }
 0x286   : > { %1831 = vmatmul.msk.f32.vlgmr.msra.gmra.mxu1 %vm1369_vm8, %v4074_v50  ;;  %1832 = vmatmul.msk.f32.vlgmr.msra.gmra.mxu0 %vm1369_vm8, %v4074_v50 }
 0x287   : > { %1687 = vmatpush.msrb.mxu2 %v1200_v17  ;;  %1621 = vmatpush.msrb.mxu1 %v4812_v35 }
 0x288   : > { %1658 = vmatpush.msrb.mxu0 %v4731_v56  ;;  %1589 = vmatmul.f32.vlgmr.msra.gmra.mxu2 %v4034_v12  ;;  %v4817_v56 = vld [vmem:[#allocation18_spill] sm:$0xff] }
 0x289   : > { %1688 = vmatpush.msrb.mxu2 %v4813_v36  ;;  %1622 = vmatpush.msrb.mxu1 %v4814_v7 }
 0x28a   : > { %1659 = vmatpush.msrb.mxu0 %v4733_v32  ;;  %1833 = vmatmul.msk.f32.vlgmr.msrb.gmra.mxu3 %vm1369_vm8, %v4074_v50  ;;  %v360_v32 = vsel %vm353_vm1, %v1928_v53, %v4819_v43  ;;  %v4824_v53 = vld [vmem:[#allocation12_spill] sm:$0xff] }
 0x28b   : > { %1623 = vmatpush.msrb.mxu1 %v4815_v1 }
 0x28c   : > { %1660 = vmatpush.msrb.mxu0 %v4816_v46  ;;  %v1726_v46 = vperm.slane %v4459_v2, 5 }
 0x28d   : > { %1624 = vmatpush.msrb.mxu1 %v4817_v56 }
 0x28e   : > { %1661 = vmatpush.msrb.mxu0 %v4818_v11 }
 0x28f   : > { %1625 = vmatpush.msrb.mxu1 %v360_v32 }
 0x290   : > { %1662 = vmatpush.msrb.mxu0 %v4820_v30  ;;  %1834 = vmatmul.msk.f32.vlgmr.msrb.gmra.mxu2 %vm1369_vm8, %v4074_v50 }
 0x291   : > { %1626 = vmatpush.msrb.mxu1 %v325_v52 }
 0x292   : > { %1663 = vmatpush.msrb.mxu0 %v4821_v51  ;;  %v1727_v51 = vperm.slane %v4459_v2, 6 }
 0x293   : > { %1627 = vmatpush.msrb.mxu1 %v4822_v62 }
 0x294   : > { %1664 = vmatpush.msrb.mxu0 %v4823_v42 }
 0x295   : > { %1628 = vmatpush.msrb.mxu1 %v2574_v8 }
 0x296   : > { %1665 = vmatpush.msrb.mxu0 %v4824_v53  ;;  %1629 = vmatmul.f32.vlgmr.msrb.gmra.mxu1 %v4034_v12 }
 0x298   : > { %1666 = vmatpush.msrb.mxu0 %v326_v16 }
 0x29a   : > { %1667 = vmatpush.msrb.mxu0 %v4826_v48 }
 0x29c   : > { %1668 = vmatpush.msrb.mxu0 %v2575_v6  ;;  %v1728_v6 = vperm.slane %v4459_v2, 7 }
 0x29d   : > { %1669 = vmatmul.f32.vlgmr.msrb.gmra.mxu0 %v4034_v12 }
 0x2a4   : > { %v1390_v50 = vpop.f32.mrf.mxu0 }
 0x2aa   : > { %v1430_v18 = vpop.f32.mrf.mxu2 }
 0x2ac   : > { %v1510_v60 = vpop.f32.mrf.mxu0 }
 0x2b8   : > { %v1410_v5 = vpop.f32.mrf.mxu1 }
 0x2ba   : > { %v1450_v9 = vpop.f32.mrf.mxu3 }
 0x2cd   : > { %v4456_v47 = vpop.permute.xlu1 %1366 }
 0x2ce   : > { %v1391_v31 = vadd.f32 %v1390_v50, %v4456_v47  ;;  %v1431_v12 = vadd.f32 %v1430_v18, %v4456_v47  ;;  %v1511_v58 = vadd.f32 %v1510_v60, %v4456_v47 }
 0x2d0   : > { %v1411_v37 = vadd.f32 %v1410_v5, %v1391_v31  ;;  %v1451_v59 = vadd.f32 %v1450_v9, %v1431_v12 }
 0x2d2   : > { %vm1694_vm0 = vcmp.ge.f32.partialorder %v1411_v37, 0.0  ;;  %v1703_v63 = vmul.f32 %v4462_v39, %v1411_v37  ;;  %vm1695_vm1 = vcmp.ge.f32.partialorder %v1451_v59, 0.0  ;;  %v1704_v21 = vmul.f32 %v4462_v39, %v1451_v59 }
 0x2d4   : > { %v1711_v40 = vsel %vm1694_vm0, %v1411_v37, %v1703_v63  ;;  %v1712_v19 = vsel %vm1695_vm1, %v1451_v59, %v1704_v21 }
 0x2d5   : > { %v1737_v44 = vmul.f32 %v1721_v57, %v1711_v40  ;;  %v1738_v10 = vmul.f32 %v1722_v33, %v1712_v19 }
 0x2d6   : > { %v1490_v55 = vpop.f32.mrf.mxu3 }
 0x2d7   : > { %1745 = vst [vmem:[%s4471_s13] sm:$0xff] %v1737_v44 }
 0x2d8   : > { %1746 = vst [vmem:[%s4471_s13 + $0x8] sm:$0xff] %v1738_v10 }
 0x2da   : > { %v1470_v28 = vpop.f32.mrf.mxu1 }
 0x2db   : > { %v1471_v45 = vadd.f32 %v1470_v28, %v4456_v47 }
 0x2dd   : > { %v1491_v25 = vadd.f32 %v1490_v55, %v1471_v45 }
 0x2df   : > { %vm1696_vm9 = vcmp.ge.f32.partialorder %v1491_v25, 0.0  ;;  %v1705_v23 = vmul.f32 %v4462_v39, %v1491_v25 }
 0x2e1   : > { %v1713_v0 = vsel %vm1696_vm9, %v1491_v25, %v1705_v23 }
 0x2e2   : > { %v1739_v4 = vmul.f32 %v1723_v38, %v1713_v0 }
 0x2e4   : > { %1747 = vst [vmem:[%s4471_s13 + $0x10] sm:$0xff] %v1739_v4 }
 0x2ed   : > { %v1530_v20 = vpop.f32.mrf.mxu2 }
 0x2ee   : > { %v1531_v61 = vadd.f32 %v1530_v20, %v1511_v58 }
 0x2f0   : > { %vm1697_vm10 = vcmp.ge.f32.partialorder %v1531_v61, 0.0  ;;  %v1706_v54 = vmul.f32 %v4462_v39, %v1531_v61 }
 0x2f2   : > { %v1714_v22 = vsel %vm1697_vm10, %v1531_v61, %v1706_v54 }
 0x2f3   : > { %v1740_v27 = vmul.f32 %v1724_v26, %v1714_v22 }
 0x2f4   : > { %v1550_v24 = vpop.f32.mrf.mxu3 }
 0x2f5   : > { %1748 = vst [vmem:[%s4471_s13 + $0x18] sm:$0xff] %v1740_v27  ;;  %v1551_v3 = vadd.f32 %v1550_v24, %v4456_v47 }
 0x303   : > { %v1570_v49 = vpop.f32.mrf.mxu1  ;;  %v1610_v36 = vpop.f32.mrf.mxu0 }
 0x304   : > { %v1571_v14 = vadd.f32 %v1570_v49, %v1551_v3 }
 0x306   : > { %vm1698_vm11 = vcmp.ge.f32.partialorder %v1571_v14, 0.0  ;;  %v1707_v13 = vmul.f32 %v4462_v39, %v1571_v14 }
 0x308   : > { %v1715_v34 = vsel %vm1698_vm11, %v1571_v14, %v1707_v13 }
 0x309   : > { %v1741_v17 = vmul.f32 %v1725_v29, %v1715_v34 }
 0x30b   : > { %1749 = vst [vmem:[%s4471_s13 + $0x20] sm:$0xff] %v1741_v17  ;;  %v1590_v35 = vpop.f32.mrf.mxu2 }
 0x30c   : > { %v1591_v7 = vadd.f32 %v1590_v35, %v4456_v47 }
 0x30d   : > { %v1650_v41 = vpop.f32.mrf.mxu3 }
 0x30e   : > { %v1611_v1 = vadd.f32 %v1610_v36, %v1591_v7 }
 0x310   : > { %vm1699_vm12 = vcmp.ge.f32.partialorder %v1611_v1, 0.0  ;;  %v1708_v56 = vmul.f32 %v4462_v39, %v1611_v1 }
 0x312   : > { %v1716_v43 = vsel %vm1699_vm12, %v1611_v1, %v1708_v56 }
 0x313   : > { %v1630_v11 = vpop.f32.mrf.mxu1  ;;  %v1742_v30 = vmul.f32 %v1726_v46, %v1716_v43  ;;  %v1690_v53 = vpop.f32.mrf.mxu2 }
 0x314   : > { %v1631_v32 = vadd.f32 %v1630_v11, %v4456_v47 }
 0x315   : > { %1750 = vst [vmem:[%s4471_s13 + $0x28] sm:$0xff] %v1742_v30 }
 0x316   : > { %v1651_v52 = vadd.f32 %v1650_v41, %v1631_v32 }
 0x318   : > { %vm1700_vm13 = vcmp.ge.f32.partialorder %v1651_v52, 0.0  ;;  %v1709_v62 = vmul.f32 %v4462_v39, %v1651_v52 }
 0x31a   : > { %v1670_v42 = vpop.f32.mrf.mxu0  ;;  %v1717_v8 = vsel %vm1700_vm13, %v1651_v52, %v1709_v62 }
 0x31b   : > { %v1671_v15 = vadd.f32 %v1670_v42, %v4456_v47  ;;  %v1743_v16 = vmul.f32 %v1727_v51, %v1717_v8 }
 0x31d   : > { %v1691_v48 = vadd.f32 %v1690_v53, %v1671_v15  ;;  %1751 = vst [vmem:[%s4471_s13 + $0x30] sm:$0xff] %v1743_v16 }
 0x31f   : > { %vm1701_vm14 = vcmp.ge.f32.partialorder %v1691_v48, 0.0  ;;  %v1710_v50 = vmul.f32 %v4462_v39, %v1691_v48 }
 0x321   : > { %v1718_v18 = vsel %vm1701_vm14, %v1691_v48, %v1710_v50 }
 0x322   : > { %v1744_v5 = vmul.f32 %v1728_v6, %v1718_v18 }
 0x324   : > { %1752 = vst [vmem:[%s4471_s13 + $0x38] sm:$0xff] %v1744_v5 }
 0x325 PF: > { %s16_s20 = sadd.s32 1, %s2582_s20  }
 0x326   : > { %p13_p5 = scmp.ge.s32.totalorder %s16_s20, 4  }
 0x328   :  { %15 = sbr.rel (!%p13_p5) target bundleno = 2 (0x2), region = 73 }

// kernel: downscale3d_forward.10
= control target key start
LH: loop header
LB: loop body
LE: loop exit
PB: predicated region body
PF: predicated region fallthrough
CT: control target
= control target key end

     0   :  { %s552_s6 = smov 0   ;;  %s766_s0 = inlined_call_operand.vmem [shape: f32[2,8,1152], index: 0, kind: input, shape index: {}]   ;;  %s767_s1 = inlined_call_operand.vmem [shape: f32[8,2048], index: 1, kind: output, shape index: {}]  }
   0x1 LB: > { %s558_s7 = sadd.s32 4294967295, %s533_s6   ;;  %p505_p0 = scmp.ge.s32.totalorder %s533_s6, 1  ;;  %s533_s6 = sphi %s552_s6, %s11_s6  }
   0x2   : > { %p87_p1 = scmp.lt.s32.totalorder %s533_s6, 3 }
   0x4   : > { %p88_p2 = pnand %p505_p0, %p87_p1 }
   0x5   : > { %p107_p3 = scmp.lt.s32.totalorder (!%p88_p2), %s558_s7, 1  ;;  %s535_s13 = smov (!%p88_p2), 127  }
   0x6   : > { %91 = sbr.rel (%p88_p2) target bundleno = 298 (0x12a), region = 24  ;;  %s536_s14 = smov (!%p88_p2), 118  }
   0x7   : > { %s537_s15 = smov (!%p88_p2), 117   ;;  %s538_s16 = smov (!%p88_p2), 28  }
   0x8   : > { %s539_s17 = smov (!%p88_p2), 27   ;;  %s540_s18 = smov (!%p88_p2), 18  }
   0x9   : > { %s541_s19 = smov (!%p88_p2), 17   ;;  %s507_s20 = sshll.u32 (!%p88_p2), %s558_s7, 3 }
   0xa   : > { %p113_p4 = scmp.lt.s32.totalorder (!%p88_p2), %s507_s20, 15 }
   0xb   : > { %s108_s8 = scalar_select %p107_p3, %s558_s7, 1  ;;  %vm154_vm0 = vcmask 1039360   ;;  %vm197_vm1 = vcmask 965632   ;;  %vm240_vm2 = vcmask 957440   ;;  %vm283_vm3 = vcmask 228352  }
   0xc   : > { %vm326_vm4 = vcmask 220160   ;;  %vm369_vm5 = vcmask 146432   ;;  %s769_s20 = smov (!%p113_p4, %s507_s20), 15  ;;  %vm412_vm6 = vcmask 138240  }
   0xd   : > { %s511_s9 = smul.u32 72, %s108_s8  ;;  %s508_s21 = sshll.u32 %s769_s20, 3 }
   0xe   : > { %s725_s24 = scalar_lea.vmem %s767_s1, %s508_s21 }
   0xf   : > { %s111_s12 = scalar_lea.vmem %s766_s0, %s511_s9 }
  0x10   : > { %v567_v0 = vld [vmem:[%s111_s12 + $0x10] sm:$0xff]  ;;  %v569_v1 = vld [vmem:[%s111_s12] sm:$0xff]  ;;  %v576_v3 = vld [vmem:[%s111_s12 + $0x18] sm:$0xff] }
  0x11   : > { %140 = vrot.lane.b32.xlu1 %v567_v0, %s535_s13  ;;  %136 = vrot.lane.b32.xlu0 %v569_v1, %s535_s13  ;;  %v573_v2 = vld [vmem:[%s111_s12 + $0x20] sm:$0xff]  ;;  %v578_v4 = vld [vmem:[%s111_s12 + $0x8] sm:$0xff] }
  0x12   : > { %144 = vrot.lane.b32.xlu2 %v573_v2, %s535_s13  ;;  %v580_v5 = vld [vmem:[%s111_s12 + $0x28] sm:$0xff]  ;;  %v585_v6 = vld [vmem:[%s111_s12 + $0x38] sm:$0xff]  ;;  %v587_v7 = vld [vmem:[%s111_s12 + $0x30] sm:$0xff] }
  0x13   : > { %v589_v8 = vld [vmem:[%s111_s12 + $0x40] sm:$0xff] }
  0x19   : > { %142 = vrot.lane.b32.xlu1 %v576_v3, %s535_s13  ;;  %138 = vrot.lane.b32.xlu0 %v578_v4, %s535_s13 }
  0x1a   : > { %146 = vrot.lane.b32.xlu2 %v580_v5, %s535_s13 }
  0x21   : > { %150 = vrot.lane.b32.xlu1 %v585_v6, %s535_s13  ;;  %148 = vrot.lane.b32.xlu0 %v587_v7, %s535_s13 }
  0x22   : > { %152 = vrot.lane.b32.xlu2 %v589_v8, %s535_s13 }
  0x29   : > { %181 = vrot.lane.b32.xlu1 %v578_v4, %s536_s14  ;;  %179 = vrot.lane.b32.xlu0 %v569_v1, %s536_s14 }
  0x2a   : > { %183 = vrot.lane.b32.xlu2 %v567_v0, %s536_s14 }
  0x31   : > { %187 = vrot.lane.b32.xlu1 %v573_v2, %s536_s14  ;;  %185 = vrot.lane.b32.xlu0 %v576_v3, %s536_s14 }
  0x32   : > { %189 = vrot.lane.b32.xlu2 %v580_v5, %s536_s14 }
  0x39   : > { %193 = vrot.lane.b32.xlu1 %v585_v6, %s536_s14  ;;  %191 = vrot.lane.b32.xlu0 %v587_v7, %s536_s14 }
  0x3a   : > { %195 = vrot.lane.b32.xlu2 %v589_v8, %s536_s14 }
  0x41   : > { %224 = vrot.lane.b32.xlu1 %v578_v4, %s537_s15  ;;  %222 = vrot.lane.b32.xlu0 %v569_v1, %s537_s15 }
  0x42   : > { %226 = vrot.lane.b32.xlu2 %v567_v0, %s537_s15 }
  0x49   : > { %230 = vrot.lane.b32.xlu1 %v573_v2, %s537_s15  ;;  %228 = vrot.lane.b32.xlu0 %v576_v3, %s537_s15 }
  0x4a   : > { %232 = vrot.lane.b32.xlu2 %v580_v5, %s537_s15 }
  0x51   : > { %236 = vrot.lane.b32.xlu1 %v585_v6, %s537_s15  ;;  %234 = vrot.lane.b32.xlu0 %v587_v7, %s537_s15 }
  0x52   : > { %238 = vrot.lane.b32.xlu2 %v589_v8, %s537_s15 }
  0x59   : > { %267 = vrot.lane.b32.xlu1 %v578_v4, %s538_s16  ;;  %265 = vrot.lane.b32.xlu0 %v569_v1, %s538_s16 }
  0x5a   : > { %269 = vrot.lane.b32.xlu2 %v567_v0, %s538_s16 }
  0x61   : > { %273 = vrot.lane.b32.xlu1 %v573_v2, %s538_s16  ;;  %271 = vrot.lane.b32.xlu0 %v576_v3, %s538_s16 }
  0x62   : > { %275 = vrot.lane.b32.xlu2 %v580_v5, %s538_s16 }
  0x69   : > { %279 = vrot.lane.b32.xlu1 %v585_v6, %s538_s16  ;;  %277 = vrot.lane.b32.xlu0 %v587_v7, %s538_s16 }
  0x6a   : > { %281 = vrot.lane.b32.xlu2 %v589_v8, %s538_s16 }
  0x6c   : > { %v145_v9 = vpop.permute.xlu2 %144 }
  0x71   : > { %310 = vrot.lane.b32.xlu1 %v578_v4, %s539_s17  ;;  %308 = vrot.lane.b32.xlu0 %v569_v1, %s539_s17 }
  0x72   : > { %312 = vrot.lane.b32.xlu2 %v567_v0, %s539_s17 }
  0x74   : > { %v147_v10 = vpop.permute.xlu2 %146 }
  0x75   : > { %v159_v11 = vsel %vm154_vm0, %v145_v9, %v147_v10 }
  0x76   : > { %v175_v38 = vmax.f32 %v573_v2, %v159_v11 }
  0x79   : > { %316 = vrot.lane.b32.xlu1 %v573_v2, %s539_s17  ;;  %314 = vrot.lane.b32.xlu0 %v576_v3, %s539_s17 }
  0x7a   : > { %318 = vrot.lane.b32.xlu2 %v580_v5, %s539_s17 }
  0x7c   : > { %v153_v12 = vpop.permute.xlu2 %152 }
  0x81   : > { %322 = vrot.lane.b32.xlu1 %v585_v6, %s539_s17  ;;  %320 = vrot.lane.b32.xlu0 %v587_v7, %s539_s17 }
  0x82   : > { %324 = vrot.lane.b32.xlu2 %v589_v8, %s539_s17 }
  0x83   : > { %v141_v13 = vpop.permute.xlu1 %140  ;;  %v137_v14 = vpop.permute.xlu0 %136 }
  0x84   : > { %v184_v15 = vpop.permute.xlu2 %183 }
  0x89   : > { %353 = vrot.lane.b32.xlu1 %v578_v4, %s540_s18  ;;  %351 = vrot.lane.b32.xlu0 %v569_v1, %s540_s18 }
  0x8a   : > { %355 = vrot.lane.b32.xlu2 %v567_v0, %s540_s18 }
  0x8b   : > { %v143_v16 = vpop.permute.xlu1 %142  ;;  %v139_v17 = vpop.permute.xlu0 %138 }
  0x8c   : > { %v157_v18 = vsel %vm154_vm0, %v141_v13, %v143_v16  ;;  %v158_v19 = vsel %vm154_vm0, %v143_v16, %v145_v9  ;;  %v155_v20 = vsel %vm154_vm0, %v137_v14, %v139_v17  ;;  %v156_v21 = vsel %vm154_vm0, %v139_v17, %v141_v13  ;;  %v190_v22 = vpop.permute.xlu2 %189 }
  0x8d   : > { %v171_v29 = vmax.f32 %v569_v1, %v155_v20  ;;  %v172_v30 = vmax.f32 %v578_v4, %v156_v21  ;;  %v173_v39 = vmax.f32 %v567_v0, %v157_v18  ;;  %v174_v40 = vmax.f32 %v576_v3, %v158_v19 }
  0x91   : > { %359 = vrot.lane.b32.xlu1 %v573_v2, %s540_s18  ;;  %357 = vrot.lane.b32.xlu0 %v576_v3, %s540_s18 }
  0x92   : > { %361 = vrot.lane.b32.xlu2 %v580_v5, %s540_s18 }
  0x93   : > { %v151_v23 = vpop.permute.xlu1 %150  ;;  %v149_v24 = vpop.permute.xlu0 %148 }
  0x94   : > { %v162_v25 = vsel %vm154_vm0, %v151_v23, %v153_v12  ;;  %v160_v26 = vsel %vm154_vm0, %v147_v10, %v149_v24  ;;  %v161_v27 = vsel %vm154_vm0, %v149_v24, %v151_v23  ;;  %v196_v28 = vpop.permute.xlu2 %195 }
  0x95   : > { %v178_v50 = vmax.f32 %v585_v6, %v162_v25  ;;  %v176_v51 = vmax.f32 %v580_v5, %v160_v26  ;;  %v177_v52 = vmax.f32 %v587_v7, %v161_v27 }
  0x99   : > { %365 = vrot.lane.b32.xlu1 %v585_v6, %s540_s18  ;;  %363 = vrot.lane.b32.xlu0 %v587_v7, %s540_s18 }
  0x9a   : > { %367 = vrot.lane.b32.xlu2 %v589_v8, %s540_s18 }
  0x9b   : > { %v182_v31 = vpop.permute.xlu1 %181  ;;  %v180_v32 = vpop.permute.xlu0 %179 }
  0x9c   : > { %v199_v33 = vsel %vm197_vm1, %v182_v31, %v184_v15  ;;  %v198_v34 = vsel %vm197_vm1, %v180_v32, %v182_v31  ;;  %v227_v35 = vpop.permute.xlu2 %226 }
  0x9d   : > { %v651_v36 = vmax.f32 %v172_v30, %v199_v33  ;;  %v653_v37 = vmax.f32 %v171_v29, %v198_v34 }
  0xa1   : > { %396 = vrot.lane.b32.xlu1 %v578_v4, %s541_s19  ;;  %394 = vrot.lane.b32.xlu0 %v569_v1, %s541_s19 }
  0xa2   : > { %398 = vrot.lane.b32.xlu2 %v567_v0, %s541_s19 }
  0xa3   : > { %v188_v41 = vpop.permute.xlu1 %187  ;;  %v186_v42 = vpop.permute.xlu0 %185 }
  0xa4   : > { %v202_v43 = vsel %vm197_vm1, %v188_v41, %v190_v22  ;;  %v200_v44 = vsel %vm197_vm1, %v184_v15, %v186_v42  ;;  %v201_v45 = vsel %vm197_vm1, %v186_v42, %v188_v41  ;;  %v233_v46 = vpop.permute.xlu2 %232 }
  0xa5   : > { %v218_v47 = vmax.f32 %v175_v38, %v202_v43  ;;  %v216_v48 = vmax.f32 %v173_v39, %v200_v44  ;;  %v217_v49 = vmax.f32 %v174_v40, %v201_v45 }
  0xa9   : > { %402 = vrot.lane.b32.xlu1 %v573_v2, %s541_s19  ;;  %400 = vrot.lane.b32.xlu0 %v576_v3, %s541_s19 }
  0xaa   : > { %404 = vrot.lane.b32.xlu2 %v580_v5, %s541_s19 }
  0xab   : > { %v194_v53 = vpop.permute.xlu1 %193  ;;  %v192_v54 = vpop.permute.xlu0 %191 }
  0xac   : > { %v205_v55 = vsel %vm197_vm1, %v194_v53, %v196_v28  ;;  %v203_v56 = vsel %vm197_vm1, %v190_v22, %v192_v54  ;;  %v204_v57 = vsel %vm197_vm1, %v192_v54, %v194_v53  ;;  %v239_v58 = vpop.permute.xlu2 %238 }
  0xad   : > { %v221_v59 = vmax.f32 %v178_v50, %v205_v55  ;;  %v219_v60 = vmax.f32 %v176_v51, %v203_v56  ;;  %v220_v61 = vmax.f32 %v177_v52, %v204_v57 }
  0xb1   : > { %408 = vrot.lane.b32.xlu1 %v585_v6, %s541_s19  ;;  %406 = vrot.lane.b32.xlu0 %v587_v7, %s541_s19 }
  0xb2   : > { %410 = vrot.lane.b32.xlu2 %v589_v8, %s541_s19 }
  0xb3   : > { %v225_v62 = vpop.permute.xlu1 %224  ;;  %v223_v63 = vpop.permute.xlu0 %222 }
  0xb4   : > { %v242_v0 = vsel %vm240_vm2, %v225_v62, %v227_v35  ;;  %v241_v1 = vsel %vm240_vm2, %v223_v63, %v225_v62  ;;  %v270_v2 = vpop.permute.xlu2 %269 }
  0xb5   : > { %v258_v3 = vmax.f32 %v651_v36, %v242_v0  ;;  %v257_v4 = vmax.f32 %v653_v37, %v241_v1 }
  0xbb   : > { %v231_v5 = vpop.permute.xlu1 %230  ;;  %v229_v6 = vpop.permute.xlu0 %228 }
  0xbc   : > { %v245_v9 = vsel %vm240_vm2, %v231_v5, %v233_v46  ;;  %v243_v7 = vsel %vm240_vm2, %v227_v35, %v229_v6  ;;  %v244_v10 = vsel %vm240_vm2, %v229_v6, %v231_v5  ;;  %v276_v8 = vpop.permute.xlu2 %275 }
  0xbd   : > { %v261_v11 = vmax.f32 %v218_v47, %v245_v9  ;;  %v259_v12 = vmax.f32 %v216_v48, %v243_v7  ;;  %v260_v13 = vmax.f32 %v217_v49, %v244_v10 }
  0xc3   : > { %v237_v14 = vpop.permute.xlu1 %236  ;;  %v235_v15 = vpop.permute.xlu0 %234 }
  0xc4   : > { %v248_v16 = vsel %vm240_vm2, %v237_v14, %v239_v58  ;;  %v246_v17 = vsel %vm240_vm2, %v233_v46, %v235_v15  ;;  %v247_v18 = vsel %vm240_vm2, %v235_v15, %v237_v14  ;;  %v282_v22 = vpop.permute.xlu2 %281 }
  0xc5   : > { %v264_v19 = vmax.f32 %v221_v59, %v248_v16  ;;  %v262_v20 = vmax.f32 %v219_v60, %v246_v17  ;;  %v263_v21 = vmax.f32 %v220_v61, %v247_v18 }
  0xcb   : > { %v268_v23 = vpop.permute.xlu1 %267  ;;  %v266_v24 = vpop.permute.xlu0 %265 }
  0xcc   : > { %v285_v25 = vsel %vm283_vm3, %v268_v23, %v270_v2  ;;  %v284_v26 = vsel %vm283_vm3, %v266_v24, %v268_v23  ;;  %v313_v29 = vpop.permute.xlu2 %312 }
  0xcd   : > { %v301_v27 = vmax.f32 %v258_v3, %v285_v25  ;;  %v300_v28 = vmax.f32 %v257_v4, %v284_v26 }
  0xd3   : > { %v274_v30 = vpop.permute.xlu1 %273  ;;  %v272_v31 = vpop.permute.xlu0 %271 }
  0xd4   : > { %v288_v32 = vsel %vm283_vm3, %v274_v30, %v276_v8  ;;  %v286_v33 = vsel %vm283_vm3, %v270_v2, %v272_v31  ;;  %v287_v34 = vsel %vm283_vm3, %v272_v31, %v274_v30  ;;  %v706_v38 = vpop.permute.xlu2 %318 }
  0xd5   : > { %v700_v35 = vmax.f32 %v261_v11, %v288_v32  ;;  %v702_v36 = vmax.f32 %v259_v12, %v286_v33  ;;  %v704_v37 = vmax.f32 %v260_v13, %v287_v34 }
  0xdb   : > { %v280_v39 = vpop.permute.xlu1 %279  ;;  %v278_v40 = vpop.permute.xlu0 %277 }
  0xdc   : > { %v291_v41 = vsel %vm283_vm3, %v280_v39, %v282_v22  ;;  %v289_v42 = vsel %vm283_vm3, %v276_v8, %v278_v40  ;;  %v290_v43 = vsel %vm283_vm3, %v278_v40, %v280_v39  ;;  %v325_v49 = vpop.permute.xlu2 %324 }
  0xdd   : > { %v711_v44 = vmax.f32 %v264_v19, %v291_v41  ;;  %v713_v45 = vmax.f32 %v262_v20, %v289_v42  ;;  %v715_v46 = vmax.f32 %v263_v21, %v290_v43 }
  0xe3   : > { %v311_v47 = vpop.permute.xlu1 %310  ;;  %v309_v48 = vpop.permute.xlu0 %308 }
  0xe4   : > { %v356_v52 = vpop.permute.xlu2 %355  ;;  %v328_v0 = vsel %vm326_vm4, %v311_v47, %v313_v29  ;;  %v327_v1 = vsel %vm326_vm4, %v309_v48, %v311_v47 }
  0xe5   : > { %v344_v4 = vmax.f32 %v301_v27, %v328_v0  ;;  %v343_v5 = vmax.f32 %v300_v28, %v327_v1 }
  0xeb   : > { %v317_v50 = vpop.permute.xlu1 %316  ;;  %v315_v51 = vpop.permute.xlu0 %314 }
  0xec   : > { %v362_v55 = vpop.permute.xlu2 %361  ;;  %v331_v14 = vsel %vm326_vm4, %v317_v50, %v706_v38  ;;  %v329_v15 = vsel %vm326_vm4, %v313_v29, %v315_v51  ;;  %v330_v16 = vsel %vm326_vm4, %v315_v51, %v317_v50 }
  0xed   : > { %v347_v21 = vmax.f32 %v700_v35, %v331_v14  ;;  %v345_v22 = vmax.f32 %v702_v36, %v329_v15  ;;  %v346_v23 = vmax.f32 %v704_v37, %v330_v16 }
  0xf3   : > { %v323_v53 = vpop.permute.xlu1 %322  ;;  %v321_v54 = vpop.permute.xlu0 %320 }
  0xf4   : > { %v368_v58 = vpop.permute.xlu2 %367  ;;  %v334_v35 = vsel %vm326_vm4, %v323_v53, %v325_v49  ;;  %v332_v36 = vsel %vm326_vm4, %v706_v38, %v321_v54  ;;  %v333_v37 = vsel %vm326_vm4, %v321_v54, %v323_v53 }
  0xf5   : > { %v350_v42 = vmax.f32 %v711_v44, %v334_v35  ;;  %v348_v43 = vmax.f32 %v713_v45, %v332_v36  ;;  %v349_v47 = vmax.f32 %v715_v46, %v333_v37 }
  0xfb   : > { %v354_v56 = vpop.permute.xlu1 %353  ;;  %v352_v57 = vpop.permute.xlu0 %351 }
  0xfc   : > { %v399_v63 = vpop.permute.xlu2 %398  ;;  %v371_v2 = vsel %vm369_vm5, %v354_v56, %v356_v52  ;;  %v370_v3 = vsel %vm369_vm5, %v352_v57, %v354_v56 }
  0xfd   : > { %v387_v6 = vmax.f32 %v344_v4, %v371_v2  ;;  %v386_v9 = vmax.f32 %v343_v5, %v370_v3 }
 0x103   : > { %v360_v59 = vpop.permute.xlu1 %359  ;;  %v358_v60 = vpop.permute.xlu0 %357 }
 0x104   : > { %v405_v17 = vpop.permute.xlu2 %404  ;;  %v374_v18 = vsel %vm369_vm5, %v360_v59, %v362_v55  ;;  %v372_v19 = vsel %vm369_vm5, %v356_v52, %v358_v60  ;;  %v373_v20 = vsel %vm369_vm5, %v358_v60, %v360_v59 }
 0x105   : > { %v390_v24 = vmax.f32 %v347_v21, %v374_v18  ;;  %v388_v25 = vmax.f32 %v345_v22, %v372_v19  ;;  %v389_v26 = vmax.f32 %v346_v23, %v373_v20 }
 0x10b   : > { %v366_v61 = vpop.permute.xlu1 %365  ;;  %v364_v62 = vpop.permute.xlu0 %363 }
 0x10c   : > { %v377_v39 = vsel %vm369_vm5, %v366_v61, %v368_v58  ;;  %v375_v40 = vsel %vm369_vm5, %v362_v55, %v364_v62  ;;  %v376_v41 = vsel %vm369_vm5, %v364_v62, %v366_v61  ;;  %v411_v38 = vpop.permute.xlu2 %410 }
 0x10d   : > { %v393_v48 = vmax.f32 %v350_v42, %v377_v39  ;;  %v391_v49 = vmax.f32 %v348_v43, %v375_v40  ;;  %v392_v50 = vmax.f32 %v349_v47, %v376_v41 }
 0x113   : > { %v397_v7 = vpop.permute.xlu1 %396  ;;  %v395_v10 = vpop.permute.xlu0 %394 }
 0x114   : > { %v414_v8 = vsel %vm412_vm6, %v397_v7, %v399_v63  ;;  %v413_v11 = vsel %vm412_vm6, %v395_v10, %v397_v7 }
 0x115   : > { %v430_v12 = vmax.f32 %v387_v6, %v414_v8  ;;  %v429_v13 = vmax.f32 %v386_v9, %v413_v11 }
 0x117   : > { %438 = vst [vmem:[%s725_s24 + $0x8] sm:$0xff] %v430_v12 }
 0x118   : > { %437 = vst [vmem:[%s725_s24] sm:$0xff] %v429_v13 }
 0x11b   : > { %v403_v27 = vpop.permute.xlu1 %402  ;;  %v401_v28 = vpop.permute.xlu0 %400 }
 0x11c   : > { %v417_v29 = vsel %vm412_vm6, %v403_v27, %v405_v17  ;;  %v415_v30 = vsel %vm412_vm6, %v399_v63, %v401_v28  ;;  %v416_v31 = vsel %vm412_vm6, %v401_v28, %v403_v27 }
 0x11d   : > { %v433_v32 = vmax.f32 %v390_v24, %v417_v29  ;;  %v431_v33 = vmax.f32 %v388_v25, %v415_v30  ;;  %v432_v34 = vmax.f32 %v389_v26, %v416_v31 }
 0x11f   : > { %441 = vst [vmem:[%s725_s24 + $0x20] sm:$0xff] %v433_v32 }
 0x120   : > { %439 = vst [vmem:[%s725_s24 + $0x10] sm:$0xff] %v431_v33 }
 0x121   : > { %440 = vst [vmem:[%s725_s24 + $0x18] sm:$0xff] %v432_v34 }
 0x123   : > { %v409_v51 = vpop.permute.xlu1 %408  ;;  %v407_v52 = vpop.permute.xlu0 %406 }
 0x124   : > { %v420_v53 = vsel %vm412_vm6, %v409_v51, %v411_v38  ;;  %v418_v54 = vsel %vm412_vm6, %v405_v17, %v407_v52  ;;  %v419_v44 = vsel %vm412_vm6, %v407_v52, %v409_v51 }
 0x125   : > { %v436_v55 = vmax.f32 %v393_v48, %v420_v53  ;;  %v434_v56 = vmax.f32 %v391_v49, %v418_v54  ;;  %v435_v45 = vmax.f32 %v392_v50, %v419_v44 }
 0x127   : > { %444 = vst [vmem:[%s725_s24 + $0x38] sm:$0xff] %v436_v55 }
 0x128   : > { %442 = vst [vmem:[%s725_s24 + $0x28] sm:$0xff] %v434_v56 }
 0x129   : > { %443 = vst [vmem:[%s725_s24 + $0x30] sm:$0xff] %v435_v45 }
 0x12a PF: > { %s11_s6 = sadd.s32 1, %s533_s6  }
 0x12b   : > { %p8_p5 = scmp.ge.s32.totalorder %s11_s6, 4  }
 0x12d   :  { %10 = sbr.rel (!%p8_p5) target bundleno = 1 (0x1), region = 54 }

// kernel: downscale3d_forward.11
= control target key start
LH: loop header
LB: loop body
LE: loop exit
PB: predicated region body
PF: predicated region fallthrough
CT: control target
= control target key end

     0   :  { %s1069_s20 = smov 0   ;;  %s1341_s0 = inlined_call_operand.vmem [shape: f32[2,8,384], index: 0, kind: input, shape index: {}]   ;;  %s1342_s1 = inlined_call_operand.vmem [shape: f32[8,216], index: 1, kind: input, shape index: {}]   ;;  %s1343_s2 = inlined_call_operand.vmem [shape: f32[8,1], index: 2, kind: input, shape index: {}]   ;;  %s1344_s3 = inlined_call_operand.<no memory space> [shape: f32[1], index: 3, kind: input, shape index: {}]   ;;  %s1345_s4 = inlined_call_operand.vmem [shape: f32[1,512], index: 4, kind: input, shape index: {}]   ;;  %s1346_s5 = inlined_call_operand.vmem [shape: f32[8,512], index: 5, kind: output, shape index: {}]  }
   0x1   :  { %10 = sst [smem:[#allocation2]] %s1344_s3 }
   0x2 LB: > { %s1075_s21 = sadd.s32 4294967295, %s1010_s20   ;;  %p770_p0 = scmp.ge.s32.totalorder %s1010_s20, 1  ;;  %s1010_s20 = sphi %s1069_s20, %s16_s20  }
   0x3   : > { %p198_p1 = scmp.lt.s32.totalorder %s1010_s20, 3 }
   0x5   : > { %p199_p2 = pnand %p770_p0, %p198_p1 }
   0x6   : > { %p230_p3 = scmp.lt.s32.totalorder (!%p199_p2), %s1075_s21, 1  ;;  %s1012_s26 = smov (!%p199_p2), 126  }
   0x7   : > { %202 = sbr.rel (%p199_p2) target bundleno = 479 (0x1df), region = 40  ;;  %s1013_s27 = smov (!%p199_p2), 127  }
   0x8   : > { %s1014_s28 = smov (!%p199_p2), 122   ;;  %s1015_s29 = smov (!%p199_p2), 121  }
   0x9   : > { %s1016_s30 = smov (!%p199_p2), 120   ;;  %s1017_s6 = smov (!%p199_p2), 116  }
   0xa   : > { %s1018_s7 = smov (!%p199_p2), 115   ;;  %s1019_s8 = smov (!%p199_p2), 91  }
   0xb   : > { %s1020_s9 = smov (!%p199_p2), 93   ;;  %s1021_s10 = smov (!%p199_p2), 92  }
   0xc   : > { %s231_s3 = scalar_select %p230_p3, %s1075_s21, 1  ;;  %vm280_vm0 = vcmask 998400   ;;  %vm269_vm1 = vcmask 1031168   ;;  %vm357_vm2 = vcmask 744448   ;;  %vm291_vm3 = vcmask 990208  }
   0xd   : > { %s1022_s11 = smov 97   ;;  %s1023_s12 = smov 98   ;;  %vm302_vm4 = vcmask 982016   ;;  %vm313_vm5 = vcmask 949248   ;;  %vm324_vm6 = vcmask 941056   ;;  %vm477_vm7 = vcmask 760832  }
   0xe   : > { %s779_s22 = smul.u32 24, %s231_s3  ;;  %s1024_s13 = smov 99   ;;  %vm346_vm8 = vcmask 752640   ;;  %vm468_vm9 = vcmask 793600   ;;  %vm459_vm10 = vcmask 801792   ;;  %vm450_vm11 = vcmask 809984  }
   0xf   : > { %s1025_s14 = smov 103   ;;  %s1026_s15 = smov 104   ;;  %vm412_vm12 = vcmask 654336   ;;  %vm432_vm13 = vcmask 850944   ;;  %vm441_vm14 = vcmask 842752   ;;  %vm423_vm15 = vcmask 859136  }
  0x10   : > { %s234_s25 = scalar_lea.vmem %s1341_s0, %s779_s22  ;;  %s1027_s16 = smov 105  }
  0x11   : > { %v1084_v0 = vld [vmem:[%s234_s25] sm:$0xff]  ;;  %v1086_v1 = vld [vmem:[%s234_s25 + $0x8] sm:$0xff]  ;;  %v248_v3 = vld [vmem:[%s234_s25 + $0x10] sm:$0xff]  ;;  %s1028_s17 = smov 80   ;;  %s1029_s18 = smov 85  }
  0x12   : > { %v817_v2 = vpack.i.bf16 %v1086_v1, %v1084_v0  ;;  %v1091_v4 = vpack.i.bf16 %v248_v3, %v1086_v1  ;;  %s1030_s19 = smov 84   ;;  %s1031_s3 = smov 86  }
  0x13   : > { %s1032_s22 = smov 90   ;;  %s1033_s23 = smov 114  }
  0x14   : > { %818 = vrot.lane.b32.xlu1 %v817_v2, %s1012_s26  ;;  %813 = vrot.lane.b32.xlu0 %v817_v2, %s1013_s27  ;;  %s1034_s24 = smov 79  }
  0x15   : > { %823 = vrot.lane.b32.xlu2 %v817_v2, %s1014_s28 }
  0x1c   : > { %267 = vrot.lane.b32.xlu1 %v248_v3, %s1012_s26  ;;  %256 = vrot.lane.b32.xlu0 %v248_v3, %s1013_s27 }
  0x1d   : > { %278 = vrot.lane.b32.xlu2 %v248_v3, %s1014_s28 }
  0x24   : > { %289 = vrot.lane.b32.xlu1 %v248_v3, %s1015_s29  ;;  %828 = vrot.lane.b32.xlu0 %v817_v2, %s1015_s29 }
  0x25   : > { %833 = vrot.lane.b32.xlu2 %v817_v2, %s1016_s30 }
  0x2c   : > { %838 = vrot.lane.b32.xlu1 %v817_v2, %s1017_s6  ;;  %300 = vrot.lane.b32.xlu0 %v248_v3, %s1016_s30 }
  0x2d   : > { %311 = vrot.lane.b32.xlu2 %v248_v3, %s1017_s6  ;;  %s772_s6 = sshll.u32 %s1075_s21, 1 }
  0x2e   : > { %p236_p4 = scmp.lt.s32.totalorder %s772_s6, 3 }
  0x30   : > { %s1348_s6 = smov (!%p236_p4, %s772_s6), 3 }
  0x34   : > { %322 = vrot.lane.b32.xlu1 %v248_v3, %s1018_s7  ;;  %843 = vrot.lane.b32.xlu0 %v817_v2, %s1018_s7  ;;  %s683_s7 = sld [smem:[#allocation2]] }
  0x35   : > { %848 = vrot.lane.b32.xlu2 %v1091_v4, %s1019_s8 }
  0x3c   : > { %858 = vrot.lane.b32.xlu1 %v1091_v4, %s1020_s9  ;;  %853 = vrot.lane.b32.xlu0 %v1091_v4, %s1021_s10 }
  0x3d   : > { %351 = vrot.lane.b32.xlu2 %v1084_v0, %s1019_s8 }
  0x44   : > { %340 = vrot.lane.b32.xlu1 %v1084_v0, %s1021_s10  ;;  %863 = vrot.lane.b32.xlu0 %v1091_v4, %s1022_s11  ;;  %s238_s10 = scalar_lea.vmem %s1345_s4, %s1348_s6 }
  0x45   : > { %868 = vrot.lane.b32.xlu2 %v1091_v4, %s1023_s12 }
  0x4c   : > { %873 = vrot.lane.b32.xlu1 %v1091_v4, %s1024_s13  ;;  %471 = vrot.lane.b32.xlu0 %v1084_v0, %s1020_s9 }
  0x4d   : > { %462 = vrot.lane.b32.xlu2 %v1084_v0, %s1022_s11  ;;  %s774_s11 = sshll.u32 %s1348_s6, 3 }
  0x54   : > { %453 = vrot.lane.b32.xlu1 %v1084_v0, %s1023_s12  ;;  %878 = vrot.lane.b32.xlu0 %v1091_v4, %s1025_s14 }
  0x55   : > { %883 = vrot.lane.b32.xlu2 %v1091_v4, %s1026_s15 }
  0x5c   : > { %888 = vrot.lane.b32.xlu1 %v1091_v4, %s1027_s16  ;;  %444 = vrot.lane.b32.xlu0 %v1084_v0, %s1024_s13  ;;  %s244_s13 = scalar_lea.vmem %s1346_s5, %s774_s11 }
  0x5d   : > { %435 = vrot.lane.b32.xlu2 %v1084_v0, %s1025_s14 }
  0x64   : > { %417 = vrot.lane.b32.xlu1 %v1084_v0, %s1027_s16  ;;  %426 = vrot.lane.b32.xlu0 %v1084_v0, %s1026_s15 }
  0x65   : > { %893 = vrot.lane.b32.xlu2 %v1091_v4, %s1028_s17 }
  0x6c   : > { %903 = vrot.lane.b32.xlu1 %v1091_v4, %s1029_s18  ;;  %898 = vrot.lane.b32.xlu0 %v1091_v4, %s1030_s19 }
  0x6d   : > { %406 = vrot.lane.b32.xlu2 %v1084_v0, %s1028_s17 }
  0x6f   : > { %v1115_v5 = vpop.permute.xlu2 %823 }
  0x70   : > { %v826_v6 = vunpack.i.h.bf16 %v1115_v5 }
  0x74   : > { %395 = vrot.lane.b32.xlu1 %v1084_v0, %s1030_s19  ;;  %908 = vrot.lane.b32.xlu0 %v1091_v4, %s1031_s3 }
  0x75   : > { %913 = vrot.lane.b32.xlu2 %v1091_v4, %s1032_s22 }
  0x77   : > { %v279_v7 = vpop.permute.xlu2 %278 }
  0x78   : > { %v1124_v8 = vsel %vm280_vm0, %v826_v6, %v279_v7 }
  0x7c   : > { %373 = vrot.lane.b32.xlu1 %v1084_v0, %s1031_s3  ;;  %384 = vrot.lane.b32.xlu0 %v1084_v0, %s1029_s18 }
  0x7f   : > { %v1128_v9 = vpop.permute.xlu2 %833 }
  0x80   : > { %v836_v27 = vunpack.i.h.bf16 %v1128_v9 }
  0x84   : > { %918 = vrot.lane.b32.xlu1 %v1091_v4, %s1033_s23  ;;  %362 = vrot.lane.b32.xlu0 %v1084_v0, %s1032_s22 }
  0x86   : > { %v1133_v10 = vpop.permute.xlu1 %818  ;;  %v1135_v11 = vpop.permute.xlu0 %813 }
  0x87   : > { %v312_v12 = vpop.permute.xlu2 %311  ;;  %v821_v13 = vunpack.i.h.bf16 %v1133_v10 }
  0x8e   : > { %v268_v14 = vpop.permute.xlu1 %267  ;;  %v1138_v15 = vpop.permute.xlu0 %256 }
  0x8f   : > { %v849_v16 = vpop.permute.xlu2 %848  ;;  %v1143_v17 = vsel %vm269_vm1, %v821_v13, %v268_v14 }
  0x90   : > { %v851_v18 = vunpack.i.h.bf16 %v849_v16  ;;  %v850_v19 = vunpack.i.l.bf16 %v849_v16 }
  0x92   : > { %v1146_v20 = vsel %vm357_vm2, %v850_v19, %v851_v18 }
  0x93   : > { %v922_v21 = vpack.i.bf16 %v851_v18, %v1146_v20 }
  0x95   : > { %923 = vrot.lane.b32.xlu2 %v922_v21, %s1034_s24 }
  0x96   : > { %v290_v22 = vpop.permute.xlu1 %289  ;;  %v1150_v23 = vpop.permute.xlu0 %828 }
  0x97   : > { %v831_v24 = vunpack.i.h.bf16 %v1150_v23  ;;  %v352_v25 = vpop.permute.xlu2 %351 }
  0x98   : > { %v1195_v56 = vsel %vm357_vm2, %v352_v25, %v850_v19  ;;  %vm258_vm2 = vcmask 1039360  }
  0x99   : > { %v1156_v26 = vsel %vm291_vm3, %v831_v24, %v290_v22 }
  0x9e   : > { %v1159_v28 = vpop.permute.xlu1 %838  ;;  %v301_v29 = vpop.permute.xlu0 %300 }
  0x9f   : > { %v841_v30 = vunpack.i.h.bf16 %v1159_v28  ;;  %v1162_v31 = vpop.permute.xlu2 %868  ;;  %v1167_v32 = vsel %vm302_vm4, %v836_v27, %v301_v29 }
  0xa0   : > { %v871_v60 = vunpack.i.h.bf16 %v1162_v31  ;;  %v870_v61 = vunpack.i.l.bf16 %v1162_v31 }
  0xa1   : > { %v1172_v33 = vsel %vm313_vm5, %v841_v30, %v312_v12 }
  0xa2   : > { %v461_v2 = vsel %vm459_vm10, %v870_v61, %v871_v60 }
  0xa3   : > { %v947_v25 = vpack.i.bf16 %v871_v60, %v461_v2 }
  0xa6   : > { %v323_v34 = vpop.permute.xlu1 %322  ;;  %v1174_v35 = vpop.permute.xlu0 %843 }
  0xa7   : > { %v846_v36 = vunpack.i.h.bf16 %v1174_v35  ;;  %v463_v37 = vpop.permute.xlu2 %462 }
  0xa9   : > { %v1180_v38 = vsel %vm324_vm6, %v846_v36, %v323_v34 }
  0xae   : > { %v859_v39 = vpop.permute.xlu1 %858  ;;  %v854_v40 = vpop.permute.xlu0 %853 }
  0xaf   : > { %v861_v41 = vunpack.i.h.bf16 %v859_v39  ;;  %v860_v42 = vunpack.i.l.bf16 %v859_v39  ;;  %v856_v43 = vunpack.i.h.bf16 %v854_v40  ;;  %v855_v44 = vunpack.i.l.bf16 %v854_v40  ;;  %v1182_v45 = vpop.permute.xlu2 %883 }
  0xb0   : > { %v886_v34 = vunpack.i.h.bf16 %v1182_v45  ;;  %v885_v39 = vunpack.i.l.bf16 %v1182_v45 }
  0xb1   : > { %v479_v46 = vsel %vm477_vm7, %v860_v42, %v861_v41  ;;  %v1186_v47 = vsel %vm346_vm8, %v855_v44, %v856_v43 }
  0xb2   : > { %v932_v48 = vpack.i.bf16 %v861_v41, %v479_v46  ;;  %v927_v49 = vpack.i.bf16 %v856_v43, %v1186_v47  ;;  %v434_v43 = vsel %vm432_vm13, %v885_v39, %v886_v34 }
  0xb4   : > { %933 = vrot.lane.b32.xlu0 %v932_v48, %s1034_s24  ;;  %928 = vrot.lane.b32.xlu2 %v927_v49, %s1034_s24 }
  0xb6   : > { %v341_v50 = vpop.permute.xlu1 %340  ;;  %v864_v51 = vpop.permute.xlu0 %863 }
  0xb7   : > { %v1192_v52 = vsel %vm346_vm8, %v341_v50, %v855_v44  ;;  %v866_v53 = vunpack.i.h.bf16 %v864_v51  ;;  %v865_v54 = vunpack.i.l.bf16 %v864_v51  ;;  %v436_v55 = vpop.permute.xlu2 %435  ;;  %vm390_vm8 = vcmask 695296  }
  0xb9   : > { %v942_v57 = vpack.i.bf16 %v1192_v52, %v866_v53  ;;  %v470_v58 = vsel %vm468_vm9, %v865_v54, %v866_v53  ;;  %v469_v14 = vsel %vm468_vm9, %v463_v37, %v865_v54  ;;  %vm379_vm9 = vcmask 703488  }
  0xba   : > { %v937_v59 = vpack.i.bf16 %v470_v58, %v1195_v56 }
  0xbc   : > { %329 = vrot.lane.b32.xlu0 %v1084_v0, %s1033_s23  ;;  %938 = vrot.lane.b32.xlu1 %v937_v59, %s1034_s24  ;;  %v816_v59 = vunpack.i.h.bf16 %v1135_v11 }
  0xbd   : > { %943 = vrot.lane.b32.xlu2 %v942_v57, %s1034_s24 }
  0xbe   : > { %v874_v62 = vpop.permute.xlu1 %873  ;;  %v472_v63 = vpop.permute.xlu0 %471 }
  0xbf   : > { %v876_v3 = vunpack.i.h.bf16 %v874_v62  ;;  %v875_v7 = vunpack.i.l.bf16 %v874_v62  ;;  %v894_v12 = vpop.permute.xlu2 %893  ;;  %v478_v22 = vsel %vm477_vm7, %v472_v63, %v860_v42  ;;  %v1227_v63 = vsel %vm258_vm2, %v816_v59, %v1138_v15 }
  0xc0   : > { %v896_v16 = vunpack.i.h.bf16 %v894_v12  ;;  %v895_v18 = vunpack.i.l.bf16 %v894_v12  ;;  %vm401_vm7 = vcmask 687104  }
  0xc1   : > { %v957_v19 = vpack.i.bf16 %v469_v14, %v876_v3  ;;  %v452_v21 = vsel %vm450_vm11, %v875_v7, %v876_v3 }
  0xc2   : > { %v952_v29 = vpack.i.bf16 %v452_v21, %v478_v22  ;;  %v414_v31 = vsel %vm412_vm12, %v895_v18, %v896_v16 }
  0xc3   : > { %643 = vmatpush.msra.mxu2 %v414_v31 }
  0xc4   : > { %948 = vrot.lane.b32.xlu1 %v947_v25, %s1034_s24  ;;  %958 = vrot.lane.b32.xlu0 %v957_v19, %s1034_s24 }
  0xc5   : > { %953 = vrot.lane.b32.xlu2 %v952_v29, %s1034_s24 }
  0xc6   : > { %v454_v37 = vpop.permute.xlu1 %453  ;;  %v879_v40 = vpop.permute.xlu0 %878 }
  0xc7   : > { %v881_v41 = vunpack.i.h.bf16 %v879_v40  ;;  %v880_v42 = vunpack.i.l.bf16 %v879_v40  ;;  %v460_v44 = vsel %vm459_vm10, %v454_v37, %v870_v61  ;;  %v407_v49 = vpop.permute.xlu2 %406  ;;  %vm368_vm10 = vcmask 736256  }
  0xc8   : > { %v967_v48 = vpack.i.bf16 %v434_v43, %v460_v44  ;;  %v413_v53 = vsel %vm412_vm12, %v407_v49, %v895_v18  ;;  %vm335_vm12 = vcmask 932864  }
  0xc9   : > { %v443_v46 = vsel %vm441_vm14, %v880_v42, %v881_v41  ;;  %603 = vmatpush.msra.mxu0 %v413_v53  ;;  %v442_v60 = vsel %vm441_vm14, %v436_v55, %v880_v42 }
  0xca   : > { %v962_v45 = vpack.i.bf16 %v881_v41, %v443_v46  ;;  %v982_v3 = vpack.i.bf16 %v1227_v63, %v442_v60 }
  0xcc   : > { %963 = vrot.lane.b32.xlu1 %v962_v45, %s1034_s24 }
  0xcd   : > { %968 = vrot.lane.b32.xlu2 %v967_v48, %s1034_s24 }
  0xce   : > { %v889_v50 = vpop.permute.xlu1 %888  ;;  %v445_v51 = vpop.permute.xlu0 %444 }
  0xcf   : > { %v891_v54 = vunpack.i.h.bf16 %v889_v50  ;;  %v890_v57 = vunpack.i.l.bf16 %v889_v50  ;;  %v451_v58 = vsel %vm450_vm11, %v445_v51, %v875_v7  ;;  %v815_v7 = vunpack.i.l.bf16 %v1135_v11  ;;  %v914_v37 = vpop.permute.xlu2 %913 }
  0xd0   : > { %v972_v61 = vpack.i.bf16 %v451_v58, %v886_v34  ;;  %v915_v40 = vunpack.i.l.bf16 %v914_v37  ;;  %vm546_vm11 = vcmask 646144  }
  0xd1   : > { %v425_v62 = vsel %vm423_vm15, %v890_v57, %v891_v54  ;;  %v1237_v19 = vsel %vm258_vm2, %v815_v7, %v816_v59 }
  0xd2   : > { %v977_v2 = vpack.i.bf16 %v891_v54, %v425_v62  ;;  %973 = vrot.lane.b32.xlu0 %v972_v61, %s1034_s24 }
  0xd4   : > { %978 = vrot.lane.b32.xlu1 %v977_v2, %s1034_s24 }
  0xd5   : > { %983 = vrot.lane.b32.xlu2 %v982_v3, %s1034_s24 }
  0xd6   : > { %v418_v12 = vpop.permute.xlu1 %417  ;;  %v427_v55 = vpop.permute.xlu0 %426 }
  0xd7   : > { %v433_v14 = vsel %vm432_vm13, %v427_v55, %v885_v39  ;;  %v424_v16 = vsel %vm423_vm15, %v418_v12, %v890_v57 }
  0xd8   : > { %v987_v18 = vpack.i.bf16 %v433_v14, %v1138_v15  ;;  %v997_v21 = vpack.i.bf16 %v1237_v19, %v424_v16 }
  0xda   : > { %988 = vrot.lane.b32.xlu0 %v987_v18, %s1034_s24 }
  0xdc   : > { %993 = vrot.lane.b32.xlu1 %v1091_v4, %s1034_s24  ;;  %v916_v4 = vunpack.i.h.bf16 %v914_v37 }
  0xdd   : > { %998 = vrot.lane.b32.xlu2 %v997_v21, %s1034_s24 }
  0xde   : > { %v904_v11 = vpop.permute.xlu1 %903  ;;  %v899_v22 = vpop.permute.xlu0 %898  ;;  %v370_v48 = vsel %vm368_vm10, %v915_v40, %v916_v4 }
  0xdf   : > { %v906_v25 = vunpack.i.h.bf16 %v904_v11  ;;  %v905_v29 = vunpack.i.l.bf16 %v904_v11  ;;  %v901_v31 = vunpack.i.h.bf16 %v899_v22  ;;  %v900_v34 = vunpack.i.l.bf16 %v899_v22  ;;  %v591_v22 = vld [vmem:[%s1342_s1] sm:$0xff] }
  0xe1   : > { %v403_v15 = vsel %vm401_vm7, %v900_v34, %v901_v31  ;;  %v392_v39 = vsel %vm390_vm8, %v905_v29, %v906_v25  ;;  %v835_v25 = vunpack.i.l.bf16 %v1128_v9  ;;  %v593_v9 = vld [vmem:[%s1343_s2] sm:$0xff] }
  0xe2   : > { %480 = vrot.lane.b32.xlu0 %v1084_v0, %s1034_s24  ;;  %644 = vmatpush.msra.mxu2 %v403_v15  ;;  %v830_v15 = vunpack.i.l.bf16 %v1150_v23 }
  0xe4   : > { %645 = vmatpush.msra.mxu2 %v392_v39 }
  0xe6   : > { %v396_v41 = vpop.permute.xlu1 %395  ;;  %v909_v42 = vpop.permute.xlu0 %908 }
  0xe7   : > { %v911_v43 = vunpack.i.h.bf16 %v909_v42  ;;  %v910_v44 = vunpack.i.l.bf16 %v909_v42  ;;  %v402_v46 = vsel %vm401_vm7, %v396_v41, %v900_v34  ;;  %v820_v42 = vunpack.i.l.bf16 %v1133_v10 }
  0xe8   : > { %604 = vmatpush.msra.mxu0 %v402_v46 }
  0xe9   : > { %v381_v45 = vsel %vm379_vm9, %v910_v44, %v911_v43 }
  0xea   : > { %646 = vmatpush.msra.mxu2 %v381_v45  ;;  %v292_v45 = vsel %vm291_vm3, %v830_v15, %v831_v24  ;;  %v270_v24 = vsel %vm269_vm1, %v820_v42, %v821_v13 }
  0xec   : > { %647 = vmatpush.msra.mxu2 %v370_v48 }
  0xee   : > { %v374_v49 = vpop.permute.xlu1 %373  ;;  %v385_v50 = vpop.permute.xlu0 %384  ;;  %648 = vmatpush.msra.mxu2 %v1146_v20 }
  0xef   : > { %v391_v51 = vsel %vm390_vm8, %v385_v50, %v905_v29  ;;  %v380_v53 = vsel %vm379_vm9, %v374_v49, %v910_v44  ;;  %v924_v54 = vpop.permute.xlu2 %923 }
  0xf0   : > { %649 = vmatpush.msra.mxu2 %v1186_v47  ;;  %605 = vmatpush.msra.mxu0 %v391_v51  ;;  %v926_v57 = vunpack.i.h.bf16 %v924_v54  ;;  %v925_v58 = vunpack.i.l.bf16 %v924_v54 }
  0xf2   : > { %606 = vmatpush.msra.mxu0 %v380_v53  ;;  %v568_v59 = vsel %vm546_vm11, %v925_v58, %v926_v57  ;;  %v1035_v53 = vmov 0  }
  0xf3   : > { %668 = vmatpush.msra.mxu3 %v568_v59  ;;  %1002 = vset.pattern.permute.xlu1 %v1035_v53 }
  0xf4   : > { %596 = vperm.xlu1 %1002, %v593_v9   ;;  %1003 = vset.pattern.permute.xlu0 %v1035_v53 }
  0xf6   : > { %v919_v60 = vpop.permute.xlu1 %918  ;;  %v363_v61 = vpop.permute.xlu0 %362 }
  0xf7   : > { %v921_v62 = vunpack.i.h.bf16 %v919_v60  ;;  %v920_v2 = vunpack.i.l.bf16 %v919_v60  ;;  %v369_v20 = vsel %vm368_vm10, %v363_v61, %v915_v40  ;;  %v303_v40 = vsel %vm302_vm4, %v835_v25, %v836_v27 }
  0xf8   : > { %607 = vmatpush.msra.mxu0 %v369_v20 }
  0xf9   : > { %v337_v3 = vsel %vm335_vm12, %v920_v2, %v921_v62 }
  0xfa   : > { %608 = vmatpush.msra.mxu0 %v1195_v56  ;;  %650 = vmatpush.msra.mxu2 %v337_v3 }
  0xfc   : > { %609 = vmatpush.msra.mxu0 %v1192_v52  ;;  %651 = vmatpush.msra.mxu2 %v1180_v38 }
  0xfe   : > { %652 = vmatpush.msra.mxu2 %v1172_v33 }
 0x100   : > { %653 = vmatpush.msra.mxu2 %v1167_v32 }
 0x102   : > { %654 = vmatpush.msra.mxu2 %v1156_v26 }
 0x104   : > { %655 = vmatpush.msra.mxu2 %v1124_v8 }
 0x106   : > { %656 = vmatpush.msra.mxu2 %v1143_v17  ;;  %v845_v17 = vunpack.i.l.bf16 %v1174_v35 }
 0x108   : > { %657 = vmatpush.msra.mxu2 %v1227_v63  ;;  %v840_v63 = vunpack.i.l.bf16 %v1159_v28  ;;  %v325_v29 = vsel %vm324_vm6, %v845_v17, %v846_v36  ;;  %v825_v36 = vunpack.i.l.bf16 %v1115_v5 }
 0x10a   : > { %658 = vmatpush.msra.mxu2 %v1086_v1  ;;  %v314_v37 = vsel %vm313_vm5, %v840_v63, %v841_v30  ;;  %v281_v49 = vsel %vm280_vm0, %v825_v36, %v826_v6  ;;  %vm599_vm0 = vcmask 719872   ;;  %v686_v36 = vstv %s683_s7 }
 0x10b   : > { %659 = vmatmul.f32.vlgmr.msra.gmra.mxu2 %v591_v22 }
 0x10e   : > { %v929_v47 = vpop.permute.xlu2 %928 }
 0x10f   : > { %v931_v56 = vunpack.i.h.bf16 %v929_v47  ;;  %v930_v7 = vunpack.i.l.bf16 %v929_v47 }
 0x111   : > { %v566_v52 = vsel %vm546_vm11, %v930_v7, %v931_v56 }
 0x112   : > { %669 = vmatpush.msra.mxu3 %v566_v52 }
 0x117   : > { %v944_v38 = vpop.permute.xlu2 %943 }
 0x118   : > { %v946_v1 = vunpack.i.h.bf16 %v944_v38  ;;  %v945_v16 = vunpack.i.l.bf16 %v944_v38 }
 0x11a   : > { %v565_v35 = vsel %vm546_vm11, %v946_v1, %v930_v7 }
 0x11f   : > { %v1268_v8 = vpop.permute.xlu2 %953 }
 0x120   : > { %v955_v39 = vunpack.i.l.bf16 %v1268_v8  ;;  %v956_v23 = vunpack.i.h.bf16 %v1268_v8 }
 0x126   : > { %v934_v33 = vpop.permute.xlu0 %933 }
 0x127   : > { %v936_v12 = vunpack.i.h.bf16 %v934_v33  ;;  %v935_v32 = vunpack.i.l.bf16 %v934_v33  ;;  %v1289_v4 = vpop.permute.xlu2 %968 }
 0x128   : > { %v970_v27 = vunpack.i.l.bf16 %v1289_v4  ;;  %v971_v60 = vunpack.i.h.bf16 %v1289_v4 }
 0x129   : > { %v564_v26 = vsel %vm546_vm11, %v935_v32, %v936_v12  ;;  %v563_v41 = vsel %vm546_vm11, %v955_v39, %v935_v32 }
 0x12a   : > { %670 = vmatpush.msra.mxu3 %v564_v26 }
 0x12e   : > { %v330_v55 = vpop.permute.xlu0 %329  ;;  %v939_v14 = vpop.permute.xlu1 %938 }
 0x12f   : > { %v941_v18 = vunpack.i.h.bf16 %v939_v14  ;;  %v940_v21 = vunpack.i.l.bf16 %v939_v14  ;;  %v336_v11 = vsel %vm335_vm12, %v330_v55, %v920_v2  ;;  %v984_v59 = vpop.permute.xlu2 %983 }
 0x130   : > { %610 = vmatpush.msra.mxu0 %v336_v11  ;;  %v985_v2 = vunpack.i.l.bf16 %v984_v59  ;;  %v986_v33 = vunpack.i.h.bf16 %v984_v59 }
 0x131   : > { %v567_v31 = vsel %vm546_vm11, %v940_v21, %v925_v58  ;;  %v562_v34 = vsel %vm546_vm11, %v941_v18, %v945_v16  ;;  %v592_v16 = vld [vmem:[%s1342_s1 + $0x8] sm:$0xff] }
 0x132   : > { %611 = vmatpush.msra.mxu0 %v325_v29  ;;  %628 = vmatpush.msra.mxu1 %v567_v31 }
 0x133   : > { %671 = vmatpush.msra.mxu3 %v562_v34 }
 0x134   : > { %612 = vmatpush.msra.mxu0 %v314_v37  ;;  %629 = vmatpush.msra.mxu1 %v565_v35  ;;  %v691_v37 = vld [vmem:[%s238_s10] sm:$0x3] }
 0x136   : > { %v949_v43 = vpop.permute.xlu1 %948  ;;  %v959_v28 = vpop.permute.xlu0 %958  ;;  %613 = vmatpush.msra.mxu0 %v303_v40  ;;  %630 = vmatpush.msra.mxu1 %v563_v41  ;;  %v693_v40 = vperm.slane %v691_v37, 0 }
 0x137   : > { %v951_v30 = vunpack.i.h.bf16 %v949_v43  ;;  %v950_v44 = vunpack.i.l.bf16 %v949_v43  ;;  %v961_v46 = vunpack.i.h.bf16 %v959_v28  ;;  %v960_v48 = vunpack.i.l.bf16 %v959_v28  ;;  %v999_v52 = vpop.permute.xlu2 %998 }
 0x138   : > { %614 = vmatpush.msra.mxu0 %v292_v45  ;;  %v1001_v26 = vunpack.i.h.bf16 %v999_v52  ;;  %v1000_v8 = vunpack.i.l.bf16 %v999_v52  ;;  %v694_v28 = vperm.slane %v691_v37, 1 }
 0x139   : > { %v561_v50 = vsel %vm546_vm11, %v961_v46, %v941_v18  ;;  %v560_v51 = vsel %vm546_vm11, %v950_v44, %v951_v30  ;;  %v559_v54 = vsel %vm546_vm11, %v970_v27, %v950_v44  ;;  %v558_v5 = vsel %vm546_vm11, %v956_v23, %v960_v48 }
 0x13a   : > { %615 = vmatpush.msra.mxu0 %v281_v49  ;;  %631 = vmatpush.msra.mxu1 %v561_v50  ;;  %v549_v11 = vsel %vm546_vm11, %v1001_v26, %v986_v33 }
 0x13b   : > { %672 = vmatpush.msra.mxu3 %v560_v51 }
 0x13c   : > { %616 = vmatpush.msra.mxu0 %v270_v24  ;;  %632 = vmatpush.msra.mxu1 %v559_v54 }
 0x13d   : > { %673 = vmatpush.msra.mxu3 %v558_v5 }
 0x13e   : > { %v964_v6 = vpop.permute.xlu1 %963  ;;  %617 = vmatpush.msra.mxu0 %v1237_v19 }
 0x13f   : > { %v966_v57 = vunpack.i.h.bf16 %v964_v6  ;;  %v965_v58 = vunpack.i.l.bf16 %v964_v6 }
 0x140   : > { %618 = vmatpush.msra.mxu0 %v1084_v0 }
 0x141   : > { %v556_v10 = vsel %vm546_vm11, %v965_v58, %v966_v57  ;;  %619 = vmatmul.f32.vlgmr.msra.gmra.mxu0 %v591_v22  ;;  %v555_v0 = vsel %vm546_vm11, %v985_v2, %v965_v58 }
 0x142   : > { %674 = vmatpush.msra.mxu3 %v556_v10 }
 0x144   : > { %v974_v13 = vpop.permute.xlu0 %973 }
 0x145   : > { %v976_v61 = vunpack.i.h.bf16 %v974_v13  ;;  %v975_v62 = vunpack.i.l.bf16 %v974_v13 }
 0x146   : > { %v979_v20 = vpop.permute.xlu1 %978 }
 0x147   : > { %v981_v3 = vunpack.i.h.bf16 %v979_v20  ;;  %v980_v47 = vunpack.i.l.bf16 %v979_v20  ;;  %v557_v19 = vsel %vm546_vm11, %v976_v61, %v956_v23  ;;  %v554_v56 = vsel %vm546_vm11, %v971_v60, %v975_v62 }
 0x148   : > { %633 = vmatpush.msra.mxu1 %v557_v19  ;;  %675 = vmatpush.msra.mxu3 %v554_v56 }
 0x149   : > { %v552_v7 = vsel %vm546_vm11, %v980_v47, %v981_v3  ;;  %v551_v18 = vsel %vm546_vm11, %v1000_v8, %v980_v47 }
 0x14a   : > { %634 = vmatpush.msra.mxu1 %v555_v0  ;;  %676 = vmatpush.msra.mxu3 %v552_v7 }
 0x14c   : > { %v989_v38 = vpop.permute.xlu0 %988 }
 0x14d   : > { %v991_v12 = vunpack.i.h.bf16 %v989_v38  ;;  %v990_v32 = vunpack.i.l.bf16 %v989_v38 }
 0x14e   : > { %v994_v17 = vpop.permute.xlu1 %993 }
 0x14f   : > { %v996_v63 = vunpack.i.h.bf16 %v994_v17  ;;  %v995_v1 = vunpack.i.l.bf16 %v994_v17  ;;  %v553_v55 = vsel %vm546_vm11, %v991_v12, %v971_v60  ;;  %v550_v14 = vsel %vm546_vm11, %v986_v33, %v990_v32 }
 0x150   : > { %635 = vmatpush.msra.mxu1 %v553_v55  ;;  %677 = vmatpush.msra.mxu3 %v550_v14 }
 0x151   : > { %v548_v21 = vsel %vm546_vm11, %v995_v1, %v996_v63 }
 0x152   : > { %636 = vmatpush.msra.mxu1 %v551_v18  ;;  %678 = vmatpush.msra.mxu3 %v548_v21 }
 0x153   : > { %776 = vmatmul.msk.f32.vlgmr.msra.gmra.mxu3 %vm599_vm0, %v592_v16 }
 0x154   : > { %v481_v22 = vpop.permute.xlu0 %480  ;;  %637 = vmatpush.msra.mxu1 %v549_v11 }
 0x155   : > { %v547_v25 = vsel %vm546_vm11, %v481_v22, %v995_v1 }
 0x156   : > { %638 = vmatpush.msra.mxu1 %v547_v25 }
 0x157   : > { %775 = vmatmul.msk.f32.vlgmr.msra.gmra.mxu1 %vm599_vm0, %v592_v16 }
 0x166   : > { %v597_v29 = vpop.permute.xlu1 %596 }
 0x18e   : > { %v660_v34 = vpop.f32.mrf.mxu2 }
 0x18f   : > { %v661_v39 = vadd.f32 %v660_v34, %v597_v29 }
 0x1be   : > { %v620_v31 = vpop.f32.mrf.mxu0 }
 0x1bf   : > { %v621_v15 = vadd.f32 %v620_v31, %v597_v29 }
 0x1d4   : > { %v640_v35 = vpop.f32.mrf.mxu1 }
 0x1d5   : > { %v641_v4 = vadd.f32 %v640_v35, %v621_v15 }
 0x1d6   : > { %v680_v41 = vpop.f32.mrf.mxu3 }
 0x1d7   : > { %vm684_vm1 = vcmp.ge.f32.partialorder %v641_v4, 0.0  ;;  %v687_v42 = vmul.f32 %v686_v36, %v641_v4  ;;  %v681_v43 = vadd.f32 %v680_v41, %v661_v39 }
 0x1d9   : > { %v689_v30 = vsel %vm684_vm1, %v641_v4, %v687_v42  ;;  %vm685_vm3 = vcmp.ge.f32.partialorder %v681_v43, 0.0  ;;  %v688_v44 = vmul.f32 %v686_v36, %v681_v43 }
 0x1da   : > { %v697_v46 = vmul.f32 %v693_v40, %v689_v30 }
 0x1db   : > { %v690_v45 = vsel %vm685_vm3, %v681_v43, %v688_v44 }
 0x1dc   : > { %699 = vst [vmem:[%s244_s13] sm:$0xff] %v697_v46  ;;  %v698_v48 = vmul.f32 %v694_v28, %v690_v45 }
 0x1de   : > { %700 = vst [vmem:[%s244_s13 + $0x8] sm:$0xff] %v698_v48 }
 0x1df PF: > { %s16_s20 = sadd.s32 1, %s1010_s20  }
 0x1e0   : > { %p13_p5 = scmp.ge.s32.totalorder %s16_s20, 4  }
 0x1e2   :  { %15 = sbr.rel (!%p13_p5) target bundleno = 2 (0x2), region = 73 }

// kernel: downscale3d_forward.12
= control target key start
LH: loop header
LB: loop body
LE: loop exit
PB: predicated region body
PF: predicated region fallthrough
CT: control target
= control target key end

     0   :  { %s324_s6 = smov 0   ;;  %s352_s0 = inlined_call_operand.vmem [shape: f32[2,8,384], index: 0, kind: input, shape index: {}]   ;;  %s353_s1 = inlined_call_operand.vmem [shape: f32[8,512], index: 1, kind: output, shape index: {}]  }
   0x1 LB: > { %s330_s7 = sadd.s32 4294967295, %s305_s6   ;;  %p277_p0 = scmp.ge.s32.totalorder %s305_s6, 1  ;;  %s305_s6 = sphi %s324_s6, %s11_s6  }
   0x2   : > { %p87_p1 = scmp.lt.s32.totalorder %s305_s6, 3 }
   0x4   : > { %p88_p2 = pnand %p277_p0, %p87_p1 }
   0x5   : > { %p107_p3 = scmp.lt.s32.totalorder (!%p88_p2), %s330_s7, 1  ;;  %s307_s13 = smov (!%p88_p2), 127  }
   0x6   : > { %91 = sbr.rel (%p88_p2) target bundleno = 185 (0xb9), region = 24  ;;  %s308_s14 = smov (!%p88_p2), 122  }
   0x7   : > { %s309_s15 = smov (!%p88_p2), 121   ;;  %s310_s16 = smov (!%p88_p2), 92  }
   0x8   : > { %s311_s17 = smov (!%p88_p2), 91   ;;  %s312_s18 = smov (!%p88_p2), 86  }
   0x9   : > { %s313_s19 = smov (!%p88_p2), 85   ;;  %s279_s20 = sshll.u32 (!%p88_p2), %s330_s7, 1 }
   0xa   : > { %p340_p4 = scmp.lt.s32.totalorder (!%p88_p2), %s279_s20, 3 }
   0xb   : > { %s108_s8 = scalar_select %p107_p3, %s330_s7, 1  ;;  %vm130_vm0 = vcmask 1039360   ;;  %vm143_vm1 = vcmask 998400   ;;  %vm156_vm2 = vcmask 990208   ;;  %vm169_vm3 = vcmask 752640  }
   0xc   : > { %vm182_vm4 = vcmask 744448   ;;  %vm195_vm5 = vcmask 703488   ;;  %s356_s20 = smov (!%p340_p4, %s279_s20), 3  ;;  %vm208_vm6 = vcmask 695296  }
   0xd   : > { %s283_s9 = smul.u32 24, %s108_s8  ;;  %s280_s22 = sshll.u32 %s356_s20, 3 }
   0xe   : > { %s116_s25 = scalar_lea.vmem %s353_s1, %s280_s22 }
   0xf   : > { %s111_s12 = scalar_lea.vmem %s352_s0, %s283_s9 }
  0x10   : > { %v120_v0 = vld [vmem:[%s111_s12 + $0x10] sm:$0xff]  ;;  %v118_v1 = vld [vmem:[%s111_s12] sm:$0xff]  ;;  %v119_v2 = vld [vmem:[%s111_s12 + $0x8] sm:$0xff] }
  0x11   : > { %128 = vrot.lane.b32.xlu1 %v120_v0, %s307_s13  ;;  %124 = vrot.lane.b32.xlu0 %v118_v1, %s307_s13 }
  0x12   : > { %139 = vrot.lane.b32.xlu2 %v119_v2, %s308_s14 }
  0x19   : > { %137 = vrot.lane.b32.xlu1 %v118_v1, %s308_s14  ;;  %126 = vrot.lane.b32.xlu0 %v119_v2, %s307_s13 }
  0x1a   : > { %141 = vrot.lane.b32.xlu2 %v120_v0, %s308_s14 }
  0x21   : > { %152 = vrot.lane.b32.xlu1 %v119_v2, %s309_s15  ;;  %150 = vrot.lane.b32.xlu0 %v118_v1, %s309_s15 }
  0x22   : > { %154 = vrot.lane.b32.xlu2 %v120_v0, %s309_s15 }
  0x29   : > { %165 = vrot.lane.b32.xlu1 %v119_v2, %s310_s16  ;;  %163 = vrot.lane.b32.xlu0 %v118_v1, %s310_s16 }
  0x2a   : > { %167 = vrot.lane.b32.xlu2 %v120_v0, %s310_s16 }
  0x31   : > { %178 = vrot.lane.b32.xlu1 %v119_v2, %s311_s17  ;;  %176 = vrot.lane.b32.xlu0 %v118_v1, %s311_s17 }
  0x32   : > { %180 = vrot.lane.b32.xlu2 %v120_v0, %s311_s17 }
  0x39   : > { %191 = vrot.lane.b32.xlu1 %v119_v2, %s312_s18  ;;  %189 = vrot.lane.b32.xlu0 %v118_v1, %s312_s18 }
  0x3a   : > { %193 = vrot.lane.b32.xlu2 %v120_v0, %s312_s18 }
  0x41   : > { %204 = vrot.lane.b32.xlu1 %v119_v2, %s313_s19  ;;  %202 = vrot.lane.b32.xlu0 %v118_v1, %s313_s19 }
  0x42   : > { %206 = vrot.lane.b32.xlu2 %v120_v0, %s313_s19 }
  0x6c   : > { %v140_v3 = vpop.permute.xlu2 %139 }
  0x74   : > { %v142_v4 = vpop.permute.xlu2 %141 }
  0x75   : > { %v145_v23 = vsel %vm143_vm1, %v140_v3, %v142_v4 }
  0x7c   : > { %v155_v7 = vpop.permute.xlu2 %154 }
  0x83   : > { %v129_v5 = vpop.permute.xlu1 %128  ;;  %v125_v6 = vpop.permute.xlu0 %124 }
  0x84   : > { %v168_v10 = vpop.permute.xlu2 %167 }
  0x8b   : > { %v138_v8 = vpop.permute.xlu1 %137  ;;  %v127_v9 = vpop.permute.xlu0 %126 }
  0x8c   : > { %v181_v15 = vpop.permute.xlu2 %180  ;;  %v131_v18 = vsel %vm130_vm0, %v125_v6, %v127_v9  ;;  %v132_v19 = vsel %vm130_vm0, %v127_v9, %v129_v5  ;;  %v144_v24 = vsel %vm143_vm1, %v138_v8, %v140_v3 }
  0x8d   : > { %v135_v20 = vmax.f32 %v118_v1, %v131_v18  ;;  %v136_v21 = vmax.f32 %v119_v2, %v132_v19 }
  0x8f   : > { %v149_v27 = vmax.f32 %v136_v21, %v145_v23  ;;  %v148_v28 = vmax.f32 %v135_v20, %v144_v24 }
  0x93   : > { %v153_v11 = vpop.permute.xlu1 %152  ;;  %v151_v12 = vpop.permute.xlu0 %150 }
  0x94   : > { %v194_v22 = vpop.permute.xlu2 %193  ;;  %v158_v25 = vsel %vm156_vm2, %v153_v11, %v155_v7  ;;  %v157_v26 = vsel %vm156_vm2, %v151_v12, %v153_v11 }
  0x95   : > { %v162_v33 = vmax.f32 %v149_v27, %v158_v25  ;;  %v161_v34 = vmax.f32 %v148_v28, %v157_v26 }
  0x9b   : > { %v166_v13 = vpop.permute.xlu1 %165  ;;  %v164_v14 = vpop.permute.xlu0 %163 }
  0x9c   : > { %v171_v31 = vsel %vm169_vm3, %v166_v13, %v168_v10  ;;  %v170_v32 = vsel %vm169_vm3, %v164_v14, %v166_v13  ;;  %v207_v43 = vpop.permute.xlu2 %206 }
  0x9d   : > { %v175_v37 = vmax.f32 %v162_v33, %v171_v31  ;;  %v174_v38 = vmax.f32 %v161_v34, %v170_v32 }
  0xa3   : > { %v179_v16 = vpop.permute.xlu1 %178  ;;  %v177_v17 = vpop.permute.xlu0 %176 }
  0xa4   : > { %v184_v35 = vsel %vm182_vm4, %v179_v16, %v181_v15  ;;  %v183_v36 = vsel %vm182_vm4, %v177_v17, %v179_v16 }
  0xa5   : > { %v188_v41 = vmax.f32 %v175_v37, %v184_v35  ;;  %v187_v42 = vmax.f32 %v174_v38, %v183_v36 }
  0xab   : > { %v192_v29 = vpop.permute.xlu1 %191  ;;  %v190_v30 = vpop.permute.xlu0 %189 }
  0xac   : > { %v197_v39 = vsel %vm195_vm5, %v192_v29, %v194_v22  ;;  %v196_v40 = vsel %vm195_vm5, %v190_v30, %v192_v29 }
  0xad   : > { %v201_v44 = vmax.f32 %v188_v41, %v197_v39  ;;  %v200_v45 = vmax.f32 %v187_v42, %v196_v40 }
  0xb3   : > { %v205_v46 = vpop.permute.xlu1 %204  ;;  %v203_v47 = vpop.permute.xlu0 %202 }
  0xb4   : > { %v210_v48 = vsel %vm208_vm6, %v205_v46, %v207_v43  ;;  %v209_v49 = vsel %vm208_vm6, %v203_v47, %v205_v46 }
  0xb5   : > { %v214_v50 = vmax.f32 %v201_v44, %v210_v48  ;;  %v213_v51 = vmax.f32 %v200_v45, %v209_v49 }
  0xb7   : > { %215 = vst [vmem:[%s116_s25] sm:$0xff] %v213_v51 }
  0xb8   : > { %216 = vst [vmem:[%s116_s25 + $0x8] sm:$0xff] %v214_v50 }
  0xb9 PF: > { %s11_s6 = sadd.s32 1, %s305_s6  }
  0xba   : > { %p8_p5 = scmp.ge.s32.totalorder %s11_s6, 4  }
  0xbc   :  { %10 = sbr.rel (!%p8_p5) target bundleno = 1 (0x1), region = 54 }

// kernel: downscale3d_forward.13
= control target key start
LH: loop header
LB: loop body
LE: loop exit
PB: predicated region body
PF: predicated region fallthrough
CT: control target
= control target key end

     0   :  { %s470_s3 = smov 111   ;;  %s471_s22 = smov 113   ;;  %vm92_vm0 = vcmask 908288   ;;  %vm158_vm1 = vcmask 924672   ;;  %vm85_vm2 = vcmask 916480   ;;  %vm152_vm3 = vcmask 941056   ;;  %s608_s0 = inlined_call_operand.vmem [shape: f32[1,8,256], index: 0, kind: input, shape index: {}]   ;;  %s609_s3 = inlined_call_operand.<no memory space> [shape: f32[1], index: 3, kind: input, shape index: {}]   ;;  %s610_s1 = inlined_call_operand.vmem [shape: f32[8,216], index: 1, kind: input, shape index: {}]   ;;  %s611_s4 = inlined_call_operand.vmem [shape: f32[1,128], index: 4, kind: input, shape index: {}]   ;;  %s612_s2 = inlined_call_operand.vmem [shape: f32[8,1], index: 2, kind: input, shape index: {}]   ;;  %s613_s5 = inlined_call_operand.vmem [shape: f32[8,128], index: 5, kind: output, shape index: {}]  }
   0x1   :  { %v525_v0 = vld [vmem:[%s608_s0] sm:$0xff]  ;;  %v22_v1 = vld [vmem:[%s608_s0 + $0x8] sm:$0xff]  ;;  %s472_s23 = smov 116   ;;  %s473_s24 = smov 112   ;;  %vm140_vm4 = vcmask 957440   ;;  %vm146_vm5 = vcmask 949248  }
   0x2   :  { %v531_v2 = vpack.i.bf16 %v22_v1, %v525_v0  ;;  %s474_s25 = smov 115   ;;  %s475_s26 = smov 117   ;;  %vm71_vm6 = vcmask 973824   ;;  %vm64_vm7 = vcmask 982016   ;;  %vm134_vm8 = vcmask 990208  }
   0x3   :  { %s476_s0 = smov 119   ;;  %s477_s27 = smov 120   ;;  %vm29_vm9 = vcmask 1039360   ;;  %vm127_vm10 = vcmask 850944   ;;  %vm120_vm11 = vcmask 867328   ;;  %vm113_vm12 = vcmask 875520  }
   0x4   :  { %313 = vrot.lane.b32.xlu0 %v531_v2, %s470_s3  ;;  %323 = vrot.lane.b32.xlu1 %v531_v2, %s471_s22  ;;  %s478_s28 = smov 121   ;;  %s479_s29 = smov 127   ;;  %vm106_vm13 = vcmask 883712   ;;  %vm99_vm14 = vcmask 900096   ;;  %vm78_vm15 = vcmask 965632  }
   0x5   :  { %333 = vrot.lane.b32.xlu2 %v531_v2, %s472_s23  ;;  %s480_s30 = smov 104   ;;  %s481_s6 = smov 106  }
   0x6   :  { %s482_s7 = smov 107   ;;  %s483_s8 = smov 108  }
   0x7   :  { %s484_s9 = smov 110   ;;  %s485_s10 = smov 118  }
   0x8   :  { %s486_s11 = smov 124   ;;  %s487_s12 = smov 122  }
   0x9   :  { %s488_s13 = smov 123   ;;  %s489_s14 = smov 126  }
   0xa   :  { %s490_s15 = smov 103  }
   0xc   :  { %318 = vrot.lane.b32.xlu0 %v531_v2, %s473_s24  ;;  %328 = vrot.lane.b32.xlu1 %v531_v2, %s474_s25 }
   0xd   :  { %338 = vrot.lane.b32.xlu2 %v531_v2, %s475_s26 }
  0x14   :  { %343 = vrot.lane.b32.xlu0 %v531_v2, %s476_s0  ;;  %348 = vrot.lane.b32.xlu1 %v531_v2, %s477_s27 }
  0x15   :  { %353 = vrot.lane.b32.xlu2 %v531_v2, %s478_s28 }
  0x1c   :  { %358 = vrot.lane.b32.xlu0 %v531_v2, %s479_s29  ;;  %363 = vrot.lane.b32.xlu1 %v531_v2, %s480_s30 }
  0x1d   :  { %368 = vrot.lane.b32.xlu2 %v531_v2, %s481_s6 }
  0x24   :  { %373 = vrot.lane.b32.xlu0 %v531_v2, %s482_s7  ;;  %378 = vrot.lane.b32.xlu1 %v531_v2, %s483_s8 }
  0x25   :  { %383 = vrot.lane.b32.xlu2 %v531_v2, %s484_s9 }
  0x2c   :  { %388 = vrot.lane.b32.xlu1 %v531_v2, %s485_s10  ;;  %403 = vrot.lane.b32.xlu0 %v531_v2, %s486_s11 }
  0x2d   :  { %393 = vrot.lane.b32.xlu2 %v531_v2, %s487_s12 }
  0x34   :  { %398 = vrot.lane.b32.xlu1 %v531_v2, %s488_s13 }
  0x35   :  { %408 = vrot.lane.b32.xlu2 %v531_v2, %s489_s14 }
  0x5f   :  { %v334_v3 = vpop.permute.xlu2 %333 }
  0x60   :  { %v336_v28 = vunpack.i.h.bf16 %v334_v3  ;;  %v335_v29 = vunpack.i.l.bf16 %v334_v3 }
  0x62   :  { %v147_v33 = vsel %vm146_vm5, %v335_v29, %v336_v28  ;;  %vm235_vm5 = vcmask 719872  }
  0x63   :  { %v432_v43 = vpack.i.bf16 %v336_v28, %v147_v33 }
  0x67   :  { %v339_v4 = vpop.permute.xlu2 %338 }
  0x68   :  { %v341_v23 = vunpack.i.h.bf16 %v339_v4  ;;  %v340_v24 = vunpack.i.l.bf16 %v339_v4 }
  0x6a   :  { %v141_v30 = vsel %vm140_vm4, %v340_v24, %v341_v23  ;;  %vm204_vm4 = vcmask 842752  }
  0x6b   :  { %v437_v36 = vpack.i.bf16 %v341_v23, %v141_v30 }
  0x6f   :  { %v354_v20 = vpop.permute.xlu2 %353 }
  0x70   :  { %v356_v37 = vunpack.i.h.bf16 %v354_v20  ;;  %v355_v41 = vunpack.i.l.bf16 %v354_v20 }
  0x72   :  { %v135_v46 = vsel %vm134_vm8, %v355_v41, %v356_v37 }
  0x73   :  { %v452_v56 = vpack.i.bf16 %v356_v37, %v135_v46 }
  0x76   :  { %v314_v5 = vpop.permute.xlu0 %313  ;;  %v324_v6 = vpop.permute.xlu1 %323 }
  0x77   :  { %v316_v7 = vunpack.i.h.bf16 %v314_v5  ;;  %v315_v8 = vunpack.i.l.bf16 %v314_v5  ;;  %v326_v11 = vunpack.i.h.bf16 %v324_v6  ;;  %v325_v12 = vunpack.i.l.bf16 %v324_v6  ;;  %v369_v42 = vpop.permute.xlu2 %368 }
  0x78   :  { %v371_v49 = vunpack.i.h.bf16 %v369_v42  ;;  %v370_v50 = vunpack.i.l.bf16 %v369_v42 }
  0x79   :  { %v553_v9 = vsel %vm92_vm0, %v315_v8, %v316_v7  ;;  %v159_v13 = vsel %vm158_vm1, %v325_v12, %v326_v11  ;;  %vm57_vm0 = vcmask 998400   ;;  %vm50_vm1 = vcmask 1006592  }
  0x7a   :  { %v412_v10 = vpack.i.bf16 %v316_v7, %v553_v9  ;;  %v422_v25 = vpack.i.bf16 %v326_v11, %v159_v13  ;;  %v121_v60 = vsel %vm120_vm11, %v370_v50, %v371_v49 }
  0x7c   :  { %413 = vrot.lane.b32.xlu0 %v412_v10, %s490_s15 }
  0x7e   :  { %v319_v14 = vpop.permute.xlu0 %318  ;;  %v329_v15 = vpop.permute.xlu1 %328 }
  0x7f   :  { %v321_v16 = vunpack.i.h.bf16 %v319_v14  ;;  %v320_v17 = vunpack.i.l.bf16 %v319_v14  ;;  %v331_v18 = vunpack.i.h.bf16 %v329_v15  ;;  %v330_v19 = vunpack.i.l.bf16 %v329_v15  ;;  %v384_v61 = vpop.permute.xlu2 %383 }
  0x80   :  { %v386_v1 = vunpack.i.h.bf16 %v384_v61  ;;  %v385_v3 = vunpack.i.l.bf16 %v384_v61 }
  0x81   :  { %v557_v21 = vsel %vm85_vm2, %v320_v17, %v321_v16  ;;  %v153_v22 = vsel %vm152_vm3, %v330_v19, %v331_v18  ;;  %vm43_vm2 = vcmask 1014784   ;;  %vm36_vm3 = vcmask 1031168  }
  0x82   :  { %v417_v26 = vpack.i.bf16 %v321_v16, %v557_v21  ;;  %v427_v27 = vpack.i.bf16 %v331_v18, %v153_v22  ;;  %v100_v11 = vsel %vm99_vm14, %v385_v3, %v386_v1 }
  0x84   :  { %423 = vrot.lane.b32.xlu0 %v422_v25, %s490_s15  ;;  %428 = vrot.lane.b32.xlu1 %v427_v27, %s490_s15 }
  0x85   :  { %418 = vrot.lane.b32.xlu2 %v417_v26, %s490_s15 }
  0x86   :  { %v344_v31 = vpop.permute.xlu0 %343  ;;  %v349_v32 = vpop.permute.xlu1 %348 }
  0x87   :  { %v346_v34 = vunpack.i.h.bf16 %v344_v31  ;;  %v345_v35 = vunpack.i.l.bf16 %v344_v31  ;;  %v351_v39 = vunpack.i.h.bf16 %v349_v32  ;;  %v350_v40 = vunpack.i.l.bf16 %v349_v32  ;;  %v394_v12 = vpop.permute.xlu2 %393 }
  0x88   :  { %v396_v17 = vunpack.i.h.bf16 %v394_v12  ;;  %v395_v18 = vunpack.i.l.bf16 %v394_v12 }
  0x89   :  { %v563_v38 = vsel %vm71_vm6, %v345_v35, %v346_v34  ;;  %v568_v45 = vsel %vm64_vm7, %v350_v40, %v351_v39 }
  0x8a   :  { %v442_v44 = vpack.i.bf16 %v346_v34, %v563_v38  ;;  %v447_v55 = vpack.i.bf16 %v351_v39, %v568_v45  ;;  %v491_v39 = vmov 0  }
  0x8b   :  { %467 = vset.pattern.permute.xlu1 %v491_v39  ;;  %468 = vset.pattern.permute.xlu0 %v491_v39 }
  0x8c   :  { %433 = vrot.lane.b32.xlu0 %v432_v43, %s490_s15  ;;  %443 = vrot.lane.b32.xlu1 %v442_v44, %s490_s15 }
  0x8d   :  { %438 = vrot.lane.b32.xlu2 %v437_v36, %s490_s15  ;;  %v227_v36 = vld [vmem:[%s610_s1] sm:$0xff] }
  0x8e   :  { %v359_v47 = vpop.permute.xlu0 %358  ;;  %v364_v48 = vpop.permute.xlu1 %363 }
  0x8f   :  { %v361_v51 = vunpack.i.h.bf16 %v359_v47  ;;  %v360_v52 = vunpack.i.l.bf16 %v359_v47  ;;  %v366_v53 = vunpack.i.h.bf16 %v364_v48  ;;  %v365_v54 = vunpack.i.l.bf16 %v364_v48  ;;  %v409_v22 = vpop.permute.xlu2 %408 }
  0x91   :  { %v30_v57 = vsel %vm29_vm9, %v360_v52, %v361_v51  ;;  %v128_v58 = vsel %vm127_vm10, %v365_v54, %v366_v53 }
  0x92   :  { %v457_v59 = vpack.i.bf16 %v361_v51, %v30_v57  ;;  %239 = vmatpush.msra.mxu0 %v128_v58 }
  0x94   :  { %448 = vrot.lane.b32.xlu0 %v447_v55, %s490_s15  ;;  %453 = vrot.lane.b32.xlu1 %v452_v56, %s490_s15 }
  0x95   :  { %240 = vmatpush.msra.mxu0 %v121_v60  ;;  %458 = vrot.lane.b32.xlu2 %v457_v59, %s490_s15 }
  0x96   :  { %v374_v62 = vpop.permute.xlu0 %373  ;;  %v379_v63 = vpop.permute.xlu1 %378 }
  0x97   :  { %v376_v4 = vunpack.i.h.bf16 %v374_v62  ;;  %v375_v5 = vunpack.i.l.bf16 %v374_v62  ;;  %v381_v6 = vunpack.i.h.bf16 %v379_v63  ;;  %v380_v7 = vunpack.i.l.bf16 %v379_v63 }
  0x99   :  { %v114_v8 = vsel %vm113_vm12, %v375_v5, %v376_v4  ;;  %v107_v10 = vsel %vm106_vm13, %v380_v7, %v381_v6 }
  0x9a   :  { %241 = vmatpush.msra.mxu0 %v114_v8 }
  0x9c   :  { %242 = vmatpush.msra.mxu0 %v107_v10  ;;  %463 = vrot.lane.b32.xlu0 %v531_v2, %s490_s15  ;;  %v58_v2 = vsel %vm57_vm0, %v395_v18, %v396_v17 }
  0x9e   :  { %243 = vmatpush.msra.mxu0 %v100_v11  ;;  %v389_v13 = vpop.permute.xlu1 %388  ;;  %v404_v19 = vpop.permute.xlu0 %403 }
  0x9f   :  { %v391_v14 = vunpack.i.h.bf16 %v389_v13  ;;  %v390_v15 = vunpack.i.l.bf16 %v389_v13  ;;  %v406_v25 = vunpack.i.h.bf16 %v404_v19  ;;  %v405_v26 = vunpack.i.l.bf16 %v404_v19  ;;  %v469_v19 = vld [vmem:[%s611_s4] ss:$0 sm:$0xff] }
  0xa0   :  { %244 = vmatpush.msra.mxu0 %v553_v9  ;;  %v411_v9 = vunpack.i.h.bf16 %v409_v22 }
  0xa1   :  { %v79_v16 = vsel %vm78_vm15, %v390_v15, %v391_v14  ;;  %v44_v28 = vsel %vm43_vm2, %v405_v26, %v406_v25  ;;  %v228_v14 = vld [vmem:[%s610_s1 + $0x8] sm:$0xff] }
  0xa2   :  { %245 = vmatpush.msra.mxu0 %v557_v21  ;;  %v410_v21 = vunpack.i.l.bf16 %v409_v22 }
  0xa4   :  { %246 = vmatpush.msra.mxu0 %v79_v16  ;;  %v37_v29 = vsel %vm36_vm3, %v410_v21, %v411_v9 }
  0xa6   :  { %247 = vmatpush.msra.mxu0 %v563_v38  ;;  %v399_v20 = vpop.permute.xlu1 %398 }
  0xa7   :  { %v401_v23 = vunpack.i.h.bf16 %v399_v20  ;;  %v400_v24 = vunpack.i.l.bf16 %v399_v20 }
  0xa8   :  { %248 = vmatpush.msra.mxu0 %v568_v45 }
  0xa9   :  { %v51_v27 = vsel %vm50_vm1, %v400_v24, %v401_v23 }
  0xaa   :  { %249 = vmatpush.msra.mxu0 %v58_v2 }
  0xac   :  { %250 = vmatpush.msra.mxu0 %v51_v27 }
  0xae   :  { %251 = vmatpush.msra.mxu0 %v44_v28 }
  0xb0   :  { %252 = vmatpush.msra.mxu0 %v37_v29 }
  0xb2   :  { %253 = vmatpush.msra.mxu0 %v30_v57 }
  0xb4   :  { %254 = vmatpush.msra.mxu0 %v525_v0  ;;  %v229_v0 = vld [vmem:[%s612_s2] sm:$0xff] }
  0xb5   :  { %255 = vmatmul.f32.vlgmr.msra.gmra.mxu0 %v227_v36  ;;  %232 = vperm.xlu1 %467, %v229_v0  }
  0xdf   :  { %v419_v30 = vpop.permute.xlu2 %418 }
  0xe0   :  { %v421_v32 = vunpack.i.h.bf16 %v419_v30  ;;  %v420_v33 = vunpack.i.l.bf16 %v419_v30 }
  0xe2   :  { %v214_v38 = vsel %vm204_vm4, %v420_v33, %v421_v32 }
  0xe7   :  { %v439_v48 = vpop.permute.xlu2 %438 }
  0xe8   :  { %v441_v49 = vunpack.i.h.bf16 %v439_v48  ;;  %v440_v50 = vunpack.i.l.bf16 %v439_v48 }
  0xea   :  { %v210_v58 = vsel %vm204_vm4, %v440_v50, %v441_v49 }
  0xee   :  { %v414_v31 = vpop.permute.xlu0 %413 }
  0xef   :  { %v416_v34 = vunpack.i.h.bf16 %v414_v31  ;;  %v415_v35 = vunpack.i.l.bf16 %v414_v31  ;;  %v459_v60 = vpop.permute.xlu2 %458 }
  0xf0   :  { %v461_v63 = vunpack.i.h.bf16 %v459_v60  ;;  %v460_v1 = vunpack.i.l.bf16 %v459_v60 }
  0xf1   :  { %v215_v37 = vsel %vm204_vm4, %v415_v35, %v416_v34 }
  0xf2   :  { %264 = vmatpush.msra.mxu1 %v215_v37  ;;  %v206_v10 = vsel %vm204_vm4, %v460_v1, %v461_v63 }
  0xf4   :  { %265 = vmatpush.msra.mxu1 %v214_v38 }
  0xf6   :  { %v424_v40 = vpop.permute.xlu0 %423  ;;  %v429_v41 = vpop.permute.xlu1 %428 }
  0xf7   :  { %v426_v42 = vunpack.i.h.bf16 %v424_v40  ;;  %v425_v43 = vunpack.i.l.bf16 %v424_v40  ;;  %v431_v44 = vunpack.i.h.bf16 %v429_v41  ;;  %v430_v45 = vunpack.i.l.bf16 %v429_v41 }
  0xf9   :  { %v213_v46 = vsel %vm204_vm4, %v425_v43, %v426_v42  ;;  %v212_v47 = vsel %vm204_vm4, %v430_v45, %v431_v44 }
  0xfa   :  { %266 = vmatpush.msra.mxu1 %v213_v46 }
  0xfc   :  { %267 = vmatpush.msra.mxu1 %v212_v47 }
  0xfe   :  { %v434_v51 = vpop.permute.xlu0 %433  ;;  %v444_v52 = vpop.permute.xlu1 %443 }
  0xff   :  { %v436_v53 = vunpack.i.h.bf16 %v434_v51  ;;  %v435_v54 = vunpack.i.l.bf16 %v434_v51  ;;  %v446_v55 = vunpack.i.h.bf16 %v444_v52  ;;  %v445_v56 = vunpack.i.l.bf16 %v444_v52 }
 0x101   :  { %v211_v57 = vsel %vm204_vm4, %v435_v54, %v436_v53  ;;  %v209_v59 = vsel %vm204_vm4, %v445_v56, %v446_v55 }
 0x102   :  { %268 = vmatpush.msra.mxu1 %v211_v57 }
 0x104   :  { %269 = vmatpush.msra.mxu1 %v210_v58 }
 0x106   :  { %v449_v61 = vpop.permute.xlu0 %448  ;;  %270 = vmatpush.msra.mxu1 %v209_v59  ;;  %v454_v62 = vpop.permute.xlu1 %453 }
 0x107   :  { %v451_v3 = vunpack.i.h.bf16 %v449_v61  ;;  %v450_v4 = vunpack.i.l.bf16 %v449_v61  ;;  %v456_v5 = vunpack.i.h.bf16 %v454_v62  ;;  %v455_v6 = vunpack.i.l.bf16 %v454_v62 }
 0x109   :  { %v208_v7 = vsel %vm204_vm4, %v450_v4, %v451_v3  ;;  %v207_v8 = vsel %vm204_vm4, %v455_v6, %v456_v5 }
 0x10a   :  { %271 = vmatpush.msra.mxu1 %v208_v7 }
 0x10c   :  { %272 = vmatpush.msra.mxu1 %v207_v8 }
 0x10e   :  { %v464_v11 = vpop.permute.xlu0 %463  ;;  %273 = vmatpush.msra.mxu1 %v206_v10 }
 0x10f   :  { %v466_v12 = vunpack.i.h.bf16 %v464_v11  ;;  %v465_v13 = vunpack.i.l.bf16 %v464_v11 }
 0x111   :  { %v205_v15 = vsel %vm204_vm4, %v465_v13, %v466_v12 }
 0x112   :  { %274 = vmatpush.msra.mxu1 %v205_v15 }
 0x113   :  { %289 = vmatmul.msk.f32.vlgmr.msra.gmra.mxu1 %vm235_vm5, %v228_v14 }
 0x127   :  { %v233_v16 = vpop.permute.xlu1 %232 }
 0x132   :  { %v256_v17 = vpop.f32.mrf.mxu0 }
 0x133   :  { %v257_v18 = vadd.f32 %v256_v17, %v233_v16 }
 0x190   :  { %v276_v20 = vpop.f32.mrf.mxu1 }
 0x191   :  { %v277_v2 = vadd.f32 %v276_v20, %v257_v18 }
 0x193   :  { %v283_v22 = vmul.f32 %v469_v19, %v277_v2 }
 0x195   :  { %284 = vst [vmem:[%s613_s5] sm:$0xff] %v283_v22 }

</bundles_post_ra>
